<compile_context>
chip_gen: v6e
topology: v6e:2x2x1
jax: 0.10.0
libtpu: 0.0.40
codegen_flags: <defaults>
</compile_context>

<pallas_src>
import functools

import jax
import jax.numpy as jnp
from jax import lax
from jax.experimental import pallas as pl
from jax.experimental.pallas import tpu as pltpu

EPS = 1e-5                       # torch.nn.LayerNorm default eps
_HIGHEST = lax.Precision.HIGHEST  # keep f32 accuracy through the MXU


# ----------------------------------------------------------------------------- kernel
def _blockwise_embed_kernel(x_ref, w_ref, b_ref, g1_ref, b1_ref, g2_ref, b2_ref,
                            red_in_ref, bcast_in_ref, red_out_ref, bcast_out_ref,
                            o_ref, *, patch_dim, dim):
    """Fused grouped-LayerNorm -> block-diagonal Linear -> grouped-LayerNorm.

    x_ref:      (tile, pack*patch_dim)  `pack` patch rows packed along lanes
    w_ref:      (pack*patch_dim, pack*dim)  block-diagonal packed weight of this channel block
    b_ref:      (1, pack*dim)           packed bias
    g1/b1:      (1, pack*patch_dim)     pre_norm gamma/beta (tiled `pack` times)
    g2/b2:      (1, pack*dim)           post_norm gamma/beta (tiled `pack` times)
    red_in:     (pack*patch_dim, pack)  0/1 segment-reduce matrix (per-row groups)
    bcast_in:   (pack, pack*patch_dim)  its transpose (broadcast back to lanes)
    red_out:    (pack*dim, pack), bcast_out: (pack, pack*dim)  same for the output groups
    o_ref:      (tile, pack*dim)        lane-dense output tile
    """
    f32 = jnp.float32
    x = x_ref[...].astype(f32)

    def _dot(a, b):
        return jnp.dot(a, b, precision=_HIGHEST, preferred_element_type=f32)

    def grouped_layernorm(v, red_ref, bcast_ref, gamma_ref, beta_ref, group_size):
        red = red_ref[...].astype(f32)
        bc = bcast_ref[...].astype(f32)
        inv_n = 1.0 / group_size
        # one-pass statistics per lane-group (each group = one original row)
        mu = _dot(v, red) * inv_n                       # (tile, pack)
        ms = _dot(v * v, red) * inv_n                   # (tile, pack)
        var = jnp.maximum(ms - mu * mu, 0.0)            # biased variance
        rstd = lax.rsqrt(var + EPS)
        mu_l = _dot(mu, bc)                             # broadcast back to lanes
        rstd_l = _dot(rstd, bc)
        return (v - mu_l) * rstd_l * gamma_ref[...].astype(f32) + beta_ref[...].astype(f32)

    # pre_norm over each patch_dim lane-group
    xn = grouped_layernorm(x, red_in_ref, bcast_in_ref, g1_ref, b1_ref, patch_dim)
    # blockwise Linear: block-diagonal packed weight keeps rows independent
    y = _dot(xn, w_ref[...].astype(f32)) + b_ref[...].astype(f32)
    # post_norm over each dim lane-group
    yn = grouped_layernorm(y, red_out_ref, bcast_out_ref, g2_ref, b2_ref, dim)
    o_ref[...] = yn.astype(o_ref.dtype)


# ----------------------------------------------------------------------------- helpers
def _choose_pack(patch_dim, dim, n, max_pack=16):
    """Rows packed per super-row: make output (and ideally input) lane width a multiple of 128."""
    p = 1
    while (p < max_pack and n % (2 * p) == 0
           and ((p * dim) % 128 != 0 or (p * patch_dim) % 128 != 0)):
        p *= 2
    return p


def _choose_tile(n_packed, target):
    """Largest divisor of n_packed that is <= target and a multiple of 8 (or the full extent)."""
    if n_packed <= target:
        return n_packed
    cands = [t for t in range(8, n_packed + 1, 8) if n_packed % t == 0 and t <= target]
    return max(cands) if cands else n_packed


def _rearrange_to_patches(x, num_blocks, p0, p1, p2):
    """'b (c p0) (h p1) (w p2) -> b c (h w) (p0 p1 p2)'  (plain-JAX glue)."""
    B, C, H, W = x.shape
    h, w = H // p1, W // p2
    t = x.reshape(B, num_blocks, p0, h, p1, w, p2)
    t = jnp.transpose(t, (0, 1, 3, 5, 2, 4, 6))           # b c h w p0 p1 p2
    return t.reshape(B, num_blocks, h * w, p0 * p1 * p2)


# ----------------------------------------------------------------------------- wrapper
@functools.partial(jax.jit, static_argnames=("p0", "p1", "p2", "tile_rows"))
def blockwise_patch_embed(x, params, *, p0, p1, p2, tile_rows=4096):
    w = params["w"]          # (num_blocks, patch_dim, dim)  (transposed vs. torch Linear)
    b = params["b"]          # (num_blocks, dim)
    g1, b1 = params["g1"], params["b1"]   # (patch_dim,)
    g2, b2 = params["g2"], params["b2"]   # (dim,)

    B, C, H, W = x.shape
    num_blocks, patch_dim, dim = w.shape
    assert C == num_blocks * p0 and patch_dim == p0 * p1 * p2
    n = (H // p1) * (W // p2)

    patches = _rearrange_to_patches(x, num_blocks, p0, p1, p2)   # (B, g, n, patch_dim)

    # ---- lane packing (pure contiguous reinterpretation of the same HBM bytes) ----
    pack = _choose_pack(patch_dim, dim, n)
    lin, lout = pack * patch_dim, pack * dim
    n_packed = n // pack
    x_pack = patches.reshape(B, num_blocks, n_packed, lin)

    # packed parameters
    f32 = jnp.float32
    eye = jnp.eye(pack, dtype=w.dtype)
    w_pack = jnp.einsum("gkd,pq->gpkqd", w, eye).reshape(num_blocks, lin, lout)
    b_pack = jnp.tile(b[:, None, :], (1, 1, pack))                # (g, 1, lout)
    g1p = jnp.tile(g1, pack)[None, :].astype(f32)                 # (1, lin)
    b1p = jnp.tile(b1, pack)[None, :].astype(f32)
    g2p = jnp.tile(g2, pack)[None, :].astype(f32)                 # (1, lout)
    b2p = jnp.tile(b2, pack)[None, :].astype(f32)

    # 0/1 segment reduce / broadcast matrices for the grouped LayerNorms
    red_in = ((jnp.arange(lin) // patch_dim)[:, None] == jnp.arange(pack)[None, :]).astype(f32)
    bcast_in = red_in.T
    red_out = ((jnp.arange(lout) // dim)[:, None] == jnp.arange(pack)[None, :]).astype(f32)
    bcast_out = red_out.T

    # ---- tiling / grid ----
    tile_r = _choose_tile(n_packed, max(8, tile_rows // pack))
    grid = (B, num_blocks, n_packed // tile_r)

    itemsize = jnp.dtype(x.dtype).itemsize
    tile_in_b = tile_r * lin * itemsize
    tile_out_b = tile_r * lout * itemsize
    const_b = 4 * (lin * lout + lout + 2 * lin + 2 * lout + 2 * pack * (lin + lout))
    vmem_limit = int(min(64 << 20,
                         max(32 << 20, 2 * (tile_in_b + tile_out_b) + 2 * const_b + (4 << 20))))

    total_rows = B * num_blocks * n
    cost = pl.CostEstimate(
        flops=int(2 * total_rows * patch_dim * dim + 8 * total_rows * (patch_dim + dim)),
        transcendentals=int(2 * total_rows),
        bytes_accessed=int(x_pack.size * itemsize + total_rows * dim * itemsize
                           + w_pack.size * jnp.dtype(w_pack.dtype).itemsize),
    )

    kernel = functools.partial(_blockwise_embed_kernel, patch_dim=patch_dim, dim=dim)

    out_packed = pl.pallas_call(
        kernel,
        out_shape=jax.ShapeDtypeStruct((B, num_blocks, n_packed, lout), x.dtype),
        grid_spec=pltpu.PrefetchScalarGridSpec(
            num_scalar_prefetch=0,
            grid=grid,
            in_specs=[
                pl.BlockSpec((None, None, tile_r, lin), lambda bi, gi, ri: (bi, gi, ri, 0)),
                pl.BlockSpec((None, lin, lout),         lambda bi, gi, ri: (gi, 0, 0)),
                pl.BlockSpec((None, 1, lout),           lambda bi, gi, ri: (gi, 0, 0)),
                pl.BlockSpec((1, lin),                  lambda bi, gi, ri: (0, 0)),
                pl.BlockSpec((1, lin),                  lambda bi, gi, ri: (0, 0)),
                pl.BlockSpec((1, lout),                 lambda bi, gi, ri: (0, 0)),
                pl.BlockSpec((1, lout),                 lambda bi, gi, ri: (0, 0)),
                pl.BlockSpec((lin, pack),               lambda bi, gi, ri: (0, 0)),
                pl.BlockSpec((pack, lin),               lambda bi, gi, ri: (0, 0)),
                pl.BlockSpec((lout, pack),              lambda bi, gi, ri: (0, 0)),
                pl.BlockSpec((pack, lout),              lambda bi, gi, ri: (0, 0)),
            ],
            out_specs=pl.BlockSpec((None, None, tile_r, lout),
                                   lambda bi, gi, ri: (bi, gi, ri, 0)),
        ),
        compiler_params=pltpu.CompilerParams(
            dimension_semantics=("parallel", "parallel", "parallel"),
            vmem_limit_bytes=vmem_limit,
        ),
        cost_estimate=cost,
    )(x_pack, w_pack, b_pack, g1p, b1p, g2p, b2p, red_in, bcast_in, red_out, bcast_out)

    # (B, g, n_packed, pack*dim) is the same bytes as (B, g*n, dim), row-major.
    return out_packed.reshape(B, num_blocks * n, dim)


# ----------------------------------------------------------------------------- reference
def reference(x, params, *, p0, p1, p2):
    """Pure-JAX mirror of the PyTorch forward (pre_norm -> blockwise Linear -> post_norm)."""
    w, b = params["w"], params["b"]
    g1, b1, g2, b2 = params["g1"], params["b1"], params["g2"], params["b2"]
    B, C, H, W = x.shape
    num_blocks, patch_dim, dim = w.shape
    n = (H // p1) * (W // p2)

    patches = _rearrange_to_patches(x, num_blocks, p0, p1, p2).astype(jnp.float32)

    def ln(v, gamma, beta):
        mu = jnp.mean(v, axis=-1, keepdims=True)
        var = jnp.mean((v - mu) ** 2, axis=-1, keepdims=True)
        return (v - mu) / jnp.sqrt(var + EPS) * gamma + beta

    pre = ln(patches, g1, b1)
    y = jnp.einsum("bgnk,gkd->bgnd", pre, w.astype(jnp.float32),
                   precision=_HIGHEST) + b[:, None, :]
    y = y.reshape(B, num_blocks * n, dim)
    return ln(y, g2, b2).astype(x.dtype)


# ----------------------------------------------------------------------------- demo
if __name__ == "__main__":
    # patch_depth=4, patch_height=2, patch_width=2 -> patch_dim = 16
    # num_channels=8 -> num_blocks = 2 (exercises the blockwise weights), dim = 32
    p0, p1, p2 = 4, 2, 2
    num_channels, dim = 8, 32
    B, H, W = 2, 16, 16
    num_blocks = num_channels // p0
    patch_dim = p0 * p1 * p2

    key = jax.random.PRNGKey(0)
    kx, kw, kb, kg1, kb1, kg2, kb2 = jax.random.split(key, 7)

    x = jax.random.normal(kx, (B, num_channels, H, W), dtype=jnp.float32)
    params = {
        # nn.Linear(patch_dim, dim) per block: torch weight is (dim, patch_dim); stored transposed.
        "w": 0.05 * jax.random.normal(kw, (num_blocks, patch_dim, dim), dtype=jnp.float32),
        "b": 0.01 * jax.random.normal(kb, (num_blocks, dim), dtype=jnp.float32),
        "g1": 1.0 + 0.1 * jax.random.normal(kg1, (patch_dim,), dtype=jnp.float32),
        "b1": 0.1 * jax.random.normal(kb1, (patch_dim,), dtype=jnp.float32),
        "g2": 1.0 + 0.1 * jax.random.normal(kg2, (dim,), dtype=jnp.float32),
        "b2": 0.1 * jax.random.normal(kb2, (dim,), dtype=jnp.float32),
    }

    out = blockwise_patch_embed(x, params, p0=p0, p1=p1, p2=p2)
    out = jax.block_until_ready(out)

    ref = reference(x, params, p0=p0, p1=p1, p2=p2)
    n = (H // p1) * (W // p2)
    assert out.shape == (B, num_blocks * n, dim), out.shape
    err = float(jnp.max(jnp.abs(out - ref)))
    # Tolerance leaves headroom for possible multi-pass-bf16 MXU lowering of the in-kernel
    # f32 dots vs. the XLA reference; any structural/logic bug produces O(1) errors.
    assert err < 2e-2, err

    print("KERNEL_OK")
</pallas_src>

<mosaic_0001>
module attributes {stable_mosaic.version = 11 : i64} {
  func.func @_blockwise_embed_kernel(%arg0: i32, %arg1: i32, %arg2: i32, %arg3: memref<1x1x8x128xf32, #tpu.memory_space<vmem>>, %arg4: memref<1x128x256xf32, #tpu.memory_space<vmem>>, %arg5: memref<1x1x256xf32, #tpu.memory_space<vmem>>, %arg6: memref<1x128xf32, #tpu.memory_space<vmem>>, %arg7: memref<1x128xf32, #tpu.memory_space<vmem>>, %arg8: memref<1x256xf32, #tpu.memory_space<vmem>>, %arg9: memref<1x256xf32, #tpu.memory_space<vmem>>, %arg10: memref<128x8xf32, #tpu.memory_space<vmem>>, %arg11: memref<8x128xf32, #tpu.memory_space<vmem>>, %arg12: memref<256x8xf32, #tpu.memory_space<vmem>>, %arg13: memref<8x256xf32, #tpu.memory_space<vmem>>, %arg14: memref<1x1x8x256xf32, #tpu.memory_space<vmem>>) attributes {dimension_semantics = [#tpu.dimension_semantics<parallel>, #tpu.dimension_semantics<parallel>, #tpu.dimension_semantics<parallel>], iteration_bounds = array<i64: 2, 2, 1>, scalar_prefetch = 0 : i64, scratch_operands = 0 : i64, tpu.core_type = #tpu.core_type<tc>, window_params = [{transform_indices = @transform_0, window_bounds = array<i64: 1, 1, 8, 128>}, {transform_indices = @transform_1, window_bounds = array<i64: 1, 128, 256>}, {transform_indices = @transform_2, window_bounds = array<i64: 1, 1, 256>}, {pipeline_mode = #tpu.pipeline_mode<synchronous>, transform_indices = @transform_3, window_bounds = array<i64: 1, 128>}, {pipeline_mode = #tpu.pipeline_mode<synchronous>, transform_indices = @transform_4, window_bounds = array<i64: 1, 128>}, {pipeline_mode = #tpu.pipeline_mode<synchronous>, transform_indices = @transform_5, window_bounds = array<i64: 1, 256>}, {pipeline_mode = #tpu.pipeline_mode<synchronous>, transform_indices = @transform_6, window_bounds = array<i64: 1, 256>}, {pipeline_mode = #tpu.pipeline_mode<synchronous>, transform_indices = @transform_7, window_bounds = array<i64: 128, 8>}, {pipeline_mode = #tpu.pipeline_mode<synchronous>, transform_indices = @transform_8, window_bounds = array<i64: 8, 128>}, {pipeline_mode = #tpu.pipeline_mode<synchronous>, transform_indices = @transform_9, window_bounds = array<i64: 256, 8>}, {pipeline_mode = #tpu.pipeline_mode<synchronous>, transform_indices = @transform_10, window_bounds = array<i64: 8, 256>}, {transform_indices = @transform_11, window_bounds = array<i64: 1, 1, 8, 256>}]} {
    %c0 = arith.constant 0 : index
    %c0_0 = arith.constant 0 : index
    %c0_1 = arith.constant 0 : index
    %c0_2 = arith.constant 0 : index
    %0 = vector.load %arg3[%c0, %c0_0, %c0_1, %c0_2] : memref<1x1x8x128xf32, #tpu.memory_space<vmem>>, vector<1x1x8x128xf32>
    %1 = vector.shape_cast %0 : vector<1x1x8x128xf32> to vector<8x128xf32>
    %c0_3 = arith.constant 0 : index
    %c0_4 = arith.constant 0 : index
    %2 = vector.load %arg10[%c0_3, %c0_4] : memref<128x8xf32, #tpu.memory_space<vmem>>, vector<128x8xf32>
    %c0_5 = arith.constant 0 : index
    %c0_6 = arith.constant 0 : index
    %3 = vector.load %arg11[%c0_5, %c0_6] : memref<8x128xf32, #tpu.memory_space<vmem>>, vector<8x128xf32>
    %cst = arith.constant dense<0.000000e+00> : vector<8x8xf32>
    %4 = tpu.matmul %1, %2, %cst {dimension_numbers = #tpu.dot_dimension_numbers<[1], [0], [0], [1], [0, 0, 1, 1], [], []>, precision = #tpu.contract_precision<fp32>} : vector<8x128xf32>, vector<128x8xf32>, vector<8x8xf32> -> vector<8x8xf32>
    %cst_7 = arith.constant 6.250000e-02 : f32
    %5 = vector.broadcast %cst_7 : f32 to vector<8x8xf32>
    %6 = arith.mulf %4, %5 : vector<8x8xf32>
    %7 = arith.mulf %1, %1 : vector<8x128xf32>
    %cst_8 = arith.constant dense<0.000000e+00> : vector<8x8xf32>
    %8 = tpu.matmul %7, %2, %cst_8 {dimension_numbers = #tpu.dot_dimension_numbers<[1], [0], [0], [1], [0, 0, 1, 1], [], []>, precision = #tpu.contract_precision<fp32>} : vector<8x128xf32>, vector<128x8xf32>, vector<8x8xf32> -> vector<8x8xf32>
    %cst_9 = arith.constant 6.250000e-02 : f32
    %9 = vector.broadcast %cst_9 : f32 to vector<8x8xf32>
    %10 = arith.mulf %8, %9 : vector<8x8xf32>
    %11 = arith.mulf %6, %6 : vector<8x8xf32>
    %12 = arith.subf %10, %11 : vector<8x8xf32>
    %cst_10 = arith.constant 0.000000e+00 : f32
    %13 = vector.broadcast %cst_10 : f32 to vector<8x8xf32>
    %14 = arith.maximumf %12, %13 : vector<8x8xf32>
    %cst_11 = arith.constant 9.99999974E-6 : f32
    %15 = vector.broadcast %cst_11 : f32 to vector<8x8xf32>
    %16 = arith.addf %14, %15 : vector<8x8xf32>
    %17 = math.rsqrt %16 : vector<8x8xf32>
    %cst_12 = arith.constant dense<0.000000e+00> : vector<8x128xf32>
    %18 = tpu.matmul %6, %3, %cst_12 {dimension_numbers = #tpu.dot_dimension_numbers<[1], [0], [0], [1], [0, 0, 1, 1], [], []>, precision = #tpu.contract_precision<fp32>} : vector<8x8xf32>, vector<8x128xf32>, vector<8x128xf32> -> vector<8x128xf32>
    %cst_13 = arith.constant dense<0.000000e+00> : vector<8x128xf32>
    %19 = tpu.matmul %17, %3, %cst_13 {dimension_numbers = #tpu.dot_dimension_numbers<[1], [0], [0], [1], [0, 0, 1, 1], [], []>, precision = #tpu.contract_precision<fp32>} : vector<8x8xf32>, vector<8x128xf32>, vector<8x128xf32> -> vector<8x128xf32>
    %20 = arith.subf %1, %18 : vector<8x128xf32>
    %21 = arith.mulf %20, %19 : vector<8x128xf32>
    %c0_14 = arith.constant 0 : index
    %c0_15 = arith.constant 0 : index
    %22 = vector.load %arg6[%c0_14, %c0_15] : memref<1x128xf32, #tpu.memory_space<vmem>>, vector<1x128xf32>
    %23 = vector.broadcast %22 : vector<1x128xf32> to vector<8x128xf32>
    %24 = arith.mulf %21, %23 : vector<8x128xf32>
    %c0_16 = arith.constant 0 : index
    %c0_17 = arith.constant 0 : index
    %25 = vector.load %arg7[%c0_16, %c0_17] : memref<1x128xf32, #tpu.memory_space<vmem>>, vector<1x128xf32>
    %26 = vector.broadcast %25 : vector<1x128xf32> to vector<8x128xf32>
    %27 = arith.addf %24, %26 : vector<8x128xf32>
    %c0_18 = arith.constant 0 : index
    %c0_19 = arith.constant 0 : index
    %c0_20 = arith.constant 0 : index
    %28 = vector.load %arg4[%c0_18, %c0_19, %c0_20] : memref<1x128x256xf32, #tpu.memory_space<vmem>>, vector<1x128x256xf32>
    %29 = vector.shape_cast %28 : vector<1x128x256xf32> to vector<128x256xf32>
    %cst_21 = arith.constant dense<0.000000e+00> : vector<8x256xf32>
    %30 = tpu.matmul %27, %29, %cst_21 {dimension_numbers = #tpu.dot_dimension_numbers<[1], [0], [0], [1], [0, 0, 1, 1], [], []>, precision = #tpu.contract_precision<fp32>} : vector<8x128xf32>, vector<128x256xf32>, vector<8x256xf32> -> vector<8x256xf32>
    %c0_22 = arith.constant 0 : index
    %c0_23 = arith.constant 0 : index
    %c0_24 = arith.constant 0 : index
    %31 = vector.load %arg5[%c0_22, %c0_23, %c0_24] : memref<1x1x256xf32, #tpu.memory_space<vmem>>, vector<1x1x256xf32>
    %32 = vector.shape_cast %31 : vector<1x1x256xf32> to vector<1x256xf32>
    %33 = vector.broadcast %32 : vector<1x256xf32> to vector<8x256xf32>
    %34 = arith.addf %30, %33 : vector<8x256xf32>
    %c0_25 = arith.constant 0 : index
    %c0_26 = arith.constant 0 : index
    %35 = vector.load %arg12[%c0_25, %c0_26] : memref<256x8xf32, #tpu.memory_space<vmem>>, vector<256x8xf32>
    %c0_27 = arith.constant 0 : index
    %c0_28 = arith.constant 0 : index
    %36 = vector.load %arg13[%c0_27, %c0_28] : memref<8x256xf32, #tpu.memory_space<vmem>>, vector<8x256xf32>
    %cst_29 = arith.constant dense<0.000000e+00> : vector<8x8xf32>
    %37 = tpu.matmul %34, %35, %cst_29 {dimension_numbers = #tpu.dot_dimension_numbers<[1], [0], [0], [1], [0, 0, 1, 1], [], []>, precision = #tpu.contract_precision<fp32>} : vector<8x256xf32>, vector<256x8xf32>, vector<8x8xf32> -> vector<8x8xf32>
    %cst_30 = arith.constant 3.125000e-02 : f32
    %38 = vector.broadcast %cst_30 : f32 to vector<8x8xf32>
    %39 = arith.mulf %37, %38 : vector<8x8xf32>
    %40 = arith.mulf %34, %34 : vector<8x256xf32>
    %cst_31 = arith.constant dense<0.000000e+00> : vector<8x8xf32>
    %41 = tpu.matmul %40, %35, %cst_31 {dimension_numbers = #tpu.dot_dimension_numbers<[1], [0], [0], [1], [0, 0, 1, 1], [], []>, precision = #tpu.contract_precision<fp32>} : vector<8x256xf32>, vector<256x8xf32>, vector<8x8xf32> -> vector<8x8xf32>
    %cst_32 = arith.constant 3.125000e-02 : f32
    %42 = vector.broadcast %cst_32 : f32 to vector<8x8xf32>
    %43 = arith.mulf %41, %42 : vector<8x8xf32>
    %44 = arith.mulf %39, %39 : vector<8x8xf32>
    %45 = arith.subf %43, %44 : vector<8x8xf32>
    %cst_33 = arith.constant 0.000000e+00 : f32
    %46 = vector.broadcast %cst_33 : f32 to vector<8x8xf32>
    %47 = arith.maximumf %45, %46 : vector<8x8xf32>
    %cst_34 = arith.constant 9.99999974E-6 : f32
    %48 = vector.broadcast %cst_34 : f32 to vector<8x8xf32>
    %49 = arith.addf %47, %48 : vector<8x8xf32>
    %50 = math.rsqrt %49 : vector<8x8xf32>
    %cst_35 = arith.constant dense<0.000000e+00> : vector<8x256xf32>
    %51 = tpu.matmul %39, %36, %cst_35 {dimension_numbers = #tpu.dot_dimension_numbers<[1], [0], [0], [1], [0, 0, 1, 1], [], []>, precision = #tpu.contract_precision<fp32>} : vector<8x8xf32>, vector<8x256xf32>, vector<8x256xf32> -> vector<8x256xf32>
    %cst_36 = arith.constant dense<0.000000e+00> : vector<8x256xf32>
    %52 = tpu.matmul %50, %36, %cst_36 {dimension_numbers = #tpu.dot_dimension_numbers<[1], [0], [0], [1], [0, 0, 1, 1], [], []>, precision = #tpu.contract_precision<fp32>} : vector<8x8xf32>, vector<8x256xf32>, vector<8x256xf32> -> vector<8x256xf32>
    %53 = arith.subf %34, %51 : vector<8x256xf32>
    %54 = arith.mulf %53, %52 : vector<8x256xf32>
    %c0_37 = arith.constant 0 : index
    %c0_38 = arith.constant 0 : index
    %55 = vector.load %arg8[%c0_37, %c0_38] : memref<1x256xf32, #tpu.memory_space<vmem>>, vector<1x256xf32>
    %56 = vector.broadcast %55 : vector<1x256xf32> to vector<8x256xf32>
    %57 = arith.mulf %54, %56 : vector<8x256xf32>
    %c0_39 = arith.constant 0 : index
    %c0_40 = arith.constant 0 : index
    %58 = vector.load %arg9[%c0_39, %c0_40] : memref<1x256xf32, #tpu.memory_space<vmem>>, vector<1x256xf32>
    %59 = vector.broadcast %58 : vector<1x256xf32> to vector<8x256xf32>
    %60 = arith.addf %57, %59 : vector<8x256xf32>
    %c0_41 = arith.constant 0 : index
    %c0_42 = arith.constant 0 : index
    %c0_43 = arith.constant 0 : index
    %c0_44 = arith.constant 0 : index
    %61 = vector.load %arg14[%c0_41, %c0_42, %c0_43, %c0_44] : memref<1x1x8x256xf32, #tpu.memory_space<vmem>>, vector<1x1x8x256xf32>
    %62 = vector.shape_cast %61 : vector<1x1x8x256xf32> to vector<8x256xf32>
    %63 = vector.shape_cast %60 : vector<8x256xf32> to vector<1x1x8x256xf32>
    tpu.vector_store %arg14[%c0_41, %c0_42, %c0_43, %c0_44], %63 {strides = array<i32>} : memref<1x1x8x256xf32, #tpu.memory_space<vmem>>, vector<1x1x8x256xf32>,
    return
  }
  func.func @transform_0(%arg0: i32, %arg1: i32, %arg2: i32) -> (i32, i32, i32, i32) {
    %c0_i32 = arith.constant 0 : i32
    %c0_i32_0 = arith.constant 0 : i32
    return %arg0, %arg1, %arg2, %c0_i32 : i32, i32, i32, i32
  }
  func.func @transform_1(%arg0: i32, %arg1: i32, %arg2: i32) -> (i32, i32, i32) {
    %c0_i32 = arith.constant 0 : i32
    %c0_i32_0 = arith.constant 0 : i32
    %c0_i32_1 = arith.constant 0 : i32
    return %arg1, %c0_i32, %c0_i32_0 : i32, i32, i32
  }
  func.func @transform_2(%arg0: i32, %arg1: i32, %arg2: i32) -> (i32, i32, i32) {
    %c0_i32 = arith.constant 0 : i32
    %c0_i32_0 = arith.constant 0 : i32
    %c0_i32_1 = arith.constant 0 : i32
    return %arg1, %c0_i32, %c0_i32_0 : i32, i32, i32
  }
  func.func @transform_3(%arg0: i32, %arg1: i32, %arg2: i32) -> (i32, i32) {
    %c0_i32 = arith.constant 0 : i32
    %c0_i32_0 = arith.constant 0 : i32
    %c0_i32_1 = arith.constant 0 : i32
    return %c0_i32, %c0_i32_0 : i32, i32
  }
  func.func @transform_4(%arg0: i32, %arg1: i32, %arg2: i32) -> (i32, i32) {
    %c0_i32 = arith.constant 0 : i32
    %c0_i32_0 = arith.constant 0 : i32
    %c0_i32_1 = arith.constant 0 : i32
    return %c0_i32, %c0_i32_0 : i32, i32
  }
  func.func @transform_5(%arg0: i32, %arg1: i32, %arg2: i32) -> (i32, i32) {
    %c0_i32 = arith.constant 0 : i32
    %c0_i32_0 = arith.constant 0 : i32
    %c0_i32_1 = arith.constant 0 : i32
    return %c0_i32, %c0_i32_0 : i32, i32
  }
  func.func @transform_6(%arg0: i32, %arg1: i32, %arg2: i32) -> (i32, i32) {
    %c0_i32 = arith.constant 0 : i32
    %c0_i32_0 = arith.constant 0 : i32
    %c0_i32_1 = arith.constant 0 : i32
    return %c0_i32, %c0_i32_0 : i32, i32
  }
  func.func @transform_7(%arg0: i32, %arg1: i32, %arg2: i32) -> (i32, i32) {
    %c0_i32 = arith.constant 0 : i32
    %c0_i32_0 = arith.constant 0 : i32
    %c0_i32_1 = arith.constant 0 : i32
    return %c0_i32, %c0_i32_0 : i32, i32
  }
  func.func @transform_8(%arg0: i32, %arg1: i32, %arg2: i32) -> (i32, i32) {
    %c0_i32 = arith.constant 0 : i32
    %c0_i32_0 = arith.constant 0 : i32
    %c0_i32_1 = arith.constant 0 : i32
    return %c0_i32, %c0_i32_0 : i32, i32
  }
  func.func @transform_9(%arg0: i32, %arg1: i32, %arg2: i32) -> (i32, i32) {
    %c0_i32 = arith.constant 0 : i32
    %c0_i32_0 = arith.constant 0 : i32
    %c0_i32_1 = arith.constant 0 : i32
    return %c0_i32, %c0_i32_0 : i32, i32
  }
  func.func @transform_10(%arg0: i32, %arg1: i32, %arg2: i32) -> (i32, i32) {
    %c0_i32 = arith.constant 0 : i32
    %c0_i32_0 = arith.constant 0 : i32
    %c0_i32_1 = arith.constant 0 : i32
    return %c0_i32, %c0_i32_0 : i32, i32
  }
  func.func @transform_11(%arg0: i32, %arg1: i32, %arg2: i32) -> (i32, i32, i32, i32) {
    %c0_i32 = arith.constant 0 : i32
    %c0_i32_0 = arith.constant 0 : i32
    return %arg0, %arg1, %arg2, %c0_i32 : i32, i32, i32, i32
  }
}

</mosaic_0001>

<bundles_post_ra>
// kernel: tile.31
= control target key start
LH: loop header
LB: loop body
LE: loop exit
PB: predicated region body
PF: predicated region fallthrough
CT: control target
= control target key end

     0   :  { %s22_s0 = inlined_call_operand.vmem [shape: f32[16], index: 0, kind: input, shape index: {}]   ;;  %s23_s1 = inlined_call_operand.vmem [shape: f32[8,16], index: 1, kind: output, shape index: {}]  }
   0x1   :  { %v4_v0 = vld [vmem:[%s22_s0] ss:$0 sm:$0xff] }
   0x2   :  { %5 = vst [vmem:[%s23_s1] sm:$0xff] %v4_v0 }

// kernel: tile.32
= control target key start
LH: loop header
LB: loop body
LE: loop exit
PB: predicated region body
PF: predicated region fallthrough
CT: control target
= control target key end

     0   :  { %s69_s10 = smov 112   ;;  %s70_s11 = smov 80   ;;  %vm3_vm0 = vcmask 130048   ;;  %vm9_vm1 = vcmask 1048448   ;;  %vm15_vm2 = vcmask 917248   ;;  %vm21_vm3 = vcmask 786048   ;;  %s113_s0 = inlined_call_operand.vmem [shape: f32[8,16], index: 0, kind: input, shape index: {}]   ;;  %s114_s1 = inlined_call_operand.vmem [shape: f32[1,128], index: 1, kind: output, shape index: {}]  }
   0x1   :  { %v55_v0 = vld [vmem:[%s113_s0 + $0x7] sm:$0x1]   ;;  %v57_v1 = vld [vmem:[%s113_s0 + $0x5] sm:$0x1]   ;;  %v56_v2 = vld [vmem:[%s113_s0 + $0x6] sm:$0x1]  }
   0x2   :  { %7 = vrot.lane.b32.xlu0 %v55_v0, %s69_s10  ;;  %19 = vrot.lane.b32.xlu1 %v57_v1, %s70_s11  ;;  %v58_v3 = vld [vmem:[%s113_s0 + $0x4] sm:$0x1]   ;;  %v2_v4 = vld [vmem:[%s113_s0] sm:$0x1]   ;;  %s71_s18 = smov 96   ;;  %s72_s19 = smov 64  }
   0x3   :  { %4 = vst.msk [vmem:[#allocation0] sm:$0x1] %vm3_vm0, %v2_v4   ;;  %v59_v5 = vld [vmem:[%s113_s0 + $0x3] sm:$0x1]   ;;  %v60_v6 = vld [vmem:[%s113_s0 + $0x2] sm:$0x1]  }
   0x4   :  { %s73_s24 = smov 48   ;;  %s74_s25 = smov 32   ;;  %v61_v7 = vld [vmem:[%s113_s0 + $0x1] sm:$0x1]   ;;  %vm27_vm4 = vcmask 654848   ;;  %vm33_vm5 = vcmask 523648  }
   0x5   :  { %s75_s0 = smov 16   ;;  %vm39_vm6 = vcmask 392448   ;;  %vm45_vm7 = vcmask 261248  }
   0x6   :  { %13 = vrot.lane.b32.xlu0 %v56_v2, %s71_s18  ;;  %25 = vrot.lane.b32.xlu1 %v58_v3, %s72_s19 }
   0xa   :  { %31 = vrot.lane.b32.xlu0 %v59_v5, %s73_s24  ;;  %37 = vrot.lane.b32.xlu1 %v60_v6, %s74_s25 }
   0xe   :  { %43 = vrot.lane.b32.xlu0 %v61_v7, %s75_s0 }
  0x74   :  { %v8_v8 = vpop.permute.xlu0 %7   ;;  %v20_v9 = vpop.permute.xlu1 %19  }
  0x75   :  { %10 = vst.msk [vmem:[#allocation0] sm:$0x1] %vm9_vm1, %v8_v8  }
  0x78   :  { %v14_v10 = vpop.permute.xlu0 %13   ;;  %v26_v11 = vpop.permute.xlu1 %25  }
  0x79   :  { %16 = vst.msk [vmem:[#allocation0] sm:$0x1] %vm15_vm2, %v14_v10  }
  0x7a   :  { %22 = vst.msk [vmem:[#allocation0] sm:$0x1] %vm21_vm3, %v20_v9  }
  0x7b   :  { %28 = vst.msk [vmem:[#allocation0] sm:$0x1] %vm27_vm4, %v26_v11  }
  0x7c   :  { %v32_v12 = vpop.permute.xlu0 %31   ;;  %v38_v13 = vpop.permute.xlu1 %37  }
  0x7d   :  { %34 = vst.msk [vmem:[#allocation0] sm:$0x1] %vm33_vm5, %v32_v12  }
  0x7e   :  { %40 = vst.msk [vmem:[#allocation0] sm:$0x1] %vm39_vm6, %v38_v13  }
  0x80   :  { %v44_v14 = vpop.permute.xlu0 %43  }
  0x81   :  { %46 = vst.msk [vmem:[#allocation0] sm:$0x1] %vm45_vm7, %v44_v14  }
  0x88   :  { %v51_v15 = vld [vmem:[#allocation0] sm:$0x1] }
  0x89   :  { %54 = vst [vmem:[%s114_s1] sm:$0x1] %v51_v15 }

// kernel: tile.41
= control target key start
LH: loop header
LB: loop body
LE: loop exit
PB: predicated region body
PF: predicated region fallthrough
CT: control target
= control target key end

     0   :  { %s22_s0 = inlined_call_operand.vmem [shape: f32[32], index: 0, kind: input, shape index: {}]   ;;  %s23_s1 = inlined_call_operand.vmem [shape: f32[8,32], index: 1, kind: output, shape index: {}]  }
   0x1   :  { %v4_v0 = vld [vmem:[%s22_s0] ss:$0 sm:$0xff] }
   0x2   :  { %5 = vst [vmem:[%s23_s1] sm:$0xff] %v4_v0 }

// kernel: tile.42
= control target key start
LH: loop header
LB: loop body
LE: loop exit
PB: predicated region body
PF: predicated region fallthrough
CT: control target
= control target key end

     0   :  { %s7_s6 = smov 3  ;;  %s14_s9 = smov 3  ;;  %vm4_vm0 = vcmask 261120   ;;  %vm11_vm1 = vcmask 1048320   ;;  %vm18_vm2 = vcmask 785920   ;;  %vm25_vm3 = vcmask 523520   ;;  %s79_s0 = inlined_call_operand.vmem [shape: f32[8,32], index: 0, kind: input, shape index: {}]   ;;  %s80_s1 = inlined_call_operand.vmem [shape: f32[1,256], index: 1, kind: output, shape index: {}]  }
   0x1   :  { %v41_v0 = vld [vmem:[%s79_s0 + $0x3] ss:$4 sm:%s7_s6]   ;;  %s48_s10 = smov 96   ;;  %s21_s11 = smov 3  ;;  %v42_v1 = vld [vmem:[%s79_s0 + $0x2] ss:$4 sm:%s14_s9]  }
   0x2   :  { %9 = vrot.lane.b32.xlu0 %v41_v0, %s48_s10  ;;  %v43_v2 = vld [vmem:[%s79_s0 + $0x1] ss:$4 sm:%s21_s11]   ;;  %s2_s16 = smov 3  ;;  %s49_s17 = smov 32  }
   0x3   :  { %23 = vrot.lane.b32.xlu1 %v43_v2, %s49_s17  ;;  %v3_v3 = vld [vmem:[%s79_s0] ss:$4 sm:%s2_s16]   ;;  %s50_s0 = smov 64  }
   0x4   :  { %5 = vst.msk [vmem:[#allocation0] ss:$8 sm:$0x3] %vm4_vm0, %v3_v3  }
   0x6   :  { %16 = vrot.lane.b32.xlu0 %v42_v1, %s50_s0 }
  0x74   :  { %v10_v4 = vpop.permute.xlu0 %9  }
  0x75   :  { %12 = vst.msk [vmem:[#allocation0] ss:$8 sm:$0x3] %vm11_vm1, %v10_v4   ;;  %v24_v5 = vpop.permute.xlu1 %23  }
  0x78   :  { %v17_v6 = vpop.permute.xlu0 %16  }
  0x79   :  { %19 = vst.msk [vmem:[#allocation0] ss:$8 sm:$0x3] %vm18_vm2, %v17_v6  }
  0x7a   :  { %26 = vst.msk [vmem:[#allocation0] ss:$8 sm:$0x3] %vm25_vm3, %v24_v5  }
  0x81   :  { %v31_v7 = vld [vmem:[#allocation0] sm:$0x1]  ;;  %v36_v8 = vld [vmem:[#allocation0 + $0x8] sm:$0x1] }
  0x82   :  { %34 = vst [vmem:[%s80_s1] sm:$0x1] %v31_v7  ;;  %44 = vst [vmem:[%s80_s1 + $0x1] sm:$0x1] %v36_v8 }

// kernel: blockwise_patch_embed.1
= control target key start
LH: loop header
LB: loop body
LE: loop exit
PB: predicated region body
PF: predicated region fallthrough
CT: control target
= control target key end

     0   :  { %s7779_s17 = smov 0   ;;  %s7781_s18 = smov 0   ;;  %s10159_s0 = inlined_call_operand.vmem [shape: f32[2,2,8,128], index: 0, kind: input, shape index: {}]   ;;  %s10160_s1 = inlined_call_operand.vmem [shape: f32[2,128,256], index: 1, kind: input, shape index: {}]   ;;  %s10161_s2 = inlined_call_operand.vmem [shape: f32[2,1,256], index: 2, kind: input, shape index: {}]   ;;  %s10162_s3 = inlined_call_operand.vmem [shape: f32[1,128], index: 3, kind: input, shape index: {}]   ;;  %s10163_s4 = inlined_call_operand.vmem [shape: f32[1,128], index: 4, kind: input, shape index: {}]   ;;  %s10164_s5 = inlined_call_operand.vmem [shape: f32[1,256], index: 5, kind: input, shape index: {}]   ;;  %s10165_s6 = inlined_call_operand.vmem [shape: f32[1,256], index: 6, kind: input, shape index: {}]   ;;  %s10166_s7 = inlined_call_operand.vmem [shape: f32[128,8], index: 7, kind: input, shape index: {}]   ;;  %s10167_s8 = inlined_call_operand.vmem [shape: f32[8,128], index: 8, kind: input, shape index: {}]   ;;  %s10168_s9 = inlined_call_operand.vmem [shape: f32[256,8], index: 9, kind: input, shape index: {}]   ;;  %s10169_s10 = inlined_call_operand.vmem [shape: f32[8,256], index: 10, kind: input, shape index: {}]   ;;  %s10170_s11 = inlined_call_operand.vmem [shape: f32[2,2,8,256], index: 11, kind: output, shape index: {}]  }
   0x1   :  { %s7783_s19 = smov 0   ;;  %s7785_s20 = smov 0  }
   0x2   :  { %s7787_s21 = smov 0  }
   0x3 LB: > { %s36_s22 = sadd.s32 1, %s7707_s19  ;;  %s40_s23 = sadd.s32 1, %s7711_s20  ;;  %s7715_s21 = sphi %s7787_s21, %s21_s21   ;;  %s7711_s20 = sphi %s7785_s20, %s10729_s20   ;;  %s7707_s19 = sphi %s7783_s19, %s10728_s19   ;;  %s7703_s18 = sphi %s7781_s18, %s10727_s18   ;;  %s7699_s17 = sphi %s7779_s17, %s10726_s17  }
   0x4   : > { %p38_p0 = scmp.ge.s32.totalorder %s36_s22, 2  ;;  %p6488_p1 = scmp.ge.s32.totalorder %s7715_s21, 1 }
   0x5   : > { %p389_p2 = scmp.lt.s32.totalorder %s7715_s21, 5 }
   0x6   : > { %s10731_s22 = smov (%p38_p0, %s36_s22), 0  ;;  %s10733_s23 = smov (!%p38_p0, %s40_s23), %s7711_s20 }
   0x7   : > { %p390_p3 = pnand %p6488_p1, %p389_p2  ;;  %p42_p4 = scmp.ge.s32.totalorder %s10733_s23, 2 }
   0x9   : > { %s10735_s23 = smov (%p42_p4, %s10733_s23), 0  ;;  %393 = sbr.rel (%p390_p3) target bundleno = 1567 (0x61f), region = 64 }
   0xe   : > { %v501_v0 = vld [vmem:[%s10166_s7 + $0x78] sm:$0xff]  ;;  %v500_v1 = vld [vmem:[%s10166_s7 + $0x70] sm:$0xff]  ;;  %v499_v2 = vld [vmem:[%s10166_s7 + $0x68] sm:$0xff]  ;;  %p452_p5 = scmp.lt.s32.totalorder %s7703_s18, 1  ;;  %v10198_v3 = vmov 0.0   ;;  %vm7718_vm0 = vmmov 0  }
   0xf   : > { %7150 = vmatprep.subr.mxu0 %v10198_v3  ;;  %v7824_v4 = vand.u32 4294901760, %v501_v0  ;;  %v7826_v5 = vand.u32 4294901760, %v500_v1  ;;  %v7828_v6 = vand.u32 4294901760, %v499_v2  ;;  %v498_v7 = vld [vmem:[%s10166_s7 + $0x60] sm:$0xff]  ;;  %7185 = vmatprep.subr.mxu1 %v10198_v3  ;;  %v497_v8 = vld [vmem:[%s10166_s7 + $0x58] sm:$0xff]  ;;  %v496_v9 = vld [vmem:[%s10166_s7 + $0x50] sm:$0xff] }
  0x10   : > { %v7840_v10 = vand.u32 4294901760, %v498_v7  ;;  %v7842_v11 = vand.u32 4294901760, %v497_v8  ;;  %v7844_v12 = vand.u32 4294901760, %v496_v9  ;;  %v495_v13 = vld [vmem:[%s10166_s7 + $0x48] sm:$0xff]  ;;  %v494_v14 = vld [vmem:[%s10166_s7 + $0x40] sm:$0xff]  ;;  %7182 = vmatprep.mubr.msk.f32.mxu0 %vm7718_vm0, %v10198_v3  ;;  %7217 = vmatprep.mubr.msk.f32.mxu1 %vm7718_vm0, %v10198_v3  ;;  %v493_v19 = vld [vmem:[%s10166_s7 + $0x38] sm:$0xff] }
  0x11   : > { %7151 = vmatpush3.msra.mxu0 %v7824_v4  ;;  %v7858_v15 = vsub.f32 %v501_v0, %v7824_v4  ;;  %v7861_v16 = vsub.f32 %v500_v1, %v7826_v5  ;;  %v7863_v17 = vand.u32 4294901760, %v495_v13  ;;  %v7866_v18 = vsub.f32 %v499_v2, %v7828_v6  ;;  %s10737_s18 = smov (!%p452_p5, %s7703_s18), 1  ;;  %p454_p6 = scmp.lt.s32.totalorder %s7699_s17, 1  ;;  %v492_v26 = vld [vmem:[%s10166_s7 + $0x30] sm:$0xff]  ;;  %v491_v36 = vld [vmem:[%s10166_s7 + $0x28] sm:$0xff]  ;;  %v490_v41 = vld [vmem:[%s10166_s7 + $0x20] sm:$0xff] }
  0x12   : > { %7152 = vmatprep.subr.mxu0 %v10198_v3  ;;  %v7878_v20 = vsub.f32 %v498_v7, %v7840_v10  ;;  %v7881_v21 = vsub.f32 %v497_v8, %v7842_v11  ;;  %v7894_v25 = vand.u32 4294901760, %v494_v14  ;;  %s6489_s13 = sshll.u32 %s10737_s18, 1  ;;  %v7904_v28 = vand.u32 4294901760, %v493_v19  ;;  %v489_v49 = vld [vmem:[%s10166_s7 + $0x18] sm:$0xff]  ;;  %v488_v54 = vld [vmem:[%s10166_s7 + $0x10] sm:$0xff]  ;;  %v487_v60 = vld [vmem:[%s10166_s7 + $0x8] sm:$0xff] }
  0x13   : > { %7153 = vmatpush3.msra.mxu0 %v7826_v5  ;;  %v7886_v22 = vand.u32 4294901760, %v7858_v15  ;;  %v7889_v23 = vand.u32 4294901760, %v7861_v16  ;;  %v7892_v24 = vand.u32 4294901760, %v7866_v18  ;;  %v7910_v30 = vsub.f32 %v496_v9, %v7844_v12  ;;  %s10739_s17 = smov (!%p454_p6, %s7699_s17), 1  ;;  %v486_v7 = vld [vmem:[%s10166_s7] sm:$0xff] }
  0x14   : > { %7154 = vmatprep.subr.mxu0 %v10198_v3  ;;  %v7902_v27 = vand.u32 4294901760, %v7878_v20  ;;  %v7907_v29 = vand.u32 4294901760, %v7881_v21  ;;  %v7923_v34 = vsub.f32 %v495_v13, %v7863_v17  ;;  %v7926_v35 = vand.u32 4294901760, %v492_v26  ;;  %s460_s16 = sadd.s32 %s6489_s13, %s10739_s17  ;;  %s6501_s28 = sshll.u32 %s10739_s17, 8 }
  0x15   : > { %7155 = vmatpush3.msra.mxu0 %v7828_v6  ;;  %v598_v31 = vsub.f32 %v7858_v15, %v7886_v22  ;;  %v605_v32 = vsub.f32 %v7861_v16, %v7889_v23  ;;  %v612_v33 = vsub.f32 %v7866_v18, %v7892_v24  ;;  %v7940_v40 = vand.u32 4294901760, %v7910_v30  ;;  %s6490_s26 = sshll.u32 %s460_s16, 3  ;;  %s8565_s13 = scalar_lea.vmem %s10160_s1, %s6501_s28 }
  0x16   : > { %7156 = vmatprep.subr.mxu0 %v10198_v3  ;;  %v619_v39 = vsub.f32 %v7878_v20, %v7902_v27  ;;  %v626_v42 = vsub.f32 %v7881_v21, %v7907_v29  ;;  %v7949_v43 = vsub.f32 %v494_v14, %v7894_v25  ;;  %s7954_s29 = scalar_lea.vmem %s10159_s0, %s6490_s26  ;;  %v7960_v45 = vand.u32 4294901760, %v491_v36  ;;  %s6493_s28 = sshll.u32 %s10739_s17, 1 }
  0x17   : > { %7157 = vmatpush3.msra.mxu0 %v7840_v10  ;;  %v7933_v37 = vand.u32 4294901760, %v598_v31  ;;  %v7935_v38 = vand.u32 4294901760, %v605_v32  ;;  %v7958_v44 = vand.u32 4294901760, %v612_v33  ;;  %v7963_v46 = vand.u32 4294901760, %v7923_v34  ;;  %v7976_v50 = vld [vmem:[%s7954_s29] sm:$0xff] }
  0x18   : > { %7158 = vmatprep.subr.mxu0 %v10198_v3  ;;  %v7966_v47 = vsub.f32 %v493_v19, %v7904_v28  ;;  %v7970_v48 = vand.u32 4294901760, %v490_v41  ;;  %v7980_v51 = vand.u32 4294901760, %v619_v39  ;;  %v633_v52 = vsub.f32 %v7910_v30, %v7940_v40 }
  0x19   : > { %7159 = vmatpush3.msra.mxu0 %v7842_v11  ;;  %7186 = vmatpush3.msra.mxu1 %v7933_v37  ;;  %10404 = vst [vmem:[#allocation2_spill] sm:$0xff] %v7958_v44  ;;  %v7985_v53 = vand.u32 4294901760, %v7949_v43  ;;  %v7991_v55 = vsub.f32 %v492_v26, %v7926_v35  ;;  %v7995_v56 = vand.u32 4294901760, %v626_v42  ;;  %v640_v58 = vsub.f32 %v7923_v34, %v7963_v46 }
  0x1a   : > { %7160 = vmatprep.subr.mxu0 %v10198_v3  ;;  %7187 = vmatprep.subr.mxu1 %v10198_v3  ;;  %10405 = vst [vmem:[#allocation3_spill] sm:$0xff] %v7980_v51  ;;  %v7998_v57 = vand.u32 4294901760, %v7966_v47  ;;  %v8004_v59 = vand.u32 4294901760, %v489_v49  ;;  %v8010_v61 = vsub.f32 %v491_v36, %v7960_v45  ;;  %v8013_v62 = vand.u32 4294901760, %v7976_v50 }
  0x1b   : > { %7161 = vmatpush3.msra.mxu0 %v7844_v12  ;;  %7188 = vmatpush3.msra.mxu1 %v7935_v38  ;;  %10406 = vst [vmem:[#allocation4_spill] sm:$0xff] %v7995_v56  ;;  %v8017_v63 = vand.u32 4294901760, %v488_v54  ;;  %v8021_v0 = vand.u32 4294901760, %v633_v52  ;;  %v647_v1 = vsub.f32 %v7949_v43, %v7985_v53  ;;  %v8026_v2 = vand.u32 4294901760, %v7991_v55 }
  0x1c   : > { %7162 = vmatprep.subr.mxu0 %v10198_v3  ;;  %7189 = vmatprep.subr.mxu1 %v10198_v3  ;;  %v8032_v8 = vsub.f32 %v490_v41, %v7970_v48  ;;  %v654_v9 = vsub.f32 %v7966_v47, %v7998_v57  ;;  %v8038_v13 = vand.u32 4294901760, %v487_v60  ;;  %v8042_v14 = vand.u32 4294901760, %v640_v58 }
  0x1d   : > { %7163 = vmatpush3.msra.mxu0 %v7863_v17  ;;  %7190 = vmatpush3.msra.mxu1 %v7958_v44  ;;  %10407 = vst [vmem:[#allocation5_spill] sm:$0xff] %v8021_v0  ;;  %v8045_v19 = vand.u32 4294901760, %v8010_v61  ;;  %v8049_v26 = vsub.f32 %v7976_v50, %v8013_v62  ;;  %v8052_v31 = vsub.f32 %v489_v49, %v8004_v59  ;;  %v8056_v32 = vand.u32 4294901760, %v486_v7 }
  0x1e   : > { %7164 = vmatprep.subr.mxu0 %v10198_v3  ;;  %7191 = vmatprep.subr.mxu1 %v10198_v3  ;;  %10408 = vst [vmem:[#allocation6_spill] sm:$0xff] %v8042_v14  ;;  %v8060_v33 = vand.u32 4294901760, %v647_v1  ;;  %v661_v36 = vsub.f32 %v7991_v55, %v8026_v2  ;;  %v8065_v39 = vand.u32 4294901760, %v8032_v8  ;;  %v8068_v41 = vsub.f32 %v488_v54, %v8017_v63 }
  0x1f   : > { %7165 = vmatpush3.msra.mxu0 %v7894_v25  ;;  %7192 = vmatpush3.msra.mxu1 %v7980_v51  ;;  %v8072_v42 = vand.u32 4294901760, %v654_v9  ;;  %v668_v49 = vsub.f32 %v8010_v61, %v8045_v19  ;;  %v8080_v58 = vand.u32 4294901760, %v8052_v31  ;;  %v8083_v54 = vsub.f32 %v487_v60, %v8038_v13 }
  0x20   : > { %7166 = vmatprep.subr.mxu0 %v10198_v3  ;;  %7193 = vmatprep.subr.mxu1 %v10198_v3  ;;  %10409 = vst [vmem:[#allocation7_spill] sm:$0xff] %v8060_v33  ;;  %v8089_v1 = vand.u32 4294901760, %v661_v36  ;;  %v675_v9 = vsub.f32 %v8032_v8, %v8065_v39  ;;  %v8094_v52 = vand.u32 4294901760, %v8068_v41  ;;  %v10412_v36 = vand.u32 4294901760, %v8049_v26 }
  0x21   : > { %7167 = vmatpush3.msra.mxu0 %v7904_v28  ;;  %7194 = vmatpush3.msra.mxu1 %v7995_v56  ;;  %10410 = vst [vmem:[#allocation8_spill] sm:$0xff] %v8072_v42  ;;  %v8103_v60 = vand.u32 4294901760, %v668_v49  ;;  %vm1793_vm1 = vcmask 64512  }
  0x22   : > { %7168 = vmatprep.subr.mxu0 %v10198_v3  ;;  %7195 = vmatprep.subr.mxu1 %v10198_v3  ;;  %10411 = vst [vmem:[#allocation9_spill] sm:$0xff] %v8089_v1  ;;  %v8117_v49 = vand.u32 4294901760, %v675_v9 }
  0x23   : > { %7169 = vmatpush3.msra.mxu0 %v7926_v35  ;;  %7196 = vmatpush3.msra.mxu1 %v8021_v0  ;;  %v682_v0 = vsub.f32 %v8052_v31, %v8080_v58 }
  0x24   : > { %7170 = vmatprep.subr.mxu0 %v10198_v3  ;;  %7197 = vmatprep.subr.mxu1 %v10198_v3 }
  0x25   : > { %7171 = vmatpush3.msra.mxu0 %v7960_v45  ;;  %7198 = vmatpush3.msra.mxu1 %v8042_v14  ;;  %v8097_v14 = vsub.f32 %v486_v7, %v8056_v32  ;;  %v8111_v7 = vand.u32 4294901760, %v8083_v54  ;;  %v8128_v51 = vand.u32 4294901760, %v682_v0 }
  0x26   : > { %7172 = vmatprep.subr.mxu0 %v10198_v3  ;;  %7199 = vmatprep.subr.mxu1 %v10198_v3 }
  0x27   : > { %7173 = vmatpush3.msra.mxu0 %v7970_v48  ;;  %7200 = vmatpush3.msra.mxu1 %v8060_v33  ;;  %v587_v33 = vsub.f32 %v8049_v26, %v10412_v36  ;;  %v8122_v36 = vand.u32 4294901760, %v8097_v14  ;;  %v696_v9 = vsub.f32 %v8083_v54, %v8111_v7 }
  0x28   : > { %7174 = vmatprep.subr.mxu0 %v10198_v3  ;;  %7201 = vmatprep.subr.mxu1 %v10198_v3 }
  0x29   : > { %7175 = vmatpush3.msra.mxu0 %v8004_v59  ;;  %7202 = vmatpush3.msra.mxu1 %v8072_v42  ;;  %v689_v42 = vsub.f32 %v8068_v41, %v8094_v52  ;;  %v588_v56 = vand.u32 4294901760, %v587_v33  ;;  %v703_v44 = vsub.f32 %v8097_v14, %v8122_v36  ;;  %v8143_v0 = vand.u32 4294901760, %v696_v9  ;;  %v10418_v9 = vld [vmem:[#allocation6_spill] sm:$0xff] }
  0x2a   : > { %7176 = vmatprep.subr.mxu0 %v10198_v3  ;;  %7203 = vmatprep.subr.mxu1 %v10198_v3 }
  0x2b   : > { %7177 = vmatpush3.msra.mxu0 %v8017_v63  ;;  %7204 = vmatpush3.msra.mxu1 %v8089_v1  ;;  %v8136_v1 = vand.u32 4294901760, %v689_v42  ;;  %v8149_v33 = vand.u32 4294901760, %v703_v44  ;;  %v10413_v44 = vand.u32 4294901760, %v8049_v26  ;;  %v10417_v42 = vld [vmem:[#allocation5_spill] sm:$0xff] }
  0x2c   : > { %7178 = vmatprep.subr.mxu0 %v10198_v3  ;;  %7205 = vmatprep.subr.mxu1 %v10198_v3 }
  0x2d   : > { %7179 = vmatpush3.msra.mxu0 %v8038_v13  ;;  %7206 = vmatpush3.msra.mxu1 %v8103_v60 }
  0x2e   : > { %7180 = vmatprep.subr.mxu0 %v10198_v3  ;;  %7207 = vmatprep.subr.mxu1 %v10198_v3 }
  0x2f   : > { %7181 = vmatpush3.msra.mxu0 %v8056_v32  ;;  %7208 = vmatpush3.msra.mxu1 %v8117_v49 }
  0x30   : > { %7209 = vmatprep.subr.mxu1 %v10198_v3  ;;  %7220 = vmatprep.subr.mxu0 %v10198_v3 }
  0x31   : > { %7183 = vmatmul.mubr.f32.vlgmr.msra.gmra.mxu0 %v588_v56  ;;  %7210 = vmatpush3.msra.mxu1 %v8128_v51  ;;  %v1145_v56 = vmul.f32 %v7976_v50, %v7976_v50  ;;  %v10415_v50 = vld [vmem:[#allocation3_spill] sm:$0xff] }
  0x32   : > { %7221 = vmatpush3.msra.mxu0 %v7858_v15  ;;  %7211 = vmatprep.subr.mxu1 %v10198_v3 }
  0x33   : > { %7222 = vmatprep.subr.mxu0 %v10198_v3  ;;  %7212 = vmatpush3.msra.mxu1 %v8136_v1 }
  0x34   : > { %7223 = vmatpush3.msra.mxu0 %v7861_v16  ;;  %7213 = vmatprep.subr.mxu1 %v10198_v3 }
  0x35   : > { %7224 = vmatprep.subr.mxu0 %v10198_v3  ;;  %7214 = vmatpush3.msra.mxu1 %v8143_v0 }
  0x36   : > { %7225 = vmatpush3.msra.mxu0 %v7866_v18  ;;  %7215 = vmatprep.subr.mxu1 %v10198_v3 }
  0x37   : > { %7226 = vmatprep.subr.mxu0 %v10198_v3  ;;  %7216 = vmatpush3.msra.mxu1 %v8149_v33 }
  0x38   : > { %7227 = vmatpush3.msra.mxu0 %v7878_v20  ;;  %7218 = vmatmul.mubr.f32.vlgmr.msra.gmra.mxu1 %v8013_v62 }
  0x39   : > { %7228 = vmatprep.subr.mxu0 %v10198_v3  ;;  %7255 = vmatprep.subr.mxu1 %v10198_v3 }
  0x3a   : > { %7229 = vmatpush3.msra.mxu0 %v7881_v21  ;;  %7256 = vmatpush3.msra.mxu1 %v7824_v4 }
  0x3b   : > { %7230 = vmatprep.subr.mxu0 %v10198_v3  ;;  %7257 = vmatprep.subr.mxu1 %v10198_v3 }
  0x3c   : > { %7231 = vmatpush3.msra.mxu0 %v7910_v30  ;;  %7258 = vmatpush3.msra.mxu1 %v7826_v5 }
  0x3d   : > { %7232 = vmatprep.subr.mxu0 %v10198_v3  ;;  %7259 = vmatprep.subr.mxu1 %v10198_v3 }
  0x3e   : > { %7233 = vmatpush3.msra.mxu0 %v7923_v34  ;;  %7260 = vmatpush3.msra.mxu1 %v7828_v6 }
  0x3f   : > { %7234 = vmatprep.subr.mxu0 %v10198_v3  ;;  %7261 = vmatprep.subr.mxu1 %v10198_v3 }
  0x40   : > { %7235 = vmatpush3.msra.mxu0 %v7949_v43  ;;  %7262 = vmatpush3.msra.mxu1 %v7840_v10 }
  0x41   : > { %7236 = vmatprep.subr.mxu0 %v10198_v3  ;;  %7263 = vmatprep.subr.mxu1 %v10198_v3 }
  0x42   : > { %7237 = vmatpush3.msra.mxu0 %v7966_v47  ;;  %7264 = vmatpush3.msra.mxu1 %v7842_v11 }
  0x43   : > { %7238 = vmatprep.subr.mxu0 %v10198_v3  ;;  %7265 = vmatprep.subr.mxu1 %v10198_v3 }
  0x44   : > { %7239 = vmatpush3.msra.mxu0 %v7991_v55  ;;  %7266 = vmatpush3.msra.mxu1 %v7844_v12 }
  0x45   : > { %7240 = vmatprep.subr.mxu0 %v10198_v3  ;;  %7267 = vmatprep.subr.mxu1 %v10198_v3 }
  0x46   : > { %7241 = vmatpush3.msra.mxu0 %v8010_v61  ;;  %7268 = vmatpush3.msra.mxu1 %v7863_v17 }
  0x47   : > { %7242 = vmatprep.subr.mxu0 %v10198_v3  ;;  %7269 = vmatprep.subr.mxu1 %v10198_v3 }
  0x48   : > { %7243 = vmatpush3.msra.mxu0 %v8032_v8  ;;  %7270 = vmatpush3.msra.mxu1 %v7894_v25 }
  0x49   : > { %7244 = vmatprep.subr.mxu0 %v10198_v3  ;;  %7271 = vmatprep.subr.mxu1 %v10198_v3 }
  0x4a   : > { %7245 = vmatpush3.msra.mxu0 %v8052_v31  ;;  %7272 = vmatpush3.msra.mxu1 %v7904_v28 }
  0x4b   : > { %7246 = vmatprep.subr.mxu0 %v10198_v3  ;;  %7273 = vmatprep.subr.mxu1 %v10198_v3 }
  0x4c   : > { %7247 = vmatpush3.msra.mxu0 %v8068_v41  ;;  %7274 = vmatpush3.msra.mxu1 %v7926_v35 }
  0x4d   : > { %7248 = vmatprep.subr.mxu0 %v10198_v3  ;;  %7275 = vmatprep.subr.mxu1 %v10198_v3 }
  0x4e   : > { %7249 = vmatpush3.msra.mxu0 %v8083_v54  ;;  %7276 = vmatpush3.msra.mxu1 %v7960_v45 }
  0x4f   : > { %7250 = vmatprep.subr.mxu0 %v10198_v3  ;;  %7277 = vmatprep.subr.mxu1 %v10198_v3 }
  0x50   : > { %7251 = vmatpush3.msra.mxu0 %v8097_v14  ;;  %7252 = vmatprep.mubr.msk.f32.mxu0 %vm7718_vm0, %v10198_v3 }
  0x51   : > { %7278 = vmatpush3.msra.mxu1 %v7970_v48  ;;  %7253 = vmatmul.mubr.f32.vlgmr.msra.gmra.mxu0 %v8049_v26 }
  0x52   : > { %7279 = vmatprep.subr.mxu1 %v10198_v3  ;;  %7290 = vmatprep.subr.mxu0 %v10198_v3 }
  0x53   : > { %7280 = vmatpush3.msra.mxu1 %v8004_v59  ;;  %7291 = vmatpush3.msra.mxu0 %v7886_v22 }
  0x54   : > { %7281 = vmatprep.subr.mxu1 %v10198_v3  ;;  %7292 = vmatprep.subr.mxu0 %v10198_v3 }
  0x55   : > { %7282 = vmatpush3.msra.mxu1 %v8017_v63  ;;  %7293 = vmatpush3.msra.mxu0 %v7889_v23 }
  0x56   : > { %7283 = vmatprep.subr.mxu1 %v10198_v3  ;;  %7294 = vmatprep.subr.mxu0 %v10198_v3 }
  0x57   : > { %7284 = vmatpush3.msra.mxu1 %v8038_v13  ;;  %7295 = vmatpush3.msra.mxu0 %v7892_v24 }
  0x58   : > { %7285 = vmatprep.subr.mxu1 %v10198_v3  ;;  %7296 = vmatprep.subr.mxu0 %v10198_v3 }
  0x59   : > { %7286 = vmatpush3.msra.mxu1 %v8056_v32  ;;  %7287 = vmatprep.mubr.msk.f32.mxu1 %vm7718_vm0, %v10198_v3 }
  0x5a   : > { %7297 = vmatpush3.msra.mxu0 %v7902_v27  ;;  %7288 = vmatmul.mubr.f32.vlgmr.msra.gmra.mxu1 %v10413_v44 }
  0x5b   : > { %7298 = vmatprep.subr.mxu0 %v10198_v3  ;;  %7325 = vmatprep.subr.mxu1 %v10198_v3 }
  0x5c   : > { %7299 = vmatpush3.msra.mxu0 %v7907_v29  ;;  %7326 = vmatpush3.msra.mxu1 %v7824_v4 }
  0x5d   : > { %7300 = vmatprep.subr.mxu0 %v10198_v3  ;;  %7327 = vmatprep.subr.mxu1 %v10198_v3 }
  0x5e   : > { %7301 = vmatpush3.msra.mxu0 %v7940_v40  ;;  %7328 = vmatpush3.msra.mxu1 %v7826_v5 }
  0x5f   : > { %7302 = vmatprep.subr.mxu0 %v10198_v3  ;;  %7329 = vmatprep.subr.mxu1 %v10198_v3 }
  0x60   : > { %7303 = vmatpush3.msra.mxu0 %v7963_v46  ;;  %7330 = vmatpush3.msra.mxu1 %v7828_v6 }
  0x61   : > { %7304 = vmatprep.subr.mxu0 %v10198_v3  ;;  %7331 = vmatprep.subr.mxu1 %v10198_v3 }
  0x62   : > { %7305 = vmatpush3.msra.mxu0 %v7985_v53  ;;  %7332 = vmatpush3.msra.mxu1 %v7840_v10 }
  0x63   : > { %7306 = vmatprep.subr.mxu0 %v10198_v3  ;;  %7333 = vmatprep.subr.mxu1 %v10198_v3 }
  0x64   : > { %7307 = vmatpush3.msra.mxu0 %v7998_v57  ;;  %7334 = vmatpush3.msra.mxu1 %v7842_v11 }
  0x65   : > { %7308 = vmatprep.subr.mxu0 %v10198_v3  ;;  %7335 = vmatprep.subr.mxu1 %v10198_v3 }
  0x66   : > { %7309 = vmatpush3.msra.mxu0 %v8026_v2  ;;  %7336 = vmatpush3.msra.mxu1 %v7844_v12 }
  0x67   : > { %7310 = vmatprep.subr.mxu0 %v10198_v3  ;;  %7337 = vmatprep.subr.mxu1 %v10198_v3 }
  0x68   : > { %7311 = vmatpush3.msra.mxu0 %v8045_v19  ;;  %7338 = vmatpush3.msra.mxu1 %v7863_v17 }
  0x69   : > { %7312 = vmatprep.subr.mxu0 %v10198_v3  ;;  %7339 = vmatprep.subr.mxu1 %v10198_v3 }
  0x6a   : > { %7313 = vmatpush3.msra.mxu0 %v8065_v39  ;;  %7340 = vmatpush3.msra.mxu1 %v7894_v25 }
  0x6b   : > { %7314 = vmatprep.subr.mxu0 %v10198_v3  ;;  %7341 = vmatprep.subr.mxu1 %v10198_v3 }
  0x6c   : > { %7315 = vmatpush3.msra.mxu0 %v8080_v58  ;;  %7342 = vmatpush3.msra.mxu1 %v7904_v28 }
  0x6d   : > { %7316 = vmatprep.subr.mxu0 %v10198_v3  ;;  %7343 = vmatprep.subr.mxu1 %v10198_v3 }
  0x6e   : > { %7317 = vmatpush3.msra.mxu0 %v8094_v52  ;;  %7344 = vmatpush3.msra.mxu1 %v7926_v35 }
  0x6f   : > { %7318 = vmatprep.subr.mxu0 %v10198_v3  ;;  %7345 = vmatprep.subr.mxu1 %v10198_v3 }
  0x70   : > { %7319 = vmatpush3.msra.mxu0 %v8111_v7  ;;  %7346 = vmatpush3.msra.mxu1 %v7960_v45 }
  0x71   : > { %7320 = vmatprep.subr.mxu0 %v10198_v3  ;;  %7347 = vmatprep.subr.mxu1 %v10198_v3 }
  0x72   : > { %7321 = vmatpush3.msra.mxu0 %v8122_v36  ;;  %7322 = vmatprep.mubr.msk.f32.mxu0 %vm7718_vm0, %v10198_v3 }
  0x73   : > { %7348 = vmatpush3.msra.mxu1 %v7970_v48  ;;  %7323 = vmatmul.mubr.f32.vlgmr.msra.gmra.mxu0 %v8013_v62 }
  0x74   : > { %7349 = vmatprep.subr.mxu1 %v10198_v3  ;;  %7360 = vmatprep.subr.mxu0 %v10198_v3 }
  0x75   : > { %7350 = vmatpush3.msra.mxu1 %v8004_v59  ;;  %7361 = vmatpush3.msra.mxu0 %v7824_v4 }
  0x76   : > { %7351 = vmatprep.subr.mxu1 %v10198_v3  ;;  %7362 = vmatprep.subr.mxu0 %v10198_v3 }
  0x77   : > { %7352 = vmatpush3.msra.mxu1 %v8017_v63  ;;  %7363 = vmatpush3.msra.mxu0 %v7826_v5 }
  0x78   : > { %7353 = vmatprep.subr.mxu1 %v10198_v3  ;;  %7364 = vmatprep.subr.mxu0 %v10198_v3 }
  0x79   : > { %7354 = vmatpush3.msra.mxu1 %v8038_v13  ;;  %7365 = vmatpush3.msra.mxu0 %v7828_v6 }
  0x7a   : > { %7355 = vmatprep.subr.mxu1 %v10198_v3  ;;  %7366 = vmatprep.subr.mxu0 %v10198_v3 }
  0x7b   : > { %7356 = vmatpush3.msra.mxu1 %v8056_v32  ;;  %7357 = vmatprep.mubr.msk.f32.mxu1 %vm7718_vm0, %v10198_v3 }
  0x7c   : > { %7367 = vmatpush3.msra.mxu0 %v7840_v10  ;;  %7358 = vmatmul.mubr.f32.vlgmr.msra.gmra.mxu1 %v8013_v62  ;;  %v10414_v62 = vld [vmem:[#allocation2_spill] sm:$0xff] }
  0x7d   : > { %7368 = vmatprep.subr.mxu0 %v10198_v3  ;;  %7395 = vmatprep.subr.mxu1 %v10198_v3 }
  0x7e   : > { %7369 = vmatpush3.msra.mxu0 %v7842_v11  ;;  %7396 = vmatpush3.msra.mxu1 %v7933_v37  ;;  %v8316_v37 = vand.u32 4294901760, %v1145_v56 }
  0x7f   : > { %7370 = vmatprep.subr.mxu0 %v10198_v3  ;;  %7397 = vmatprep.subr.mxu1 %v10198_v3 }
  0x80   : > { %7371 = vmatpush3.msra.mxu0 %v7844_v12  ;;  %7398 = vmatpush3.msra.mxu1 %v7935_v38  ;;  %v10416_v38 = vld [vmem:[#allocation4_spill] sm:$0xff]  ;;  %v8327_v26 = vsub.f32 %v1145_v56, %v8316_v37  ;;  %v10419_v56 = vld [vmem:[#allocation7_spill] sm:$0xff] }
  0x81   : > { %7372 = vmatprep.subr.mxu0 %v10198_v3  ;;  %7399 = vmatprep.subr.mxu1 %v10198_v3 }
  0x82   : > { %7373 = vmatpush3.msra.mxu0 %v7863_v17  ;;  %7400 = vmatpush3.msra.mxu1 %v10414_v62  ;;  %v1229_v44 = vand.u32 4294901760, %v8327_v26  ;;  %v10420_v62 = vld [vmem:[#allocation8_spill] sm:$0xff] }
  0x83   : > { %7374 = vmatprep.subr.mxu0 %v10198_v3  ;;  %7401 = vmatprep.subr.mxu1 %v10198_v3 }
  0x84   : > { %7375 = vmatpush3.msra.mxu0 %v7894_v25  ;;  %7402 = vmatpush3.msra.mxu1 %v10415_v50  ;;  %v1230_v50 = vsub.f32 %v8327_v26, %v1229_v44 }
  0x85   : > { %7376 = vmatprep.subr.mxu0 %v10198_v3  ;;  %7403 = vmatprep.subr.mxu1 %v10198_v3 }
  0x86   : > { %7377 = vmatpush3.msra.mxu0 %v7904_v28  ;;  %7404 = vmatpush3.msra.mxu1 %v10416_v38  ;;  %v10421_v38 = vld [vmem:[#allocation9_spill] sm:$0xff] }
  0x87   : > { %7378 = vmatprep.subr.mxu0 %v10198_v3  ;;  %7405 = vmatprep.subr.mxu1 %v10198_v3 }
  0x88   : > { %7379 = vmatpush3.msra.mxu0 %v7926_v35  ;;  %7406 = vmatpush3.msra.mxu1 %v10417_v42  ;;  %v1231_v42 = vand.u32 4294901760, %v1230_v50 }
  0x89   : > { %7380 = vmatprep.subr.mxu0 %v10198_v3  ;;  %7407 = vmatprep.subr.mxu1 %v10198_v3 }
  0x8a   : > { %7381 = vmatpush3.msra.mxu0 %v7960_v45  ;;  %7408 = vmatpush3.msra.mxu1 %v10418_v9  ;;  %v2738_v9 = vld [vmem:[%s8565_s13 + $0xe0] sm:$0xff] }
  0x8b   : > { %7382 = vmatprep.subr.mxu0 %v10198_v3  ;;  %7409 = vmatprep.subr.mxu1 %v10198_v3  ;;  %v8580_v50 = vand.u32 4294901760, %v2738_v9 }
  0x8c   : > { %7383 = vmatpush3.msra.mxu0 %v7970_v48  ;;  %7410 = vmatpush3.msra.mxu1 %v10419_v56 }
  0x8d   : > { %7384 = vmatprep.subr.mxu0 %v10198_v3  ;;  %7411 = vmatprep.subr.mxu1 %v10198_v3 }
  0x8e   : > { %7385 = vmatpush3.msra.mxu0 %v8004_v59  ;;  %7412 = vmatpush3.msra.mxu1 %v10420_v62 }
  0x8f   : > { %7386 = vmatprep.subr.mxu0 %v10198_v3  ;;  %7413 = vmatprep.subr.mxu1 %v10198_v3 }
  0x90   : > { %7387 = vmatpush3.msra.mxu0 %v8017_v63  ;;  %7414 = vmatpush3.msra.mxu1 %v10421_v38 }
  0x91   : > { %7388 = vmatprep.subr.mxu0 %v10198_v3  ;;  %7415 = vmatprep.subr.mxu1 %v10198_v3 }
  0x92   : > { %7389 = vmatpush3.msra.mxu0 %v8038_v13  ;;  %7416 = vmatpush3.msra.mxu1 %v8103_v60 }
  0x93   : > { %7390 = vmatprep.subr.mxu0 %v10198_v3  ;;  %7417 = vmatprep.subr.mxu1 %v10198_v3 }
  0x94   : > { %7391 = vmatpush3.msra.mxu0 %v8056_v32  ;;  %7418 = vmatpush3.msra.mxu1 %v8117_v49 }
  0x95   : > { %7392 = vmatprep.mubr.msk.f32.mxu0 %vm7718_vm0, %v10198_v3  ;;  %7419 = vmatprep.subr.mxu1 %v10198_v3 }
  0x96   : > { %7430 = vmatprep.subr.mxu0 %v10198_v3  ;;  %7393 = vmatmul.mubr.f32.vlgmr.msra.gmra.mxu0 %v1231_v42 }
  0x97   : > { %7420 = vmatpush3.msra.mxu1 %v8128_v51  ;;  %7431 = vmatpush3.msra.mxu0 %v7858_v15 }
  0x98   : > { %7421 = vmatprep.subr.mxu1 %v10198_v3  ;;  %7432 = vmatprep.subr.mxu0 %v10198_v3 }
  0x99   : > { %7422 = vmatpush3.msra.mxu1 %v8136_v1  ;;  %7433 = vmatpush3.msra.mxu0 %v7861_v16 }
  0x9a   : > { %7423 = vmatprep.subr.mxu1 %v10198_v3  ;;  %7434 = vmatprep.subr.mxu0 %v10198_v3 }
  0x9b   : > { %7424 = vmatpush3.msra.mxu1 %v8143_v0  ;;  %7435 = vmatpush3.msra.mxu0 %v7866_v18  ;;  %v2741_v0 = vld [vmem:[%s8565_s13 + $0xf8] sm:$0xff] }
  0x9c   : > { %7425 = vmatprep.subr.mxu1 %v10198_v3  ;;  %7436 = vmatprep.subr.mxu0 %v10198_v3 }
  0x9d   : > { %7426 = vmatpush3.msra.mxu1 %v8149_v33  ;;  %7427 = vmatprep.mubr.msk.f32.mxu1 %vm7718_vm0, %v10198_v3  ;;  %v8568_v33 = vand.u32 4294901760, %v2741_v0 }
  0x9e   : > { %7437 = vmatpush3.msra.mxu0 %v7878_v20  ;;  %7428 = vmatmul.mubr.f32.vlgmr.msra.gmra.mxu1 %v8316_v37 }
  0x9f   : > { %7438 = vmatprep.subr.mxu0 %v10198_v3  ;;  %7465 = vmatprep.subr.mxu1 %v10198_v3 }
  0xa0   : > { %7439 = vmatpush3.msra.mxu0 %v7881_v21  ;;  %7466 = vmatpush3.msra.mxu1 %v7824_v4 }
  0xa1   : > { %7440 = vmatprep.subr.mxu0 %v10198_v3  ;;  %7467 = vmatprep.subr.mxu1 %v10198_v3 }
  0xa2   : > { %7441 = vmatpush3.msra.mxu0 %v7910_v30  ;;  %7468 = vmatpush3.msra.mxu1 %v7826_v5 }
  0xa3   : > { %7442 = vmatprep.subr.mxu0 %v10198_v3  ;;  %7469 = vmatprep.subr.mxu1 %v10198_v3 }
  0xa4   : > { %7443 = vmatpush3.msra.mxu0 %v7923_v34  ;;  %7470 = vmatpush3.msra.mxu1 %v7828_v6 }
  0xa5   : > { %7444 = vmatprep.subr.mxu0 %v10198_v3  ;;  %7471 = vmatprep.subr.mxu1 %v10198_v3 }
  0xa6   : > { %7445 = vmatpush3.msra.mxu0 %v7949_v43  ;;  %7472 = vmatpush3.msra.mxu1 %v7840_v10 }
  0xa7   : > { %7446 = vmatprep.subr.mxu0 %v10198_v3  ;;  %7473 = vmatprep.subr.mxu1 %v10198_v3 }
  0xa8   : > { %7447 = vmatpush3.msra.mxu0 %v7966_v47  ;;  %7474 = vmatpush3.msra.mxu1 %v7842_v11 }
  0xa9   : > { %7448 = vmatprep.subr.mxu0 %v10198_v3  ;;  %7475 = vmatprep.subr.mxu1 %v10198_v3 }
  0xaa   : > { %7449 = vmatpush3.msra.mxu0 %v7991_v55  ;;  %7476 = vmatpush3.msra.mxu1 %v7844_v12 }
  0xab   : > { %7450 = vmatprep.subr.mxu0 %v10198_v3  ;;  %7477 = vmatprep.subr.mxu1 %v10198_v3 }
  0xac   : > { %7451 = vmatpush3.msra.mxu0 %v8010_v61  ;;  %7478 = vmatpush3.msra.mxu1 %v7863_v17 }
  0xad   : > { %7452 = vmatprep.subr.mxu0 %v10198_v3  ;;  %7479 = vmatprep.subr.mxu1 %v10198_v3 }
  0xae   : > { %7453 = vmatpush3.msra.mxu0 %v8032_v8  ;;  %7480 = vmatpush3.msra.mxu1 %v7894_v25 }
  0xaf   : > { %7454 = vmatprep.subr.mxu0 %v10198_v3  ;;  %7481 = vmatprep.subr.mxu1 %v10198_v3 }
  0xb0   : > { %7455 = vmatpush3.msra.mxu0 %v8052_v31  ;;  %7482 = vmatpush3.msra.mxu1 %v7904_v28 }
  0xb1   : > { %7456 = vmatprep.subr.mxu0 %v10198_v3  ;;  %7483 = vmatprep.subr.mxu1 %v10198_v3 }
  0xb2   : > { %7457 = vmatpush3.msra.mxu0 %v8068_v41  ;;  %7484 = vmatpush3.msra.mxu1 %v7926_v35 }
  0xb3   : > { %7458 = vmatprep.subr.mxu0 %v10198_v3  ;;  %7485 = vmatprep.subr.mxu1 %v10198_v3 }
  0xb4   : > { %7459 = vmatpush3.msra.mxu0 %v8083_v54  ;;  %7486 = vmatpush3.msra.mxu1 %v7960_v45 }
  0xb5   : > { %7460 = vmatprep.subr.mxu0 %v10198_v3  ;;  %7487 = vmatprep.subr.mxu1 %v10198_v3 }
  0xb6   : > { %7461 = vmatpush3.msra.mxu0 %v8097_v14  ;;  %7462 = vmatprep.mubr.msk.f32.mxu0 %vm7718_vm0, %v10198_v3 }
  0xb7   : > { %7488 = vmatpush3.msra.mxu1 %v7970_v48  ;;  %7463 = vmatmul.mubr.f32.vlgmr.msra.gmra.mxu0 %v8327_v26  ;;  %v2739_v26 = vld [vmem:[%s8565_s13 + $0xe8] sm:$0xff] }
  0xb8   : > { %7489 = vmatprep.subr.mxu1 %v10198_v3  ;;  %7500 = vmatprep.subr.mxu0 %v10198_v3  ;;  %v8578_v62 = vand.u32 4294901760, %v2739_v26 }
  0xb9   : > { %7490 = vmatpush3.msra.mxu1 %v8004_v59  ;;  %7501 = vmatpush3.msra.mxu0 %v7886_v22 }
  0xba   : > { %7491 = vmatprep.subr.mxu1 %v10198_v3  ;;  %7502 = vmatprep.subr.mxu0 %v10198_v3 }
  0xbb   : > { %7492 = vmatpush3.msra.mxu1 %v8017_v63  ;;  %7503 = vmatpush3.msra.mxu0 %v7889_v23 }
  0xbc   : > { %7493 = vmatprep.subr.mxu1 %v10198_v3  ;;  %7504 = vmatprep.subr.mxu0 %v10198_v3 }
  0xbd   : > { %7494 = vmatpush3.msra.mxu1 %v8038_v13  ;;  %7505 = vmatpush3.msra.mxu0 %v7892_v24 }
  0xbe   : > { %7495 = vmatprep.subr.mxu1 %v10198_v3  ;;  %7506 = vmatprep.subr.mxu0 %v10198_v3 }
  0xbf   : > { %7496 = vmatpush3.msra.mxu1 %v8056_v32  ;;  %7497 = vmatprep.mubr.msk.f32.mxu1 %vm7718_vm0, %v10198_v3 }
  0xc0   : > { %7507 = vmatpush3.msra.mxu0 %v7902_v27  ;;  %7498 = vmatmul.mubr.f32.vlgmr.msra.gmra.mxu1 %v1229_v44  ;;  %v8574_v44 = vsub.f32 %v2741_v0, %v8568_v33 }
  0xc1   : > { %7508 = vmatprep.subr.mxu0 %v10198_v3  ;;  %7535 = vmatprep.subr.mxu1 %v10198_v3 }
  0xc2   : > { %7509 = vmatpush3.msra.mxu0 %v7907_v29  ;;  %7536 = vmatpush3.msra.mxu1 %v7824_v4  ;;  %v502_v4 = vld [vmem:[%s10167_s8] sm:$0xff]  ;;  %10422 = vst [vmem:[#allocation2_spill] sm:$0xff] %v8574_v44  ;;  %v10197_v38 = vand.u32 4294901760, %v8574_v44 }
  0xc3   : > { %7510 = vmatprep.subr.mxu0 %v10198_v3  ;;  %7537 = vmatprep.subr.mxu1 %v10198_v3 }
  0xc4   : > { %7511 = vmatpush3.msra.mxu0 %v7940_v40  ;;  %7538 = vmatpush3.msra.mxu1 %v7826_v5  ;;  %v8486_v5 = vand.u32 4294901760, %v502_v4 }
  0xc5   : > { %7512 = vmatprep.subr.mxu0 %v10198_v3  ;;  %7539 = vmatprep.subr.mxu1 %v10198_v3 }
  0xc6   : > { %7513 = vmatpush3.msra.mxu0 %v7963_v46  ;;  %7540 = vmatpush3.msra.mxu1 %v7828_v6  ;;  %v8497_v6 = vsub.f32 %v502_v4, %v8486_v5  ;;  %v8587_v4 = vsub.f32 %v2739_v26, %v8578_v62 }
  0xc7   : > { %7514 = vmatprep.subr.mxu0 %v10198_v3  ;;  %7541 = vmatprep.subr.mxu1 %v10198_v3 }
  0xc8   : > { %7515 = vmatpush3.msra.mxu0 %v7985_v53  ;;  %7542 = vmatpush3.msra.mxu1 %v7840_v10  ;;  %v8508_v10 = vand.u32 4294901760, %v8497_v6 }
  0xc9   : > { %7516 = vmatprep.subr.mxu0 %v10198_v3  ;;  %7543 = vmatprep.subr.mxu1 %v10198_v3 }
  0xca   : > { %7517 = vmatpush3.msra.mxu0 %v7998_v57  ;;  %7544 = vmatpush3.msra.mxu1 %v7842_v11  ;;  %v1907_v11 = vsub.f32 %v8497_v6, %v8508_v10 }
  0xcb   : > { %7518 = vmatprep.subr.mxu0 %v10198_v3  ;;  %7545 = vmatprep.subr.mxu1 %v10198_v3 }
  0xcc   : > { %7519 = vmatpush3.msra.mxu0 %v8026_v2  ;;  %7546 = vmatpush3.msra.mxu1 %v7844_v12  ;;  %v1908_v12 = vand.u32 4294901760, %v1907_v11 }
  0xcd   : > { %7520 = vmatprep.subr.mxu0 %v10198_v3  ;;  %7547 = vmatprep.subr.mxu1 %v10198_v3 }
  0xce   : > { %7521 = vmatpush3.msra.mxu0 %v8045_v19  ;;  %7548 = vmatpush3.msra.mxu1 %v7863_v17 }
  0xcf   : > { %7522 = vmatprep.subr.mxu0 %v10198_v3  ;;  %7549 = vmatprep.subr.mxu1 %v10198_v3 }
  0xd0   : > { %7523 = vmatpush3.msra.mxu0 %v8065_v39  ;;  %7550 = vmatpush3.msra.mxu1 %v7894_v25 }
  0xd1   : > { %7524 = vmatprep.subr.mxu0 %v10198_v3  ;;  %7551 = vmatprep.subr.mxu1 %v10198_v3 }
  0xd2   : > { %7525 = vmatpush3.msra.mxu0 %v8080_v58  ;;  %7552 = vmatpush3.msra.mxu1 %v7904_v28 }
  0xd3   : > { %7526 = vmatprep.subr.mxu0 %v10198_v3  ;;  %7553 = vmatprep.subr.mxu1 %v10198_v3 }
  0xd4   : > { %7527 = vmatpush3.msra.mxu0 %v8094_v52  ;;  %7554 = vmatpush3.msra.mxu1 %v7926_v35 }
  0xd5   : > { %7528 = vmatprep.subr.mxu0 %v10198_v3  ;;  %7555 = vmatprep.subr.mxu1 %v10198_v3 }
  0xd6   : > { %7529 = vmatpush3.msra.mxu0 %v8111_v7  ;;  %7556 = vmatpush3.msra.mxu1 %v7960_v45 }
  0xd7   : > { %7530 = vmatprep.subr.mxu0 %v10198_v3  ;;  %7557 = vmatprep.subr.mxu1 %v10198_v3 }
  0xd8   : > { %7531 = vmatpush3.msra.mxu0 %v8122_v36  ;;  %7532 = vmatprep.mubr.msk.f32.mxu0 %vm7718_vm0, %v10198_v3 }
  0xd9   : > { %7558 = vmatpush3.msra.mxu1 %v7970_v48  ;;  %7533 = vmatmul.mubr.f32.vlgmr.msra.gmra.mxu0 %v8316_v37 }
  0xda   : > { %7559 = vmatprep.subr.mxu1 %v10198_v3  ;;  %7567 = vmatprep.mubr.msk.f32.mxu1 %vm7718_vm0, %v10198_v3 }
  0xdb   : > { %7560 = vmatpush3.msra.mxu1 %v8004_v59  ;;  %7570 = vmatprep.subr.mxu0 %v10198_v3 }
  0xdc   : > { %7561 = vmatprep.subr.mxu1 %v10198_v3  ;;  %7571 = vmatpush3.msra.mxu0 %v8486_v5 }
  0xdd   : > { %7562 = vmatpush3.msra.mxu1 %v8017_v63  ;;  %7572 = vmatprep.mubr.msk.f32.mxu0 %vm7718_vm0, %v10198_v3 }
  0xde   : > { %7563 = vmatprep.subr.mxu1 %v10198_v3  ;;  %7580 = vmatprep.subr.mxu0 %v10198_v3 }
  0xdf   : > { %7564 = vmatpush3.msra.mxu1 %v8038_v13 }
  0xe0   : > { %7565 = vmatprep.subr.mxu1 %v10198_v3 }
  0xe1   : > { %7566 = vmatpush3.msra.mxu1 %v8056_v32 }
  0xe2   : > { %7568 = vmatmul.mubr.f32.vlgmr.msra.gmra.mxu1 %v8316_v37  ;;  %7575 = vmatprep.subr.mxu1 %v10198_v3  ;;  %v2740_v37 = vld [vmem:[%s8565_s13 + $0xf0] sm:$0xff] }
  0xe3   : > { %7576 = vmatpush3.msra.mxu1 %v1908_v12  ;;  %7577 = vmatprep.mubr.msk.f32.mxu1 %vm7718_vm0, %v10198_v3  ;;  %v8576_v56 = vand.u32 4294901760, %v2740_v37 }
  0xe4   : > { %7585 = vmatprep.subr.mxu1 %v10198_v3 }
  0xe5   : > { %v8584_v42 = vsub.f32 %v2740_v37, %v8576_v56  ;;  %v2728_v37 = vld [vmem:[%s8565_s13 + $0x90] sm:$0xff] }
  0xf1   : > { %v590_v15 = vpop.f32.mrf.mxu0 }
  0xf3   : > { %v7184_v16 = vpop.f32.mrf.mxu0 }
  0xf8   : > { %v741_v17 = vpop.f32.mrf.mxu1 }
  0xf9   : > { %v742_v25 = vadd.f32 %v741_v17, %v590_v15  ;;  %v2865_v17 = vsub.f32 %v8574_v44, %v10197_v38 }
  0xfa   : > { %v7219_v18 = vpop.f32.mrf.mxu1 }
  0xfb   : > { %v10196_v18 = vand.u32 4294901760, %v8584_v42 }
 0x111   : > { %v845_v20 = vpop.f32.mrf.mxu0 }
 0x112   : > { %v846_v28 = vadd.f32 %v845_v20, %v742_v25  ;;  %v10193_v20 = vand.u32 4294901760, %v8587_v4  ;;  %v2871_v25 = vsub.f32 %v8584_v42, %v10196_v18 }
 0x113   : > { %v7254_v21 = vpop.f32.mrf.mxu0 }
 0x11a   : > { %v934_v22 = vpop.f32.mrf.mxu1 }
 0x11b   : > { %v935_v29 = vadd.f32 %v934_v22, %v846_v28 }
 0x11c   : > { %v7289_v23 = vpop.f32.mrf.mxu1 }
 0x133   : > { %v1053_v24 = vpop.f32.mrf.mxu0 }
 0x134   : > { %v1054_v30 = vadd.f32 %v1053_v24, %v935_v29  ;;  %v2866_v24 = vand.u32 4294901760, %v2865_v17 }
 0x135   : > { %v7324_v27 = vpop.f32.mrf.mxu0 }
 0x136   : > { %v2877_v27 = vsub.f32 %v8587_v4, %v10193_v20 }
 0x13c   : > { %v1140_v34 = vpop.f32.mrf.mxu1 }
 0x13d   : > { %v1141_v35 = vadd.f32 %v1140_v34, %v1054_v30  ;;  %v2872_v34 = vand.u32 4294901760, %v2871_v25  ;;  %v2726_v25 = vld [vmem:[%s8565_s13 + $0x80] sm:$0xff] }
 0x13e   : > { %v7359_v40 = vpop.f32.mrf.mxu1 }
 0x13f   : > { %v1144_v43 = vmul.f32 0.0625, %v1141_v35  ;;  %v2878_v35 = vand.u32 4294901760, %v2877_v27 }
 0x141   : > { %v1795_v45 = vsel %vm1793_vm1, %v1144_v43, 0  ;;  %v1788_v1 = vmul.f32 %v1144_v43, %v1144_v43 }
 0x142   : > { %v1863_v46 = vand.u32 4294901760, %v1795_v45 }
 0x144   : > { %v1864_v47 = vsub.f32 %v1795_v45, %v1863_v46  ;;  %7578 = vmatmul.mubr.f32.vlgmr.msra.gmra.mxu1 %v1863_v46  ;;  %v2735_v45 = vld [vmem:[%s8565_s13 + $0xc8] sm:$0xff] }
 0x145   : > { %7586 = vmatpush3.msra.mxu1 %v8486_v5  ;;  %7587 = vmatprep.mubr.msk.f32.mxu1 %vm7718_vm0, %v10198_v3 }
 0x146   : > { %v1865_v48 = vand.u32 4294901760, %v1864_v47  ;;  %7595 = vmatprep.subr.mxu1 %v10198_v3 }
 0x148   : > { %7588 = vmatmul.mubr.f32.vlgmr.msra.gmra.mxu1 %v1865_v48  ;;  %v1866_v51 = vsub.f32 %v1864_v47, %v1865_v48  ;;  %v2734_v48 = vld [vmem:[%s8565_s13 + $0xc0] sm:$0xff] }
 0x149   : > { %7596 = vmatpush3.msra.mxu1 %v8486_v5  ;;  %7597 = vmatprep.mubr.msk.f32.mxu1 %vm7718_vm0, %v10198_v3 }
 0x14a   : > { %v1867_v53 = vand.u32 4294901760, %v1866_v51  ;;  %7605 = vmatprep.subr.mxu1 %v10198_v3 }
 0x14c   : > { %7573 = vmatmul.mubr.f32.vlgmr.msra.gmra.mxu0 %v1867_v53  ;;  %7598 = vmatmul.mubr.f32.vlgmr.msra.gmra.mxu1 %v1863_v46  ;;  %v8645_v53 = vand.u32 4294901760, %v2734_v48 }
 0x14d   : > { %7581 = vmatpush3.msra.mxu0 %v8497_v6  ;;  %7582 = vmatprep.mubr.msk.f32.mxu0 %vm7718_vm0, %v10198_v3 }
 0x14e   : > { %7590 = vmatprep.subr.mxu0 %v10198_v3  ;;  %7606 = vmatpush3.msra.mxu1 %v1908_v12  ;;  %v8590_v12 = vsub.f32 %v2738_v9, %v8580_v50 }
 0x14f   : > { %7607 = vmatprep.mubr.msk.f32.mxu1 %vm7718_vm0, %v10198_v3  ;;  %7615 = vmatprep.subr.mxu1 %v10198_v3 }
 0x150   : > { %7583 = vmatmul.mubr.f32.vlgmr.msra.gmra.mxu0 %v1864_v47  ;;  %v10191_v22 = vand.u32 4294901760, %v8590_v12  ;;  %v8638_v47 = vand.u32 4294901760, %v2735_v45 }
 0x151   : > { %7591 = vmatpush3.msra.mxu0 %v8508_v10  ;;  %7592 = vmatprep.mubr.msk.f32.mxu0 %vm7718_vm0, %v10198_v3 }
 0x152   : > { %7600 = vmatprep.subr.mxu0 %v10198_v3  ;;  %v2883_v29 = vsub.f32 %v8590_v12, %v10191_v22 }
 0x154   : > { %7593 = vmatmul.mubr.f32.vlgmr.msra.gmra.mxu0 %v1863_v46  ;;  %v2884_v40 = vand.u32 4294901760, %v2883_v29 }
 0x155   : > { %7601 = vmatpush3.msra.mxu0 %v8486_v5  ;;  %7602 = vmatprep.mubr.msk.f32.mxu0 %vm7718_vm0, %v10198_v3 }
 0x156   : > { %v1233_v55 = vpop.f32.mrf.mxu0  ;;  %7610 = vmatprep.subr.mxu0 %v10198_v3 }
 0x158   : > { %v7394_v57 = vpop.f32.mrf.mxu0 }
 0x15e   : > { %v1384_v59 = vpop.f32.mrf.mxu1 }
 0x15f   : > { %v1385_v19 = vadd.f32 %v1384_v59, %v1233_v55  ;;  %v2733_v55 = vld [vmem:[%s8565_s13 + $0xb8] sm:$0xff]  ;;  %v8651_v59 = vsub.f32 %v2735_v45, %v8638_v47  ;;  %v2724_v45 = vld [vmem:[%s8565_s13 + $0x70] sm:$0xff] }
 0x160   : > { %v7429_v61 = vpop.f32.mrf.mxu1 }
 0x161   : > { %v8653_v61 = vand.u32 4294901760, %v2733_v55 }
 0x177   : > { %v1488_v63 = vpop.f32.mrf.mxu0 }
 0x178   : > { %v1489_v32 = vadd.f32 %v1488_v63, %v1385_v19  ;;  %v2732_v63 = vld [vmem:[%s8565_s13 + $0xb0] sm:$0xff] }
 0x179   : > { %v7464_v2 = vpop.f32.mrf.mxu0 }
 0x180   : > { %v1577_v8 = vpop.f32.mrf.mxu1 }
 0x181   : > { %v1578_v39 = vadd.f32 %v1577_v8, %v1489_v32  ;;  %v8659_v8 = vsub.f32 %v2734_v48, %v8645_v53  ;;  %v8670_v32 = vsub.f32 %v2733_v55, %v8653_v61 }
 0x182   : > { %v7499_v13 = vpop.f32.mrf.mxu1 }
 0x183   : > { %v8661_v13 = vand.u32 4294901760, %v2732_v63 }
 0x199   : > { %v1696_v14 = vpop.f32.mrf.mxu0 }
 0x19a   : > { %v1697_v41 = vadd.f32 %v1696_v14, %v1578_v39  ;;  %v2731_v14 = vld [vmem:[%s8565_s13 + $0xa8] sm:$0xff] }
 0x19b   : > { %v7534_v31 = vpop.f32.mrf.mxu0  ;;  %v8672_v39 = vand.u32 4294901760, %v2731_v14 }
 0x19c   : > { %v10188_v31 = vand.u32 4294901760, %v8651_v59 }
 0x19d   : > { %v8692_v0 = vsub.f32 %v2731_v14, %v8672_v39  ;;  %v8735_v14 = vand.u32 4294901760, %v2726_v25 }
 0x1a2   : > { %v1783_v52 = vpop.f32.mrf.mxu1 }
 0x1a3   : > { %v1784_v58 = vadd.f32 %v1783_v52, %v1697_v41  ;;  %v2730_v41 = vld [vmem:[%s8565_s13 + $0xa0] sm:$0xff] }
 0x1a4   : > { %v7569_v54 = vpop.f32.mrf.mxu1 }
 0x1a5   : > { %v1787_v60 = vmul.f32 0.0625, %v1784_v58  ;;  %v10186_v58 = vand.u32 4294901760, %v8659_v8  ;;  %v8681_v54 = vsub.f32 %v2732_v63, %v8661_v13 }
 0x1a7   : > { %v1789_v7 = vsub.f32 %v1787_v60, %v1788_v1  ;;  %v8683_v1 = vand.u32 4294901760, %v2730_v41  ;;  %v2729_v60 = vld [vmem:[%s8565_s13 + $0x98] sm:$0xff]  ;;  %v2907_v9 = vsub.f32 %v8659_v8, %v10186_v58 }
 0x1a9   : > { %v1790_v49 = vmax.f32 %v1789_v7, 0.0  ;;  %v2908_v27 = vand.u32 4294901760, %v2907_v9  ;;  %v8749_v9 = vsub.f32 %v2726_v25, %v8735_v14 }
 0x1ab   : > { %v1791_v36 = vadd.f32 1e-05, %v1790_v49  ;;  %v2901_v49 = vsub.f32 %v8651_v59, %v10188_v31  ;;  %10423 = vst [vmem:[#allocation3_spill] sm:$0xff] %v8749_v9  ;;  %v2718_v31 = vld [vmem:[%s8565_s13 + $0x40] sm:$0xff] }
 0x1ad   : > { %7672 = vrsqrt.f32 %v1791_v36  ;;  %v10185_v36 = vand.u32 4294901760, %v8670_v32  ;;  %v2902_v17 = vand.u32 4294901760, %v2901_v49  ;;  %v2722_v49 = vld [vmem:[%s8565_s13 + $0x60] sm:$0xff] }
 0x1ba   : > { %v7673_v11 = vpop.eup %7672 }
 0x1bb   : > { %v2244_v15 = vsel %vm1793_vm1, %v7673_v11, 0  ;;  %v10183_v11 = vand.u32 4294901760, %v8681_v54 }
 0x1bc   : > { %v2312_v16 = vand.u32 4294901760, %v2244_v15 }
 0x1be   : > { %v2313_v21 = vsub.f32 %v2244_v15, %v2312_v16  ;;  %7608 = vmatmul.mubr.f32.vlgmr.msra.gmra.mxu1 %v2312_v16  ;;  %v8701_v15 = vsub.f32 %v2730_v41, %v8683_v1 }
 0x1bf   : > { %7616 = vmatpush3.msra.mxu1 %v8486_v5  ;;  %7617 = vmatprep.mubr.msk.f32.mxu1 %vm7718_vm0, %v10198_v3 }
 0x1c0   : > { %v2314_v23 = vand.u32 4294901760, %v2313_v21  ;;  %7625 = vmatprep.subr.mxu1 %v10198_v3  ;;  %v10180_v29 = vand.u32 4294901760, %v8701_v15 }
 0x1c2   : > { %7618 = vmatmul.mubr.f32.vlgmr.msra.gmra.mxu1 %v2314_v23  ;;  %v2315_v28 = vsub.f32 %v2313_v21, %v2314_v23  ;;  %v10182_v23 = vand.u32 4294901760, %v8692_v0  ;;  %v2931_v55 = vsub.f32 %v8701_v15, %v10180_v29 }
 0x1c3   : > { %7626 = vmatpush3.msra.mxu1 %v8486_v5  ;;  %7627 = vmatprep.mubr.msk.f32.mxu1 %vm7718_vm0, %v10198_v3  ;;  %v2737_v5 = vld [vmem:[%s8565_s13 + $0xd8] sm:$0xff] }
 0x1c4   : > { %v2316_v30 = vand.u32 4294901760, %v2315_v28  ;;  %2867 = vmatprep.subr.mxu1 %v2866_v24  ;;  %v8709_v24 = vand.u32 4294901760, %v2729_v60  ;;  %v2919_v28 = vsub.f32 %v8681_v54, %v10183_v11 }
 0x1c6   : > { %7603 = vmatmul.mubr.f32.vlgmr.msra.gmra.mxu0 %v2316_v30  ;;  %7628 = vmatmul.mubr.f32.vlgmr.msra.gmra.mxu1 %v2312_v16  ;;  %v8716_v30 = vand.u32 4294901760, %v2728_v37  ;;  %v2920_v48 = vand.u32 4294901760, %v2919_v28 }
 0x1c7   : > { %7611 = vmatpush3.msra.mxu0 %v8497_v6  ;;  %7612 = vmatprep.mubr.msk.f32.mxu0 %vm7718_vm0, %v10198_v3  ;;  %v8629_v6 = vand.u32 4294901760, %v2737_v5 }
 0x1c8   : > { %7620 = vmatprep.subr.mxu0 %v10198_v3  ;;  %2873 = vmatpush1.msra.mxu1 %v2872_v34  ;;  %v2725_v34 = vld [vmem:[%s8565_s13 + $0x78] sm:$0xff]  ;;  %v8733_v63 = vsub.f32 %v2728_v37, %v8716_v30  ;;  %v2932_v37 = vand.u32 4294901760, %v2931_v55  ;;  %v8773_v55 = vand.u32 4294901760, %v2722_v49 }
 0x1c9   : > { %2879 = vmatprep.subr.mxu1 %v2878_v35  ;;  %3086 = vmatprep.mubr.f32.mxu1 %v10198_v3  ;;  %v8636_v46 = vsub.f32 %v2737_v5, %v8629_v6  ;;  %v8723_v5 = vsub.f32 %v2729_v60, %v8709_v24 }
 0x1ca   : > { %7613 = vmatmul.mubr.f32.vlgmr.msra.gmra.mxu0 %v2313_v21  ;;  %2885 = vmatpush1.msra.mxu1 %v2884_v40  ;;  %v2913_v21 = vsub.f32 %v8670_v32, %v10185_v36  ;;  %v2925_v40 = vsub.f32 %v8692_v0, %v10182_v23  ;;  %v2720_v23 = vld [vmem:[%s8565_s13 + $0x50] sm:$0xff] }
 0x1cb   : > { %7621 = vmatpush3.msra.mxu0 %v8508_v10  ;;  %7622 = vmatprep.mubr.msk.f32.mxu0 %vm7718_vm0, %v10198_v3  ;;  %v2736_v10 = vld [vmem:[%s8565_s13 + $0xd0] sm:$0xff]  ;;  %v10190_v57 = vand.u32 4294901760, %v8636_v46 }
 0x1cc   : > { %2755 = vmatprep.subr.mxu0 %v8568_v33  ;;  %v8632_v43 = vand.u32 4294901760, %v2736_v10  ;;  %v2914_v35 = vand.u32 4294901760, %v2913_v21  ;;  %v2926_v41 = vand.u32 4294901760, %v2925_v40  ;;  %v10187_v40 = vand.u32 4294901760, %v8749_v9 }
 0x1cd   : > { %v2889_v19 = vsub.f32 %v8636_v46, %v10190_v57 }
 0x1ce   : > { %7623 = vmatmul.mubr.f32.vlgmr.msra.gmra.mxu0 %v2312_v16  ;;  %v8643_v51 = vsub.f32 %v2736_v10, %v8632_v43  ;;  %v2727_v16 = vld [vmem:[%s8565_s13 + $0x88] sm:$0xff]  ;;  %v2955_v11 = vsub.f32 %v8749_v9, %v10187_v40 }
 0x1cf   : > { %2757 = vmatpush1.msra.mxu0 %v8576_v56  ;;  %2850 = vmatprep.mubr.f32.mxu0 %v10198_v3  ;;  %v2890_v7 = vand.u32 4294901760, %v2889_v19  ;;  %v8725_v10 = vand.u32 4294901760, %v2727_v16  ;;  %v2723_v19 = vld [vmem:[%s8565_s13 + $0x68] sm:$0xff] }
 0x1d0   : > { %2759 = vmatprep.subr.mxu0 %v8578_v62  ;;  %v10189_v2 = vand.u32 4294901760, %v8643_v51 }
 0x1d1   : > { %2761 = vmatpush1.msra.mxu0 %v8580_v50  ;;  %2891 = vmatprep.subr.mxu1 %v2890_v7  ;;  %v8741_v60 = vsub.f32 %v2727_v16, %v8725_v10  ;;  %v8743_v7 = vand.u32 4294901760, %v2725_v34 }
 0x1d2   : > { %2763 = vmatprep.subr.mxu0 %v8629_v6  ;;  %v2895_v52 = vsub.f32 %v8643_v51, %v10189_v2  ;;  %v2956_v2 = vand.u32 4294901760, %v2955_v11 }
 0x1d3   : > { %2765 = vmatpush1.msra.mxu0 %v8632_v43  ;;  %v8761_v28 = vsub.f32 %v2725_v34, %v8743_v7 }
 0x1d4   : > { %2767 = vmatprep.subr.mxu0 %v8638_v47  ;;  %v2896_v26 = vand.u32 4294901760, %v2895_v52  ;;  %v10179_v52 = vand.u32 4294901760, %v8723_v5 }
 0x1d5   : > { %2769 = vmatpush1.msra.mxu0 %v8645_v53  ;;  %10424 = vst [vmem:[#allocation4_spill] sm:$0xff] %v8761_v28  ;;  %v10192_v29 = vand.u32 4294901760, %v8761_v28 }
 0x1d6   : > { %2771 = vmatprep.subr.mxu0 %v8653_v61  ;;  %2897 = vmatpush1.msra.mxu1 %v2896_v26  ;;  %v10181_v26 = vand.u32 4294901760, %v8733_v63  ;;  %v2937_v16 = vsub.f32 %v8723_v5, %v10179_v52 }
 0x1d7   : > { %2773 = vmatpush1.msra.mxu0 %v8661_v13  ;;  %2903 = vmatprep.subr.mxu1 %v2902_v17  ;;  %v8751_v17 = vand.u32 4294901760, %v2724_v45 }
 0x1d8   : > { %2775 = vmatprep.subr.mxu0 %v8672_v39  ;;  %2909 = vmatpush1.msra.mxu1 %v2908_v27  ;;  %v10184_v27 = vand.u32 4294901760, %v8741_v60  ;;  %v2943_v25 = vsub.f32 %v8733_v63, %v10181_v26  ;;  %v2938_v52 = vand.u32 4294901760, %v2937_v16 }
 0x1d9   : > { %2777 = vmatpush1.msra.mxu0 %v8683_v1  ;;  %2915 = vmatprep.subr.mxu1 %v2914_v35  ;;  %v8763_v35 = vand.u32 4294901760, %v2723_v19 }
 0x1da   : > { %2779 = vmatprep.subr.mxu0 %v8709_v24  ;;  %2921 = vmatpush1.msra.mxu1 %v2920_v48  ;;  %v8771_v48 = vsub.f32 %v2724_v45, %v8751_v17  ;;  %v2944_v45 = vand.u32 4294901760, %v2943_v25  ;;  %v2961_v25 = vsub.f32 %v8761_v28, %v10192_v29 }
 0x1db   : > { %2781 = vmatpush1.msra.mxu0 %v8716_v30  ;;  %2927 = vmatprep.subr.mxu1 %v2926_v41  ;;  %v2721_v41 = vld [vmem:[%s8565_s13 + $0x58] sm:$0xff]  ;;  %v8782_v26 = vsub.f32 %v2723_v19, %v8763_v35 }
 0x1dc   : > { %2783 = vmatprep.subr.mxu0 %v8725_v10  ;;  %2933 = vmatpush1.msra.mxu1 %v2932_v37  ;;  %10425 = vst [vmem:[#allocation5_spill] sm:$0xff] %v8771_v48  ;;  %v2949_v37 = vsub.f32 %v8741_v60, %v10184_v27  ;;  %v10194_v16 = vand.u32 4294901760, %v8771_v48  ;;  %v2719_v27 = vld [vmem:[%s8565_s13 + $0x48] sm:$0xff]  ;;  %v8801_v40 = vand.u32 4294901760, %v2721_v41  ;;  %v2962_v29 = vand.u32 4294901760, %v2961_v25 }
 0x1dd   : > { %2785 = vmatpush1.msra.mxu0 %v8735_v14  ;;  %10426 = vst [vmem:[#allocation6_spill] sm:$0xff] %v8782_v26  ;;  %2939 = vmatprep.subr.mxu1 %v2938_v52  ;;  %v10195_v58 = vand.u32 4294901760, %v8782_v26  ;;  %v8808_v52 = vand.u32 4294901760, %v2720_v23  ;;  %v8817_v11 = vand.u32 4294901760, %v2719_v27  ;;  %v8826_v25 = vand.u32 4294901760, %v2718_v31 }
 0x1de   : > { %2787 = vmatprep.subr.mxu0 %v8743_v7  ;;  %v2950_v19 = vand.u32 4294901760, %v2949_v37  ;;  %2945 = vmatpush1.msra.mxu1 %v2944_v45  ;;  %v2717_v37 = vld [vmem:[%s8565_s13 + $0x38] sm:$0xff]  ;;  %v8815_v45 = vsub.f32 %v2721_v41, %v8801_v40 }
 0x1df   : > { %2789 = vmatpush1.msra.mxu0 %v8751_v17  ;;  %v2973_v20 = vsub.f32 %v8782_v26, %v10195_v58  ;;  %v2716_v58 = vld [vmem:[%s8565_s13 + $0x30] sm:$0xff]  ;;  %v8836_v3 = vand.u32 4294901760, %v2717_v37 }
 0x1e0   : > { %2791 = vmatprep.subr.mxu0 %v8763_v35  ;;  %2951 = vmatprep.subr.mxu1 %v2950_v19  ;;  %10428 = vst [vmem:[#allocation8_spill] sm:$0xff] %v8815_v45  ;;  %v8824_v19 = vsub.f32 %v2720_v23, %v8808_v52  ;;  %v2714_v23 = vld [vmem:[%s8565_s13 + $0x20] sm:$0xff] }
 0x1e1   : > { %2793 = vmatpush1.msra.mxu0 %v8773_v55  ;;  %2957 = vmatpush1.msra.mxu1 %v2956_v2  ;;  %v2974_v38 = vand.u32 4294901760, %v2973_v20  ;;  %v10211_v2 = vand.u32 4294901760, %v8815_v45  ;;  %10431 = vst [vmem:[#allocation11_spill] sm:$0xff] %v8836_v3 }
 0x1e2   : > { %2795 = vmatprep.subr.mxu0 %v8801_v40  ;;  %10429 = vst [vmem:[#allocation9_spill] sm:$0xff] %v8824_v19  ;;  %2963 = vmatprep.subr.mxu1 %v2962_v29  ;;  %v8844_v29 = vsub.f32 %v2718_v31, %v8826_v25 }
 0x1e3   : > { %2797 = vmatpush1.msra.mxu0 %v8808_v52  ;;  %v2985_v28 = vsub.f32 %v8815_v45, %v10211_v2  ;;  %v2713_v45 = vld [vmem:[%s8565_s13 + $0x18] sm:$0xff] }
 0x1e4   : > { %2799 = vmatprep.subr.mxu0 %v8817_v11  ;;  %10432 = vst [vmem:[#allocation12_spill] sm:$0xff] %v8844_v29 }
 0x1e5   : > { %2801 = vmatpush1.msra.mxu0 %v8826_v25 }
 0x1e6   : > { %2803 = vmatprep.subr.mxu0 %v8836_v3 }
 0x204   : > { %v8754_v21 = vpop.f32.mrf.mxu1 }
 0x206   : > { %v7579_v34 = vpop.f32.mrf.mxu1 }
 0x207   : > { %v8791_v34 = vsub.f32 %v2722_v49, %v8773_v55  ;;  %v2967_v49 = vsub.f32 %v8771_v48, %v10194_v16  ;;  %v10214_v48 = vand.u32 4294901760, %v8824_v19 }
 0x208   : > { %v8795_v36 = vpop.f32.mrf.mxu1 }
 0x209   : > { %10427 = vst [vmem:[#allocation7_spill] sm:$0xff] %v8791_v34  ;;  %v10200_v57 = vand.u32 4294901760, %v8791_v34  ;;  %v2968_v16 = vand.u32 4294901760, %v2967_v49  ;;  %v8834_v49 = vsub.f32 %v2719_v27, %v8817_v11 }
 0x20a   : > { %v7589_v22 = vpop.f32.mrf.mxu1 }
 0x20b   : > { %v2979_v22 = vsub.f32 %v8791_v34, %v10200_v57  ;;  %10430 = vst [vmem:[#allocation10_spill] sm:$0xff] %v8834_v49  ;;  %v2715_v57 = vld [vmem:[%s8565_s13 + $0x28] sm:$0xff]  ;;  %2969 = vmatpush1.msra.mxu1 %v2968_v16  ;;  %v10219_v9 = vand.u32 4294901760, %v8834_v49  ;;  %v8854_v16 = vand.u32 4294901760, %v2716_v58 }
 0x20c   : > { %v1869_v41 = vpop.f32.mrf.mxu0  ;;  %v8830_v18 = vpop.f32.mrf.mxu1  ;;  %2975 = vmatprep.subr.mxu1 %v2974_v38  ;;  %v2991_v38 = vsub.f32 %v8824_v19, %v10214_v48  ;;  %v10437_v19 = vand.u32 4294901760, %v8844_v29 }
 0x20d   : > { %v1946_v34 = vadd.f32 %v8754_v21, %v1869_v41  ;;  %v2980_v26 = vand.u32 4294901760, %v2979_v22  ;;  %v8852_v21 = vsub.f32 %v2717_v37, %v8836_v3  ;;  %10434 = vst [vmem:[#allocation14_spill] sm:$0xff] %v8854_v16  ;;  %v8861_v22 = vand.u32 4294901760, %v2715_v57  ;;  %2805 = vmatpush1.msra.mxu0 %v8854_v16 }
 0x20e   : > { %v7574_v20 = vpop.f32.mrf.mxu0  ;;  %v7599_v27 = vpop.f32.mrf.mxu1  ;;  %v8863_v41 = vand.u32 4294901760, %v2714_v23  ;;  %v2997_v37 = vsub.f32 %v8834_v49, %v10219_v9  ;;  %v2992_v31 = vand.u32 4294901760, %v2991_v38  ;;  %v3003_v3 = vsub.f32 %v8844_v29, %v10437_v19  ;;  %v2712_v9 = vld [vmem:[%s8565_s13 + $0x10] sm:$0xff]  ;;  %v2711_v19 = vld [vmem:[%s8565_s13 + $0x8] sm:$0xff] }
 0x20f   : > { %10433 = vst [vmem:[#allocation13_spill] sm:$0xff] %v8852_v21  ;;  %2981 = vmatpush1.msra.mxu1 %v2980_v26  ;;  %10435 = vst [vmem:[#allocation15_spill] sm:$0xff] %v8861_v22  ;;  %v2986_v27 = vand.u32 4294901760, %v2985_v28  ;;  %v8870_v26 = vsub.f32 %v2716_v58, %v8854_v16  ;;  %v8878_v28 = vsub.f32 %v2715_v57, %v8861_v22  ;;  %2807 = vmatprep.subr.mxu0 %v8861_v22 }
 0x210   : > { %10436 = vst [vmem:[#allocation16_spill] sm:$0xff] %v8863_v41  ;;  %v2019_v20 = vpop.f32.mrf.mxu0  ;;  %v2998_v58 = vand.u32 4294901760, %v2997_v37  ;;  %v10438_v49 = vand.u32 4294901760, %v8852_v21  ;;  %v8887_v38 = vsub.f32 %v2714_v23, %v8863_v41  ;;  %2809 = vmatpush1.msra.mxu0 %v8863_v41  ;;  %v2710_v37 = vld [vmem:[%s8565_s13] sm:$0xff]  ;;  %v8900_v22 = vand.u32 4294901760, %v2712_v9  ;;  %s471_s13 = scalar_lea.vmem %s10161_s2, %s6493_s28 }
 0x211   : > { %v2020_v48 = vadd.f32 %v2019_v20, %v1946_v34  ;;  %2987 = vmatprep.subr.mxu1 %v2986_v27  ;;  %v10236_v34 = vand.u32 4294901760, %v8870_v26  ;;  %v3004_v20 = vand.u32 4294901760, %v3003_v3  ;;  %v8893_v27 = vand.u32 4294901760, %v2713_v45 }
 0x212   : > { %v7584_v2 = vpop.f32.mrf.mxu0  ;;  %v3009_v16 = vsub.f32 %v8852_v21, %v10438_v49  ;;  %10439 = vst [vmem:[#allocation17_spill] sm:$0xff] %v8887_v38  ;;  %2993 = vmatpush1.msra.mxu1 %v2992_v31  ;;  %v10235_v21 = vand.u32 4294901760, %v8887_v38 }
 0x213   : > { %v2094_v57 = vadd.f32 %v8795_v36, %v2020_v48  ;;  %v10232_v2 = vand.u32 4294901760, %v8878_v28  ;;  %2999 = vmatprep.subr.mxu1 %v2998_v58  ;;  %v3015_v23 = vsub.f32 %v8870_v26, %v10236_v34  ;;  %v8906_v36 = vsub.f32 %v2713_v45, %v8893_v27  ;;  %2811 = vmatprep.subr.mxu0 %v8893_v27 }
 0x214   : > { %v2167_v29 = vpop.f32.mrf.mxu0  ;;  %v3010_v49 = vand.u32 4294901760, %v3009_v16  ;;  %3005 = vmatpush1.msra.mxu1 %v3004_v20  ;;  %v8908_v48 = vand.u32 4294901760, %v2711_v19  ;;  %v3027_v58 = vsub.f32 %v8887_v38, %v10235_v21  ;;  %2813 = vmatpush1.msra.mxu0 %v8900_v22 }
 0x215   : > { %v2168_v41 = vadd.f32 %v2167_v29, %v2094_v57  ;;  %v3021_v3 = vsub.f32 %v8878_v28, %v10232_v2  ;;  %10440 = vst [vmem:[#allocation18_spill] sm:$0xff] %v8906_v36  ;;  %v3016_v31 = vand.u32 4294901760, %v3015_v23  ;;  %v8915_v29 = vsub.f32 %v2712_v9, %v8900_v22 }
 0x216   : > { %v7594_v16 = vpop.f32.mrf.mxu0  ;;  %3011 = vmatprep.subr.mxu1 %v3010_v49  ;;  %v8917_v57 = vand.u32 4294901760, %v2710_v37  ;;  %v10233_v2 = vand.u32 4294901760, %v8906_v36  ;;  %2815 = vmatprep.subr.mxu0 %v8908_v48  ;;  %v3028_v49 = vand.u32 4294901760, %v3027_v58 }
 0x217   : > { %10441 = vst [vmem:[#allocation19_spill] sm:$0xff] %v8915_v29  ;;  %v2240_v45 = vadd.f32 %v8830_v18, %v2168_v41  ;;  %v3022_v20 = vand.u32 4294901760, %v3021_v3  ;;  %v8923_v16 = vsub.f32 %v2711_v19, %v8908_v48  ;;  %3017 = vmatpush1.msra.mxu1 %v3016_v31  ;;  %v10234_v23 = vand.u32 4294901760, %v8915_v29 }
 0x218   : > { %v8928_v9 = vsub.f32 %v2710_v37, %v8917_v57  ;;  %2817 = vmatpush1.msra.mxu0 %v8917_v57  ;;  %v3033_v18 = vsub.f32 %v8906_v36, %v10233_v2 }
 0x219   : > { %10442 = vst [vmem:[#allocation20_spill] sm:$0xff] %v8923_v16  ;;  %3023 = vmatprep.subr.mxu1 %v3022_v20  ;;  %v10238_v41 = vand.u32 4294901760, %v8923_v16  ;;  %3096 = vmatprep.subr.mxu0 %v8574_v44  ;;  %v3039_v19 = vsub.f32 %v8915_v29, %v10234_v23 }
 0x21a   : > { %10443 = vst [vmem:[#allocation21_spill] sm:$0xff] %v8928_v9  ;;  %3029 = vmatpush1.msra.mxu1 %v3028_v49  ;;  %v10245_v3 = vand.u32 4294901760, %v8928_v9  ;;  %v3034_v37 = vand.u32 4294901760, %v3033_v18 }
 0x21b   : > { %v3045_v31 = vsub.f32 %v8923_v16, %v10238_v41  ;;  %v3040_v58 = vand.u32 4294901760, %v3039_v19 }
 0x21c   : > { %v3051_v20 = vsub.f32 %v8928_v9, %v10245_v3  ;;  %3035 = vmatprep.subr.mxu1 %v3034_v37 }
 0x21d   : > { %v3046_v2 = vand.u32 4294901760, %v3045_v31  ;;  %3041 = vmatpush1.msra.mxu1 %v3040_v58 }
 0x21e   : > { %v3052_v49 = vand.u32 4294901760, %v3051_v20 }
 0x21f   : > { %3047 = vmatprep.subr.mxu1 %v3046_v2 }
 0x220   : > { %3053 = vmatpush1.msra.mxu1 %v3052_v49  ;;  %v7676_v49 = vld [vmem:[%s7954_s29] sm:$0xff]  ;;  %s6495_s29 = sshll.u32 %s10737_s18, 2 }
 0x221   : > { %3232 = vmatprep.subr.mxu1 %v8568_v33  ;;  %v2692_v9 = vsub.f32 %v7676_v49, %v2240_v45  ;;  %v10454_v49 = vld [vmem:[#allocation16_spill] sm:$0xff]  ;;  %s482_s12 = sadd.s32 %s6495_s29, %s6493_s28 }
 0x222   : > { %s6496_s18 = sshll.u32 %s482_s12, 3 }
 0x27e   : > { %v2394_v23 = vpop.f32.mrf.mxu1 }
 0x280   : > { %v7609_v18 = vpop.f32.mrf.mxu1 }
 0x281   : > { %v6497_v18 = vld [vmem:[%s10162_s3] ss:$0 sm:$0xff] }
 0x282   : > { %v2542_v21 = vpop.f32.mrf.mxu1 }
 0x284   : > { %v7619_v34 = vpop.f32.mrf.mxu1 }
 0x286   : > { %v2318_v44 = vpop.f32.mrf.mxu0  ;;  %v2688_v41 = vpop.f32.mrf.mxu1 }
 0x287   : > { %v2395_v29 = vadd.f32 %v2394_v23, %v2318_v44 }
 0x288   : > { %v7604_v19 = vpop.f32.mrf.mxu0  ;;  %v7629_v16 = vpop.f32.mrf.mxu1 }
 0x289   : > { %v6498_v16 = vld [vmem:[%s10163_s4] ss:$0 sm:$0xff]  ;;  %v10448_v19 = vld [vmem:[#allocation11_spill] sm:$0xff] }
 0x28a   : > { %v2468_v36 = vpop.f32.mrf.mxu0 }
 0x28b   : > { %v2469_v3 = vadd.f32 %v2468_v36, %v2395_v29  ;;  %v10445_v29 = vmov 0.0  }
 0x28c   : > { %v7614_v37 = vpop.f32.mrf.mxu0 }
 0x28d   : > { %v2543_v31 = vadd.f32 %v2542_v21, %v2469_v3  ;;  %v10447_v3 = vld [vmem:[#allocation4_spill] sm:$0xff]  ;;  %v10449_v37 = vld [vmem:[#allocation5_spill] sm:$0xff] }
 0x28e   : > { %v2616_v58 = vpop.f32.mrf.mxu0 }
 0x28f   : > { %v2617_v20 = vadd.f32 %v2616_v58, %v2543_v31  ;;  %v10450_v31 = vld [vmem:[#allocation14_spill] sm:$0xff] }
 0x290   : > { %v7624_v2 = vpop.f32.mrf.mxu0  ;;  %v10451_v58 = vld [vmem:[#allocation6_spill] sm:$0xff] }
 0x291   : > { %v2689_v38 = vadd.f32 %v2688_v41, %v2617_v20  ;;  %v10446_v41 = vld [vmem:[#allocation3_spill] sm:$0xff] }
 0x292   : > { %v10452_v20 = vld [vmem:[#allocation15_spill] sm:$0xff] }
 0x293   : > { %v2693_v34 = vmul.f32 %v2692_v9, %v2689_v38  ;;  %v10453_v2 = vld [vmem:[#allocation7_spill] sm:$0xff] }
 0x295   : > { %v2701_v44 = vmul.f32 %v6497_v18, %v2693_v34  ;;  %v10455_v18 = vld [vmem:[#allocation8_spill] sm:$0xff]  ;;  %v10456_v34 = vld [vmem:[#allocation9_spill] sm:$0xff] }
 0x297   : > { %v2709_v23 = vadd.f32 %v6498_v16, %v2701_v44  ;;  %v10457_v16 = vld [vmem:[#allocation10_spill] sm:$0xff]  ;;  %v10458_v44 = vld [vmem:[#allocation12_spill] sm:$0xff] }
 0x299   : > { %v8954_v36 = vand.u32 4294901760, %v2709_v23 }
 0x29b   : > { %10444 = vst [vmem:[#allocation22_spill] sm:$0xff] %v8954_v36  ;;  %3088 = vmatmul.mubr.f32.vlgmr.msra.gmra.mxu1 %v8954_v36  ;;  %v8958_v21 = vsub.f32 %v2709_v23, %v8954_v36  ;;  %v10459_v23 = vld [vmem:[#allocation13_spill] sm:$0xff]  ;;  %v10462_v36 = vld [vmem:[#allocation19_spill] sm:$0xff] }
 0x29c   : > { %3234 = vmatpush1.msra.mxu1 %v8576_v56  ;;  %3327 = vmatprep.mubr.f32.mxu1 %v10445_v29 }
 0x29d   : > { %3236 = vmatprep.subr.mxu1 %v8578_v62  ;;  %v2853_v38 = vand.u32 4294901760, %v8958_v21 }
 0x29e   : > { %3238 = vmatpush1.msra.mxu1 %v8580_v50 }
 0x29f   : > { %3240 = vmatprep.subr.mxu1 %v8629_v6  ;;  %v2854_v45 = vsub.f32 %v8958_v21, %v2853_v38 }
 0x2a0   : > { %3242 = vmatpush1.msra.mxu1 %v8632_v43 }
 0x2a1   : > { %3244 = vmatprep.subr.mxu1 %v8638_v47  ;;  %v2855_v9 = vand.u32 4294901760, %v2854_v45  ;;  %v10460_v45 = vld [vmem:[#allocation17_spill] sm:$0xff] }
 0x2a2   : > { %3246 = vmatpush1.msra.mxu1 %v8645_v53 }
 0x2a3   : > { %3248 = vmatprep.subr.mxu1 %v8653_v61  ;;  %2856 = vmatmul.mubr.f32.vlgmr.msra.gmra.mxu0 %v2855_v9  ;;  %v10461_v9 = vld [vmem:[#allocation18_spill] sm:$0xff] }
 0x2a4   : > { %3099 = vmatpush1.msra.mxu0 %v8584_v42  ;;  %3250 = vmatpush1.msra.mxu1 %v8661_v13 }
 0x2a5   : > { %3102 = vmatprep.subr.mxu0 %v8587_v4  ;;  %3252 = vmatprep.subr.mxu1 %v8672_v39 }
 0x2a6   : > { %3105 = vmatpush1.msra.mxu0 %v8590_v12  ;;  %3254 = vmatpush1.msra.mxu1 %v8683_v1 }
 0x2a7   : > { %3108 = vmatprep.subr.mxu0 %v8636_v46  ;;  %3256 = vmatprep.subr.mxu1 %v8709_v24 }
 0x2a8   : > { %3111 = vmatpush1.msra.mxu0 %v8643_v51  ;;  %3258 = vmatpush1.msra.mxu1 %v8716_v30 }
 0x2a9   : > { %3114 = vmatprep.subr.mxu0 %v8651_v59  ;;  %3260 = vmatprep.subr.mxu1 %v8725_v10 }
 0x2aa   : > { %3117 = vmatpush1.msra.mxu0 %v8659_v8  ;;  %3262 = vmatpush1.msra.mxu1 %v8735_v14 }
 0x2ab   : > { %3120 = vmatprep.subr.mxu0 %v8670_v32  ;;  %3264 = vmatprep.subr.mxu1 %v8743_v7 }
 0x2ac   : > { %3123 = vmatpush1.msra.mxu0 %v8681_v54  ;;  %3266 = vmatpush1.msra.mxu1 %v8751_v17 }
 0x2ad   : > { %3126 = vmatprep.subr.mxu0 %v8692_v0  ;;  %3268 = vmatprep.subr.mxu1 %v8763_v35 }
 0x2ae   : > { %3129 = vmatpush1.msra.mxu0 %v8701_v15  ;;  %3270 = vmatpush1.msra.mxu1 %v8773_v55 }
 0x2af   : > { %3132 = vmatprep.subr.mxu0 %v8723_v5  ;;  %3272 = vmatprep.subr.mxu1 %v8801_v40 }
 0x2b0   : > { %3135 = vmatpush1.msra.mxu0 %v8733_v63  ;;  %3274 = vmatpush1.msra.mxu1 %v8808_v52 }
 0x2b1   : > { %3138 = vmatprep.subr.mxu0 %v8741_v60  ;;  %3276 = vmatprep.subr.mxu1 %v8817_v11 }
 0x2b2   : > { %3141 = vmatpush1.msra.mxu0 %v10446_v41  ;;  %3278 = vmatpush1.msra.mxu1 %v8826_v25 }
 0x2b3   : > { %3144 = vmatprep.subr.mxu0 %v10447_v3  ;;  %3280 = vmatprep.subr.mxu1 %v10448_v19 }
 0x2b4   : > { %3147 = vmatpush1.msra.mxu0 %v10449_v37  ;;  %3282 = vmatpush1.msra.mxu1 %v10450_v31 }
 0x2b5   : > { %3150 = vmatprep.subr.mxu0 %v10451_v58  ;;  %3284 = vmatprep.subr.mxu1 %v10452_v20 }
 0x2b6   : > { %3153 = vmatpush1.msra.mxu0 %v10453_v2  ;;  %3286 = vmatpush1.msra.mxu1 %v10454_v49 }
 0x2b7   : > { %3156 = vmatprep.subr.mxu0 %v10455_v18  ;;  %3288 = vmatprep.subr.mxu1 %v8893_v27 }
 0x2b8   : > { %3159 = vmatpush1.msra.mxu0 %v10456_v34  ;;  %3290 = vmatpush1.msra.mxu1 %v8900_v22 }
 0x2b9   : > { %3162 = vmatprep.subr.mxu0 %v10457_v16  ;;  %3292 = vmatprep.subr.mxu1 %v8908_v48 }
 0x2ba   : > { %3165 = vmatpush1.msra.mxu0 %v10458_v44  ;;  %3294 = vmatpush1.msra.mxu1 %v8917_v57 }
 0x2bb   : > { %3168 = vmatprep.subr.mxu0 %v10459_v23  ;;  %3331 = vmatmul.mubr.f32.vlgmr.msra.gmra.mxu1 %v2853_v38  ;;  %v3638_v38 = vld [vmem:[%s10168_s9 + $0xe8] sm:$0xff] }
 0x2bc   : > { %3506 = vmatprep.subr.mxu1 %v8568_v33  ;;  %3171 = vmatpush1.msra.mxu0 %v8870_v26  ;;  %v10463_v33 = vld [vmem:[#allocation20_spill] sm:$0xff] }
 0x2bd   : > { %3508 = vmatpush1.msra.mxu1 %v8576_v56  ;;  %3174 = vmatprep.subr.mxu0 %v8878_v28  ;;  %v10464_v56 = vld [vmem:[#allocation21_spill] sm:$0xff] }
 0x2be   : > { %3510 = vmatprep.subr.mxu1 %v8578_v62  ;;  %3177 = vmatpush1.msra.mxu0 %v10460_v45  ;;  %v10465_v62 = vld [vmem:[#allocation2_spill] sm:$0xff] }
 0x2bf   : > { %3512 = vmatpush1.msra.mxu1 %v8580_v50  ;;  %3180 = vmatprep.subr.mxu0 %v10461_v9  ;;  %v10466_v50 = vand.u32 4294901760, %v10465_v62 }
 0x2c0   : > { %3514 = vmatprep.subr.mxu1 %v8629_v6  ;;  %3183 = vmatpush1.msra.mxu0 %v10462_v36  ;;  %v10467_v6 = vand.u32 4294901760, %v8584_v42  ;;  %v10471_v42 = vand.u32 4294901760, %v8643_v51  ;;  %v10475_v51 = vand.u32 4294901760, %v8681_v54  ;;  %v10482_v54 = vand.u32 4294901760, %v10447_v3  ;;  %v3637_v3 = vld [vmem:[%s10168_s9 + $0xe0] sm:$0xff] }
 0x2c1   : > { %3516 = vmatpush1.msra.mxu1 %v8632_v43  ;;  %3186 = vmatprep.subr.mxu0 %v10463_v33  ;;  %v10468_v43 = vand.u32 4294901760, %v8587_v4  ;;  %v10472_v4 = vand.u32 4294901760, %v8651_v59  ;;  %v10476_v59 = vand.u32 4294901760, %v8692_v0  ;;  %v10484_v0 = vand.u32 4294901760, %v10451_v58 }
 0x2c2   : > { %3518 = vmatprep.subr.mxu1 %v8638_v47  ;;  %3189 = vmatpush1.msra.mxu0 %v10464_v56  ;;  %v10469_v47 = vand.u32 4294901760, %v8590_v12  ;;  %v10473_v12 = vand.u32 4294901760, %v8659_v8  ;;  %v10478_v8 = vand.u32 4294901760, %v8723_v5  ;;  %v10488_v5 = vand.u32 4294901760, %v10457_v16 }
 0x2c3   : > { %3222 = vmatprep.mubr.f32.mxu0 %v10445_v29  ;;  %3520 = vmatpush1.msra.mxu1 %v8645_v53  ;;  %v10470_v53 = vand.u32 4294901760, %v8636_v46  ;;  %v10474_v46 = vand.u32 4294901760, %v8670_v32  ;;  %v10480_v32 = vand.u32 4294901760, %v8741_v60  ;;  %v10492_v60 = vand.u32 4294901760, %v8870_v26 }
 0x2c4   : > { %3225 = vmatmul.mubr.f32.vlgmr.msra.gmra.mxu0 %v8958_v21  ;;  %3340 = vmatprep.subr.mxu0 %v10466_v50  ;;  %v3636_v50 = vld [vmem:[%s10168_s9 + $0xd8] sm:$0xff] }
 0x2c5   : > { %3522 = vmatprep.subr.mxu1 %v8653_v61  ;;  %3344 = vmatpush1.msra.mxu0 %v10467_v6  ;;  %v10477_v61 = vand.u32 4294901760, %v8701_v15  ;;  %v10485_v15 = vand.u32 4294901760, %v10453_v2 }
 0x2c6   : > { %3524 = vmatpush1.msra.mxu1 %v8661_v13  ;;  %3348 = vmatprep.subr.mxu0 %v10468_v43  ;;  %v10479_v13 = vand.u32 4294901760, %v8733_v63  ;;  %v10490_v63 = vand.u32 4294901760, %v10459_v23 }
 0x2c7   : > { %3526 = vmatprep.subr.mxu1 %v8672_v39  ;;  %3352 = vmatpush1.msra.mxu0 %v10469_v47  ;;  %v10481_v39 = vand.u32 4294901760, %v10446_v41  ;;  %v3622_v41 = vld [vmem:[%s10168_s9 + $0x68] sm:$0xff] }
 0x2c8   : > { %3528 = vmatpush1.msra.mxu1 %v8683_v1  ;;  %3356 = vmatprep.subr.mxu0 %v10470_v53  ;;  %v10483_v1 = vand.u32 4294901760, %v10449_v37  ;;  %v9172_v58 = vand.u32 4294901760, %v3622_v41 }
 0x2c9   : > { %3530 = vmatprep.subr.mxu1 %v8709_v24  ;;  %3360 = vmatpush1.msra.mxu0 %v10471_v42  ;;  %v10486_v24 = vand.u32 4294901760, %v10455_v18  ;;  %v9184_v18 = vand.u32 4294901760, %v3637_v3  ;;  %v3620_v42 = vld [vmem:[%s10168_s9 + $0x58] sm:$0xff] }
 0x2ca   : > { %3532 = vmatpush1.msra.mxu1 %v8716_v30  ;;  %3364 = vmatprep.subr.mxu0 %v10472_v4  ;;  %v10487_v30 = vand.u32 4294901760, %v10456_v34 }
 0x2cb   : > { %3534 = vmatprep.subr.mxu1 %v8725_v10  ;;  %3368 = vmatpush1.msra.mxu0 %v10473_v12  ;;  %v10489_v10 = vand.u32 4294901760, %v10458_v44 }
 0x2cc   : > { %3536 = vmatpush1.msra.mxu1 %v8735_v14  ;;  %3372 = vmatprep.subr.mxu0 %v10474_v46  ;;  %v10491_v14 = vld [vmem:[#allocation22_spill] sm:$0xff] }
 0x2cd   : > { %3538 = vmatprep.subr.mxu1 %v8743_v7  ;;  %3376 = vmatpush1.msra.mxu0 %v10475_v51  ;;  %v10493_v7 = vand.u32 4294901760, %v8878_v28  ;;  %v3639_v28 = vld [vmem:[%s10168_s9 + $0xf0] sm:$0xff] }
 0x2ce   : > { %3540 = vmatpush1.msra.mxu1 %v8751_v17  ;;  %3380 = vmatprep.subr.mxu0 %v10476_v59  ;;  %v10494_v17 = vand.u32 4294901760, %v10460_v45  ;;  %v9198_v45 = vsub.f32 %v3622_v41, %v9172_v58  ;;  %v3635_v59 = vld [vmem:[%s10168_s9 + $0xd0] sm:$0xff] }
 0x2cf   : > { %3542 = vmatprep.subr.mxu1 %v8763_v35  ;;  %3384 = vmatpush1.msra.mxu0 %v10477_v61  ;;  %v10495_v35 = vand.u32 4294901760, %v10461_v9 }
 0x2d0   : > { %3544 = vmatpush1.msra.mxu1 %v8773_v55  ;;  %3388 = vmatprep.subr.mxu0 %v10478_v8  ;;  %v10497_v55 = vand.u32 4294901760, %v10463_v33  ;;  %v9224_v53 = vand.u32 4294901760, %v9198_v45 }
 0x2d1   : > { %3546 = vmatprep.subr.mxu1 %v8801_v40  ;;  %3392 = vmatpush1.msra.mxu0 %v10479_v13  ;;  %v10496_v40 = vand.u32 4294901760, %v10462_v36 }
 0x2d2   : > { %3548 = vmatpush1.msra.mxu1 %v8808_v52  ;;  %3396 = vmatprep.subr.mxu0 %v10480_v32  ;;  %v10498_v52 = vand.u32 4294901760, %v10464_v56  ;;  %v9207_v56 = vsub.f32 %v3637_v3, %v9184_v18  ;;  %10507 = vst [vmem:[#allocation16_spill] sm:$0xff] %v9224_v53  ;;  %v3773_v13 = vsub.f32 %v9198_v45, %v9224_v53  ;;  %v9251_v32 = vand.u32 4294901760, %v3636_v50 }
 0x2d3   : > { %3550 = vmatprep.subr.mxu1 %v8817_v11  ;;  %3400 = vmatpush1.msra.mxu0 %v10481_v39  ;;  %v3640_v11 = vld [vmem:[%s10168_s9 + $0xf8] sm:$0xff]  ;;  %v3619_v39 = vld [vmem:[%s10168_s9 + $0x50] sm:$0xff] }
 0x2d4   : > { %3552 = vmatpush1.msra.mxu1 %v8826_v25  ;;  %3404 = vmatprep.subr.mxu0 %v10482_v54  ;;  %v9130_v25 = vand.u32 4294901760, %v3640_v11  ;;  %v9235_v46 = vand.u32 4294901760, %v9207_v56 }
 0x2d5   : > { %3554 = vmatprep.subr.mxu1 %v10448_v19  ;;  %3408 = vmatpush1.msra.mxu0 %v10483_v1 }
 0x2d6   : > { %3556 = vmatpush1.msra.mxu1 %v10450_v31  ;;  %3412 = vmatprep.subr.mxu0 %v10484_v0  ;;  %10499 = vst [vmem:[#allocation3_spill] sm:$0xff] %v9130_v25  ;;  %v9170_v31 = vand.u32 4294901760, %v3638_v38  ;;  %10509 = vst [vmem:[#allocation9_spill] sm:$0xff] %v9235_v46  ;;  %v3892_v1 = vsub.f32 %v9207_v56, %v9235_v46 }
 0x2d7   : > { %3558 = vmatprep.subr.mxu1 %v10452_v20  ;;  %3416 = vmatpush1.msra.mxu0 %v10485_v15  ;;  %v3621_v20 = vld [vmem:[%s10168_s9 + $0x60] sm:$0xff]  ;;  %v9263_v15 = vand.u32 4294901760, %v3620_v42 }
 0x2d8   : > { %3560 = vmatpush1.msra.mxu1 %v10454_v49  ;;  %3420 = vmatprep.subr.mxu0 %v10486_v24  ;;  %v9186_v34 = vand.u32 4294901760, %v3621_v20  ;;  %v9195_v23 = vsub.f32 %v3638_v38, %v9170_v31  ;;  %v3634_v24 = vld [vmem:[%s10168_s9 + $0xc8] sm:$0xff] }
 0x2d9   : > { %3562 = vmatprep.subr.mxu1 %v8893_v27  ;;  %3424 = vmatpush1.msra.mxu0 %v10487_v30  ;;  %v9141_v27 = vsub.f32 %v3640_v11, %v9130_v25  ;;  %v3618_v30 = vld [vmem:[%s10168_s9 + $0x48] sm:$0xff]  ;;  %v9303_v11 = vand.u32 4294901760, %v3634_v24 }
 0x2da   : > { %3564 = vmatpush1.msra.mxu1 %v8900_v22  ;;  %3428 = vmatprep.subr.mxu0 %v10488_v5  ;;  %v3624_v22 = vld [vmem:[%s10168_s9 + $0x78] sm:$0xff]  ;;  %v9210_v62 = vsub.f32 %v3621_v20, %v9186_v34  ;;  %v9221_v47 = vand.u32 4294901760, %v9195_v23 }
 0x2db   : > { %3566 = vmatprep.subr.mxu1 %v8908_v48  ;;  %3432 = vmatpush1.msra.mxu0 %v10489_v10  ;;  %v9135_v26 = vand.u32 4294901760, %v3624_v22  ;;  %10500 = vst [vmem:[#allocation4_spill] sm:$0xff] %v9141_v27  ;;  %v9143_v48 = vand.u32 4294901760, %v3639_v28  ;;  %v9165_v19 = vand.u32 4294901760, %v9141_v27  ;;  %v9274_v10 = vand.u32 4294901760, %v3773_v13 }
 0x2dc   : > { %3568 = vmatpush1.msra.mxu1 %v8917_v57  ;;  %3601 = vmatprep.mubr.f32.mxu1 %v10445_v29  ;;  %v3623_v57 = vld [vmem:[%s10168_s9 + $0x70] sm:$0xff]  ;;  %10506 = vst [vmem:[#allocation7_spill] sm:$0xff] %v9221_v47  ;;  %v9238_v51 = vand.u32 4294901760, %v9210_v62  ;;  %v3885_v8 = vsub.f32 %v9195_v23, %v9221_v47 }
 0x2dd   : > { %3436 = vmatprep.subr.mxu0 %v10490_v63  ;;  %3603 = vmatmul.mubr.f32.vlgmr.msra.gmra.mxu1 %v10491_v14  ;;  %v9150_v36 = vsub.f32 %v3624_v22, %v9135_v26  ;;  %v9152_v21 = vand.u32 4294901760, %v3623_v57  ;;  %10501 = vst [vmem:[#allocation11_spill] sm:$0xff] %v9165_v19  ;;  %v9168_v37 = vsub.f32 %v3639_v28, %v9143_v48  ;;  %10514 = vst [vmem:[#allocation18_spill] sm:$0xff] %v9274_v10  ;;  %v3617_v28 = vld [vmem:[%s10168_s9 + $0x40] sm:$0xff] }
 0x2de   : > { %3440 = vmatpush1.msra.mxu0 %v10492_v60  ;;  %3497 = vmatprep.mubr.f32.mxu0 %v10445_v29  ;;  %v3871_v16 = vsub.f32 %v9141_v27, %v9165_v19  ;;  %10510 = vst [vmem:[#allocation10_spill] sm:$0xff] %v9238_v51  ;;  %v3780_v0 = vsub.f32 %v9210_v62, %v9238_v51  ;;  %v9272_v5 = vand.u32 4294901760, %v3885_v8  ;;  %v3633_v60 = vld [vmem:[%s10168_s9 + $0xc0] sm:$0xff]  ;;  %v9305_v22 = vand.u32 4294901760, %v3618_v30  ;;  %v3632_v8 = vld [vmem:[%s10168_s9 + $0xb8] sm:$0xff]  ;;  %v3631_v29 = vld [vmem:[%s10168_s9 + $0xb0] sm:$0xff] }
 0x2df   : > { %3444 = vmatprep.subr.mxu0 %v10493_v7  ;;  %v9179_v2 = vand.u32 4294901760, %v9150_v36  ;;  %v9182_v49 = vsub.f32 %v3623_v57, %v9152_v21  ;;  %v9192_v44 = vand.u32 4294901760, %v9168_v37  ;;  %v9277_v63 = vsub.f32 %v3636_v50, %v9251_v32  ;;  %v3611_v19 = vld [vmem:[%s10168_s9 + $0x10] sm:$0xff] }
 0x2e0   : > { %3448 = vmatpush1.msra.mxu0 %v10494_v17  ;;  %v9216_v6 = vand.u32 4294901760, %v3871_v16  ;;  %10513 = vst [vmem:[#allocation17_spill] sm:$0xff] %v9272_v5  ;;  %v9286_v7 = vand.u32 4294901760, %v3892_v1  ;;  %v9288_v17 = vand.u32 4294901760, %v3780_v0  ;;  %v9318_v41 = vand.u32 4294901760, %v3633_v60 }
 0x2e1   : > { %3452 = vmatprep.subr.mxu0 %v10495_v35  ;;  %10502 = vst [vmem:[#allocation5_spill] sm:$0xff] %v9179_v2  ;;  %10503 = vst [vmem:[#allocation14_spill] sm:$0xff] %v9192_v44  ;;  %v3759_v9 = vsub.f32 %v9150_v36, %v9179_v2  ;;  %v9204_v33 = vand.u32 4294901760, %v9182_v49  ;;  %v3878_v43 = vsub.f32 %v9168_v37, %v9192_v44  ;;  %v9320_v3 = vand.u32 4294901760, %v3617_v28 }
 0x2e2   : > { %3456 = vmatpush1.msra.mxu0 %v10496_v40  ;;  %10505 = vst [vmem:[#allocation15_spill] sm:$0xff] %v9216_v6  ;;  %6765 = vmatprep.subr.mxu1 %v9216_v6  ;;  %10515 = vst [vmem:[#allocation19_spill] sm:$0xff] %v9286_v7  ;;  %v9291_v35 = vsub.f32 %v3620_v42, %v9263_v15  ;;  %v9293_v40 = vand.u32 4294901760, %v3619_v39  ;;  %v9333_v50 = vsub.f32 %v3618_v30, %v9305_v22  ;;  %v3614_v6 = vld [vmem:[%s10168_s9 + $0x28] sm:$0xff] }
 0x2e3   : > { %3460 = vmatprep.subr.mxu0 %v10497_v55  ;;  %10504 = vst [vmem:[#allocation6_spill] sm:$0xff] %v9204_v33  ;;  %v9230_v4 = vand.u32 4294901760, %v3759_v9  ;;  %v3766_v12 = vsub.f32 %v9182_v49, %v9204_v33  ;;  %v9245_v61 = vand.u32 4294901760, %v3878_v43  ;;  %10516 = vst [vmem:[#allocation20_spill] sm:$0xff] %v9288_v17  ;;  %v9298_v55 = vand.u32 4294901760, %v9277_v63  ;;  %v3627_v33 = vld [vmem:[%s10168_s9 + $0x90] sm:$0xff] }
 0x2e4   : > { %3464 = vmatpush1.msra.mxu0 %v10498_v52  ;;  %v9313_v57 = vand.u32 4294901760, %v9291_v35  ;;  %v9316_v38 = vsub.f32 %v3619_v39, %v9293_v40  ;;  %v9330_v9 = vsub.f32 %v3634_v24, %v9303_v11  ;;  %v9360_v0 = vand.u32 4294901760, %v9333_v50  ;;  %v3616_v24 = vld [vmem:[%s10168_s9 + $0x38] sm:$0xff] }
 0x2e5   : > { %3499 = vmatmul.mubr.f32.vlgmr.msra.gmra.mxu0 %v10491_v14  ;;  %6730 = vmatprep.subr.mxu0 %v9130_v25  ;;  %10508 = vst [vmem:[#allocation8_spill] sm:$0xff] %v9230_v4  ;;  %10511 = vst [vmem:[#allocation12_spill] sm:$0xff] %v9245_v61  ;;  %v9257_v54 = vand.u32 4294901760, %v3766_v12  ;;  %v9279_v14 = vand.u32 4294901760, %v3635_v59  ;;  %v3899_v20 = vsub.f32 %v9277_v63, %v9298_v55 }
 0x2e6   : > { %6731 = vmatpush3.msra.mxu0 %v9135_v26  ;;  %6766 = vmatpush3.msra.mxu1 %v9230_v4  ;;  %10517 = vst [vmem:[#allocation21_spill] sm:$0xff] %v9298_v55  ;;  %10518 = vst [vmem:[#allocation2_spill] sm:$0xff] %v9313_v57  ;;  %v3787_v43 = vsub.f32 %v9291_v35, %v9313_v57  ;;  %v9340_v42 = vand.u32 4294901760, %v9316_v38  ;;  %v9343_v12 = vsub.f32 %v3633_v60, %v9318_v41  ;;  %v3630_v4 = vld [vmem:[%s10168_s9 + $0xa8] sm:$0xff] }
 0x2e7   : > { %6732 = vmatprep.subr.mxu0 %v9143_v48  ;;  %10512 = vst [vmem:[#allocation13_spill] sm:$0xff] %v9257_v54  ;;  %6767 = vmatprep.subr.mxu1 %v9245_v61  ;;  %v9301_v52 = vsub.f32 %v3635_v59, %v9279_v14  ;;  %v9346_v59 = vsub.f32 %v3617_v28, %v9320_v3  ;;  %v9352_v13 = vand.u32 4294901760, %v3899_v20  ;;  %v9357_v1 = vand.u32 4294901760, %v9330_v9 }
 0x2e8   : > { %6733 = vmatpush3.msra.mxu0 %v9152_v21  ;;  %6768 = vmatpush3.msra.mxu1 %v9257_v54  ;;  %10520 = vst [vmem:[#allocation23_spill] sm:$0xff] %v9340_v42  ;;  %10523 = vst [vmem:[#allocation26_spill] sm:$0xff] %v9360_v0  ;;  %v9366_v30 = vand.u32 4294901760, %v3787_v43  ;;  %v3794_v60 = vsub.f32 %v9316_v38, %v9340_v42  ;;  %v9371_v28 = vand.u32 4294901760, %v9343_v12  ;;  %v9399_v61 = vand.u32 4294901760, %v3616_v24 }
 0x2e9   : > { %6734 = vmatprep.subr.mxu0 %v9170_v31  ;;  %6769 = vmatprep.subr.mxu1 %v9272_v5  ;;  %v9327_v16 = vand.u32 4294901760, %v9301_v52  ;;  %10521 = vst [vmem:[#allocation24_spill] sm:$0xff] %v9352_v13  ;;  %10522 = vst [vmem:[#allocation25_spill] sm:$0xff] %v9357_v1  ;;  %v9374_v20 = vand.u32 4294901760, %v9346_v59  ;;  %v3913_v43 = vsub.f32 %v9330_v9, %v9357_v1  ;;  %v3615_v5 = vld [vmem:[%s10168_s9 + $0x30] sm:$0xff]  ;;  %v3613_v1 = vld [vmem:[%s10168_s9 + $0x20] sm:$0xff] }
 0x2ea   : > { %6735 = vmatpush3.msra.mxu0 %v9172_v58  ;;  %6770 = vmatpush3.msra.mxu1 %v9274_v10  ;;  %10524 = vst [vmem:[#allocation27_spill] sm:$0xff] %v9366_v30  ;;  %10525 = vst [vmem:[#allocation28_spill] sm:$0xff] %v9371_v28  ;;  %v9387_v10 = vand.u32 4294901760, %v3632_v8  ;;  %v9393_v54 = vand.u32 4294901760, %v3794_v60  ;;  %v9456_v57 = vand.u32 4294901760, %v3613_v1 }
 0x2eb   : > { %6736 = vmatprep.subr.mxu0 %v9184_v18  ;;  %6771 = vmatprep.subr.mxu1 %v9286_v7  ;;  %10519 = vst [vmem:[#allocation22_spill] sm:$0xff] %v9327_v16  ;;  %v3906_v39 = vsub.f32 %v9301_v52, %v9327_v16  ;;  %10526 = vst [vmem:[#allocation29_spill] sm:$0xff] %v9374_v20  ;;  %v3801_v7 = vsub.f32 %v9333_v50, %v9360_v0  ;;  %v9408_v60 = vand.u32 4294901760, %v3913_v43  ;;  %v3629_v0 = vld [vmem:[%s10168_s9 + $0xa0] sm:$0xff] }
 0x2ec   : > { %6737 = vmatpush3.msra.mxu0 %v9186_v34  ;;  %6772 = vmatpush3.msra.mxu1 %v9288_v17  ;;  %10528 = vst [vmem:[#allocation31_spill] sm:$0xff] %v9393_v54  ;;  %v9482_v46 = vsub.f32 %v3613_v1, %v9456_v57  ;;  %v3612_v1 = vld [vmem:[%s10168_s9 + $0x18] sm:$0xff] }
 0x2ed   : > { %6738 = vmatprep.subr.mxu0 %v9251_v32  ;;  %6773 = vmatprep.subr.mxu1 %v9352_v13  ;;  %v9381_v17 = vand.u32 4294901760, %v3906_v39  ;;  %v3920_v39 = vsub.f32 %v9343_v12, %v9371_v28  ;;  %v3808_v13 = vsub.f32 %v9346_v59, %v9374_v20  ;;  %10529 = vst [vmem:[#allocation32_spill] sm:$0xff] %v9408_v60  ;;  %v9415_v20 = vand.u32 4294901760, %v3631_v29 }
 0x2ee   : > { %6739 = vmatpush3.msra.mxu0 %v9263_v15  ;;  %6774 = vmatpush3.msra.mxu1 %v9366_v30  ;;  %v9410_v30 = vand.u32 4294901760, %v3801_v7  ;;  %v9413_v28 = vsub.f32 %v3632_v8, %v9387_v10  ;;  %v9430_v8 = vsub.f32 %v3616_v24, %v9399_v61  ;;  %10543 = vst [vmem:[#allocation46_spill] sm:$0xff] %v9482_v46 }
 0x2ef   : > { %6740 = vmatprep.subr.mxu0 %v9279_v14  ;;  %10527 = vst [vmem:[#allocation30_spill] sm:$0xff] %v9381_v17  ;;  %6775 = vmatprep.subr.mxu1 %v9381_v17  ;;  %v9425_v43 = vand.u32 4294901760, %v3920_v39  ;;  %v9427_v7 = vand.u32 4294901760, %v3808_v13  ;;  %v9432_v17 = vand.u32 4294901760, %v3615_v5  ;;  %v9440_v16 = vsub.f32 %v3631_v29, %v9415_v20 }
 0x2f0   : > { %6741 = vmatpush3.msra.mxu0 %v9293_v40  ;;  %10530 = vst [vmem:[#allocation33_spill] sm:$0xff] %v9410_v30  ;;  %6776 = vmatpush3.msra.mxu1 %v9393_v54  ;;  %10533 = vst [vmem:[#allocation36_spill] sm:$0xff] %v9430_v8  ;;  %v9437_v42 = vand.u32 4294901760, %v9413_v28  ;;  %v9442_v54 = vand.u32 4294901760, %v3630_v4  ;;  %v9444_v39 = vand.u32 4294901760, %v3614_v6  ;;  %v9449_v13 = vand.u32 4294901760, %v9430_v8 }
 0x2f1   : > { %6742 = vmatprep.subr.mxu0 %v9303_v11  ;;  %10531 = vst [vmem:[#allocation34_spill] sm:$0xff] %v9425_v43  ;;  %10532 = vst [vmem:[#allocation35_spill] sm:$0xff] %v9427_v7  ;;  %6777 = vmatprep.subr.mxu1 %v9408_v60  ;;  %v9452_v24 = vsub.f32 %v3615_v5, %v9432_v17  ;;  %v9454_v60 = vand.u32 4294901760, %v3629_v0  ;;  %v9463_v55 = vand.u32 4294901760, %v9440_v16 }
 0x2f2   : > { %6743 = vmatpush3.msra.mxu0 %v9305_v22  ;;  %10534 = vst [vmem:[#allocation37_spill] sm:$0xff] %v9437_v42  ;;  %10535 = vst [vmem:[#allocation38_spill] sm:$0xff] %v9440_v16  ;;  %6778 = vmatpush3.msra.mxu1 %v9410_v30  ;;  %v3927_v29 = vsub.f32 %v9413_v28, %v9437_v42  ;;  %v9466_v30 = vsub.f32 %v3630_v4, %v9442_v54 }
 0x2f3   : > { %6744 = vmatprep.subr.mxu0 %v9318_v41  ;;  %10536 = vst [vmem:[#allocation39_spill] sm:$0xff] %v9449_v13  ;;  %10537 = vst [vmem:[#allocation40_spill] sm:$0xff] %v9452_v24  ;;  %6779 = vmatprep.subr.mxu1 %v9425_v43  ;;  %v9469_v5 = vsub.f32 %v3614_v6, %v9444_v39  ;;  %v3815_v51 = vsub.f32 %v9430_v8, %v9449_v13  ;;  %v9476_v43 = vand.u32 4294901760, %v9452_v24  ;;  %v3628_v6 = vld [vmem:[%s10168_s9 + $0x98] sm:$0xff] }
 0x2f4   : > { %6745 = vmatpush3.msra.mxu0 %v9320_v3  ;;  %10538 = vst [vmem:[#allocation41_spill] sm:$0xff] %v9463_v55  ;;  %10539 = vst [vmem:[#allocation42_spill] sm:$0xff] %v9466_v30  ;;  %6780 = vmatpush3.msra.mxu1 %v9427_v7  ;;  %v9479_v42 = vsub.f32 %v3629_v0, %v9454_v60  ;;  %v9488_v4 = vand.u32 4294901760, %v3927_v29  ;;  %v3934_v7 = vsub.f32 %v9440_v16, %v9463_v55 }
 0x2f5   : > { %6746 = vmatprep.subr.mxu0 %v9387_v10  ;;  %10540 = vst [vmem:[#allocation43_spill] sm:$0xff] %v9469_v5  ;;  %10541 = vst [vmem:[#allocation44_spill] sm:$0xff] %v9476_v43  ;;  %v9493_v13 = vand.u32 4294901760, %v9466_v30  ;;  %v9496_v0 = vand.u32 4294901760, %v9469_v5  ;;  %v9502_v53 = vand.u32 4294901760, %v3815_v51  ;;  %v3822_v29 = vsub.f32 %v9452_v24, %v9476_v43 }
 0x2f6   : > { %6747 = vmatpush3.msra.mxu0 %v9399_v61  ;;  %10542 = vst [vmem:[#allocation45_spill] sm:$0xff] %v9479_v42  ;;  %10544 = vst [vmem:[#allocation47_spill] sm:$0xff] %v9488_v4  ;;  %v9507_v47 = vand.u32 4294901760, %v9479_v42  ;;  %v9510_v55 = vand.u32 4294901760, %v9482_v46  ;;  %6781 = vmatprep.subr.mxu1 %v9488_v4  ;;  %v9517_v44 = vand.u32 4294901760, %v3934_v7  ;;  %v9523_v2 = vand.u32 4294901760, %v3628_v6 }
 0x2f7   : > { %6748 = vmatprep.subr.mxu0 %v9415_v20  ;;  %10545 = vst [vmem:[#allocation48_spill] sm:$0xff] %v9493_v13  ;;  %10546 = vst [vmem:[#allocation49_spill] sm:$0xff] %v9496_v0  ;;  %v3941_v51 = vsub.f32 %v9466_v30, %v9493_v13  ;;  %v3829_v43 = vsub.f32 %v9469_v5, %v9496_v0  ;;  %6782 = vmatpush3.msra.mxu1 %v9502_v53  ;;  %v9529_v24 = vand.u32 4294901760, %v3822_v29  ;;  %v3626_v0 = vld [vmem:[%s10168_s9 + $0x88] sm:$0xff] }
 0x2f8   : > { %6749 = vmatpush3.msra.mxu0 %v9432_v17  ;;  %10547 = vst [vmem:[#allocation50_spill] sm:$0xff] %v9502_v53  ;;  %10548 = vst [vmem:[#allocation51_spill] sm:$0xff] %v9507_v47  ;;  %v3948_v7 = vsub.f32 %v9479_v42, %v9507_v47  ;;  %v3836_v4 = vsub.f32 %v9482_v46, %v9510_v55  ;;  %v9535_v13 = vand.u32 4294901760, %v3612_v1  ;;  %v3610_v5 = vld [vmem:[%s10168_s9 + $0x8] sm:$0xff]  ;;  %6783 = vmatprep.subr.mxu1 %v9517_v44  ;;  %v3625_v46 = vld [vmem:[%s10168_s9 + $0x80] sm:$0xff] }
 0x2f9   : > { %6750 = vmatprep.subr.mxu0 %v9442_v54  ;;  %10549 = vst [vmem:[#allocation52_spill] sm:$0xff] %v9510_v55  ;;  %10550 = vst [vmem:[#allocation53_spill] sm:$0xff] %v9517_v44  ;;  %v9544_v29 = vand.u32 4294901760, %v3941_v51  ;;  %v9546_v53 = vand.u32 4294901760, %v3829_v43  ;;  %v9549_v47 = vsub.f32 %v3628_v6, %v9523_v2  ;;  %v9551_v55 = vand.u32 4294901760, %v3627_v33  ;;  %v3609_v42 = vld [vmem:[%s10168_s9] sm:$0xff]  ;;  %6784 = vmatpush3.msra.mxu1 %v9529_v24 }
 0x2fa   : > { %6751 = vmatpush3.msra.mxu0 %v9444_v39  ;;  %10551 = vst [vmem:[#allocation54_spill] sm:$0xff] %v9529_v24  ;;  %10552 = vst [vmem:[#allocation55_spill] sm:$0xff] %v9535_v13  ;;  %v9561_v51 = vand.u32 4294901760, %v3948_v7  ;;  %v9563_v43 = vand.u32 4294901760, %v3836_v4  ;;  %v9566_v6 = vsub.f32 %v3612_v1, %v9535_v13  ;;  %v9568_v44 = vand.u32 4294901760, %v3611_v19 }
 0x2fb   : > { %6752 = vmatprep.subr.mxu0 %v9454_v60  ;;  %10553 = vst [vmem:[#allocation56_spill] sm:$0xff] %v9544_v29  ;;  %10554 = vst [vmem:[#allocation57_spill] sm:$0xff] %v9546_v53  ;;  %6785 = vmatprep.subr.mxu1 %v9544_v29  ;;  %v9573_v30 = vand.u32 4294901760, %v9549_v47  ;;  %v9576_v16 = vsub.f32 %v3627_v33, %v9551_v55  ;;  %v9578_v24 = vand.u32 4294901760, %v3626_v0  ;;  %v9580_v7 = vand.u32 4294901760, %v3610_v5 }
 0x2fc   : > { %6753 = vmatpush3.msra.mxu0 %v9456_v57  ;;  %10555 = vst [vmem:[#allocation58_spill] sm:$0xff] %v9549_v47  ;;  %10556 = vst [vmem:[#allocation59_spill] sm:$0xff] %v9551_v55  ;;  %6786 = vmatpush3.msra.mxu1 %v9546_v53  ;;  %v9585_v4 = vand.u32 4294901760, %v9566_v6  ;;  %v9588_v1 = vsub.f32 %v3611_v19, %v9568_v44  ;;  %v9590_v29 = vand.u32 4294901760, %v3625_v46 }
 0x2fd   : > { %6754 = vmatprep.subr.mxu0 %v9523_v2  ;;  %10557 = vst [vmem:[#allocation60_spill] sm:$0xff] %v9561_v51  ;;  %10558 = vst [vmem:[#allocation61_spill] sm:$0xff] %v9563_v43  ;;  %6787 = vmatprep.subr.mxu1 %v9561_v51  ;;  %v3955_v33 = vsub.f32 %v9549_v47, %v9573_v30  ;;  %v9602_v53 = vsub.f32 %v3626_v0, %v9578_v24 }
 0x2fe   : > { %10559 = vst [vmem:[#allocation62_spill] sm:$0xff] %v9566_v6  ;;  %10560 = vst [vmem:[#allocation63_spill] sm:$0xff] %v9568_v44  ;;  %6755 = vmatpush3.msra.mxu0 %v9535_v13  ;;  %v9592_v13 = vand.u32 4294901760, %v3609_v42  ;;  %v9605_v19 = vsub.f32 %v3610_v5, %v9580_v7  ;;  %6788 = vmatpush3.msra.mxu1 %v9563_v43  ;;  %v9612_v51 = vand.u32 4294901760, %v9588_v1 }
 0x2ff   : > { %10561 = vst [vmem:[#allocation64_spill] sm:$0xff] %v9573_v30  ;;  %10562 = vst [vmem:[#allocation65_spill] sm:$0xff] %v9576_v16  ;;  %6756 = vmatprep.subr.mxu0 %v9551_v55  ;;  %v9599_v55 = vand.u32 4294901760, %v9576_v16  ;;  %v9615_v30 = vsub.f32 %v3625_v46, %v9590_v29  ;;  %v9621_v5 = vand.u32 4294901760, %v3955_v33  ;;  %v9626_v43 = vand.u32 4294901760, %v9602_v53 }
 0x300   : > { %10563 = vst [vmem:[#allocation66_spill] sm:$0xff] %v9578_v24  ;;  %10564 = vst [vmem:[#allocation67_spill] sm:$0xff] %v9580_v7  ;;  %6757 = vmatpush3.msra.mxu0 %v9568_v44  ;;  %v3843_v44 = vsub.f32 %v9566_v6, %v9585_v4  ;;  %v9618_v47 = vsub.f32 %v3609_v42, %v9592_v13  ;;  %v3850_v42 = vsub.f32 %v9588_v1, %v9612_v51 }
 0x301   : > { %10565 = vst [vmem:[#allocation68_spill] sm:$0xff] %v9585_v4  ;;  %10566 = vst [vmem:[#allocation69_spill] sm:$0xff] %v9588_v1  ;;  %6758 = vmatprep.subr.mxu0 %v9578_v24  ;;  %v3962_v0 = vsub.f32 %v9576_v16, %v9599_v55  ;;  %v9629_v4 = vand.u32 4294901760, %v9605_v19  ;;  %v9637_v6 = vand.u32 4294901760, %v9615_v30  ;;  %6789 = vmatprep.subr.mxu1 %v9621_v5 }
 0x302   : > { %10567 = vst [vmem:[#allocation70_spill] sm:$0xff] %v9590_v29  ;;  %10568 = vst [vmem:[#allocation71_spill] sm:$0xff] %v9592_v13  ;;  %6759 = vmatpush3.msra.mxu0 %v9580_v7  ;;  %v9632_v46 = vand.u32 4294901760, %v3843_v44  ;;  %v9640_v33 = vand.u32 4294901760, %v9618_v47  ;;  %v3969_v16 = vsub.f32 %v9602_v53, %v9626_v43 }
 0x303   : > { %10569 = vst [vmem:[#allocation72_spill] sm:$0xff] %v9599_v55  ;;  %10570 = vst [vmem:[#allocation73_spill] sm:$0xff] %v9602_v53  ;;  %6760 = vmatprep.subr.mxu0 %v9590_v29  ;;  %v9644_v55 = vand.u32 4294901760, %v3962_v0  ;;  %v3857_v44 = vsub.f32 %v9605_v19, %v9629_v4  ;;  %v3976_v1 = vsub.f32 %v9615_v30, %v9637_v6 }
 0x304   : > { %10571 = vst [vmem:[#allocation74_spill] sm:$0xff] %v9605_v19  ;;  %10572 = vst [vmem:[#allocation75_spill] sm:$0xff] %v9612_v51  ;;  %6761 = vmatpush3.msra.mxu0 %v9592_v13  ;;  %6790 = vmatpush3.msra.mxu1 %v9632_v46  ;;  %v9652_v51 = vand.u32 4294901760, %v3850_v42  ;;  %v3864_v0 = vsub.f32 %v9618_v47, %v9640_v33 }
 0x305   : > { %10573 = vst [vmem:[#allocation76_spill] sm:$0xff] %v9615_v30  ;;  %10574 = vst [vmem:[#allocation77_spill] sm:$0xff] %v9618_v47  ;;  %6800 = vmatprep.subr.mxu0 %v9141_v27  ;;  %6791 = vmatprep.subr.mxu1 %v9644_v55  ;;  %v9664_v27 = vand.u32 4294901760, %v3976_v1 }
 0x306   : > { %10575 = vst [vmem:[#allocation78_spill] sm:$0xff] %v9621_v5  ;;  %10576 = vst [vmem:[#allocation79_spill] sm:$0xff] %v9626_v43  ;;  %v9659_v5 = vand.u32 4294901760, %v3969_v16  ;;  %v9661_v43 = vand.u32 4294901760, %v3857_v44  ;;  %6792 = vmatpush3.msra.mxu1 %v9652_v51  ;;  %v2744_v16 = vlaneseq  ;;  %v2742_v44 = vld [vmem:[%s471_s13] sm:$0x3]  ;;  %s484_s13 = scalar_lea.vmem %s10170_s11, %s6496_s18 }
 0x307   : > { %10577 = vst [vmem:[#allocation80_spill] sm:$0xff] %v9629_v4  ;;  %10578 = vst [vmem:[#allocation81_spill] sm:$0xff] %v9632_v46  ;;  %v9666_v46 = vand.u32 4294901760, %v3864_v0 }
 0x308   : > { %10579 = vst [vmem:[#allocation82_spill] sm:$0xff] %v9637_v6  ;;  %10580 = vst [vmem:[#allocation83_spill] sm:$0xff] %v9640_v33  ;;  %6793 = vmatprep.subr.mxu1 %v9659_v5  ;;  %v2745_v42 = vshrl.u32 %v2744_v16, 7 }
 0x309   : > { %10581 = vst [vmem:[#allocation84_spill] sm:$0xff] %v9644_v55  ;;  %10582 = vst [vmem:[#allocation85_spill] sm:$0xff] %v9652_v51  ;;  %6794 = vmatpush3.msra.mxu1 %v9661_v43 }
 0x30a   : > { %10583 = vst [vmem:[#allocation86_spill] sm:$0xff] %v9659_v5  ;;  %10584 = vst [vmem:[#allocation87_spill] sm:$0xff] %v9661_v43  ;;  %6795 = vmatprep.subr.mxu1 %v9664_v27  ;;  %v9679_v1 = vsub.s32 0, %v2745_v42  ;;  %v9681_v0 = vsub.s32 1, %v2745_v42 }
 0x30b   : > { %10585 = vst [vmem:[#allocation88_spill] sm:$0xff] %v9664_v27  ;;  %10586 = vst [vmem:[#allocation89_spill] sm:$0xff] %v9666_v46  ;;  %6796 = vmatpush3.msra.mxu1 %v9666_v46 }
 0x30c   : > { %6835 = vmatprep.subr.mxu1 %v9130_v25  ;;  %10587 = vst [vmem:[#allocation90_spill] sm:$0xff] %v9679_v1  ;;  %10588 = vst [vmem:[#allocation91_spill] sm:$0xff] %v9681_v0  ;;  %v2747_v27 = vrot.slane %v2742_v44, %v9679_v1  ;;  %v2751_v46 = vrot.slane %v2742_v44, %v9681_v0 }
 0x35b   : > { %v3089_v5 = vpop.f32.mrf.mxu1 }
 0x35d   : > { %v3091_v6 = vpop.f32.mrf.mxu1 }
 0x363   : > { %v2857_v43 = vpop.f32.mrf.mxu0 }
 0x364   : > { %v2858_v55 = vadd.f32 %v2857_v43, %v2747_v27 }
 0x365   : > { %v2859_v51 = vpop.f32.mrf.mxu0 }
 0x366   : > { %v2860_v16 = vadd.f32 %v2859_v51, %v2751_v46  ;;  %v3090_v4 = vadd.f32 %v3089_v5, %v2858_v55  ;;  %v10594_v5 = vld [vmem:[#allocation40_spill] sm:$0xff]  ;;  %v10595_v46 = vld [vmem:[#allocation63_spill] sm:$0xff] }
 0x368   : > { %v3092_v53 = vadd.f32 %v3091_v6, %v2860_v16  ;;  %v10590_v6 = vld [vmem:[#allocation36_spill] sm:$0xff]  ;;  %v10599_v16 = vld [vmem:[#allocation67_spill] sm:$0xff] }
 0x37b   : > { %v3332_v47 = vpop.f32.mrf.mxu1 }
 0x37d   : > { %v3334_v13 = vpop.f32.mrf.mxu1 }
 0x384   : > { %v3226_v33 = vpop.f32.mrf.mxu0 }
 0x385   : > { %v3227_v19 = vadd.f32 %v3226_v33, %v3090_v4  ;;  %v10592_v4 = vld [vmem:[#allocation38_spill] sm:$0xff] }
 0x386   : > { %v3228_v30 = vpop.f32.mrf.mxu0  ;;  %v10596_v33 = vld [vmem:[#allocation42_spill] sm:$0xff] }
 0x387   : > { %v3229_v25 = vadd.f32 %v3228_v30, %v3092_v53  ;;  %v3333_v42 = vadd.f32 %v3332_v47, %v3227_v19  ;;  %v10593_v19 = vld [vmem:[#allocation59_spill] sm:$0xff] }
 0x389   : > { %v3335_v1 = vadd.f32 %v3334_v13, %v3229_v25 }
 0x39d   : > { %v3604_v29 = vpop.f32.mrf.mxu1 }
 0x39f   : > { %v3606_v27 = vpop.f32.mrf.mxu1 }
 0x3a5   : > { %v3500_v7 = vpop.f32.mrf.mxu0 }
 0x3a6   : > { %v3501_v24 = vadd.f32 %v3500_v7, %v3333_v42  ;;  %v10591_v7 = vld [vmem:[#allocation55_spill] sm:$0xff]  ;;  %v10600_v42 = vld [vmem:[#allocation45_spill] sm:$0xff] }
 0x3a7   : > { %v3502_v8 = vpop.f32.mrf.mxu0 }
 0x3a8   : > { %v9685_v44 = vadd.f32 %v3604_v29, %v3501_v24  ;;  %v3503_v0 = vadd.f32 %v3502_v8, %v3335_v1  ;;  %v10597_v1 = vld [vmem:[#allocation66_spill] sm:$0xff] }
 0x3aa   : > { %v9687_v43 = vadd.f32 %v3606_v27, %v3503_v0  ;;  %v9690_v55 = vand.u32 4294901760, %v9685_v44  ;;  %v10598_v0 = vld [vmem:[#allocation43_spill] sm:$0xff]  ;;  %v10601_v27 = vld [vmem:[#allocation70_spill] sm:$0xff] }
 0x3ac   : > { %10589 = vst [vmem:[#allocation92_spill] sm:$0xff] %v9687_v43  ;;  %v9693_v51 = vand.u32 4294901760, %v9687_v43  ;;  %v9697_v47 = vsub.f32 %v9685_v44, %v9690_v55 }
 0x3ae   : > { %3980 = vmatprep.mubr.f32.mxu1 %v9693_v51  ;;  %v3740_v25 = vsub.f32 %v9687_v43, %v9693_v51  ;;  %v3747_v53 = vand.u32 4294901760, %v9697_v47 }
 0x3af   : > { %3982 = vmatmul.mubr.f32.vlgmr.msra.gmra.mxu1 %v9690_v55 }
 0x3b0   : > { %6836 = vmatpush3.msra.mxu1 %v9135_v26  ;;  %v3741_v30 = vand.u32 4294901760, %v3740_v25  ;;  %v3748_v8 = vsub.f32 %v9697_v47, %v3747_v53 }
 0x3b1   : > { %6837 = vmatprep.subr.mxu1 %v9143_v48 }
 0x3b2   : > { %6838 = vmatpush3.msra.mxu1 %v9152_v21  ;;  %4224 = vmatprep.mubr.f32.mxu1 %v3741_v30  ;;  %v3742_v13 = vsub.f32 %v3740_v25, %v3741_v30  ;;  %v3749_v29 = vand.u32 4294901760, %v3748_v8  ;;  %v10603_v30 = vld [vmem:[#allocation71_spill] sm:$0xff]  ;;  %v10604_v8 = vld [vmem:[#allocation58_spill] sm:$0xff] }
 0x3b3   : > { %6839 = vmatprep.subr.mxu1 %v9170_v31 }
 0x3b4   : > { %6840 = vmatpush3.msra.mxu1 %v9172_v58  ;;  %v3743_v24 = vand.u32 4294901760, %v3742_v13  ;;  %v10605_v13 = vld [vmem:[#allocation3_spill] sm:$0xff] }
 0x3b5   : > { %6841 = vmatprep.subr.mxu1 %v9184_v18 }
 0x3b6   : > { %6842 = vmatpush3.msra.mxu1 %v9186_v34  ;;  %3744 = vmatprep.mubr.f32.mxu0 %v3743_v24  ;;  %v10606_v24 = vld [vmem:[#allocation62_spill] sm:$0xff] }
 0x3b7   : > { %6843 = vmatprep.subr.mxu1 %v9251_v32  ;;  %3750 = vmatmul.mubr.f32.vlgmr.msra.gmra.mxu0 %v3749_v29  ;;  %v10607_v29 = vld [vmem:[#allocation65_spill] sm:$0xff] }
 0x3b8   : > { %6801 = vmatpush3.msra.mxu0 %v9150_v36  ;;  %6844 = vmatpush3.msra.mxu1 %v9263_v15 }
 0x3b9   : > { %6802 = vmatprep.subr.mxu0 %v9168_v37  ;;  %4117 = vmatprep.mubr.f32.mxu0 %v3740_v25  ;;  %v10602_v25 = vld [vmem:[#allocation46_spill] sm:$0xff] }
 0x3ba   : > { %6845 = vmatprep.subr.mxu1 %v9279_v14  ;;  %6803 = vmatpush3.msra.mxu0 %v9182_v49 }
 0x3bb   : > { %6846 = vmatpush3.msra.mxu1 %v9293_v40  ;;  %6804 = vmatprep.subr.mxu0 %v9195_v23 }
 0x3bc   : > { %6847 = vmatprep.subr.mxu1 %v9303_v11  ;;  %6805 = vmatpush3.msra.mxu0 %v9198_v45 }
 0x3bd   : > { %6848 = vmatpush3.msra.mxu1 %v9305_v22  ;;  %6806 = vmatprep.subr.mxu0 %v9207_v56 }
 0x3be   : > { %6849 = vmatprep.subr.mxu1 %v9318_v41  ;;  %6807 = vmatpush3.msra.mxu0 %v9210_v62 }
 0x3bf   : > { %6850 = vmatpush3.msra.mxu1 %v9320_v3  ;;  %6808 = vmatprep.subr.mxu0 %v9277_v63 }
 0x3c0   : > { %6851 = vmatprep.subr.mxu1 %v9387_v10  ;;  %6809 = vmatpush3.msra.mxu0 %v9291_v35 }
 0x3c1   : > { %6852 = vmatpush3.msra.mxu1 %v9399_v61  ;;  %6810 = vmatprep.subr.mxu0 %v9301_v52 }
 0x3c2   : > { %6853 = vmatprep.subr.mxu1 %v9415_v20  ;;  %6811 = vmatpush3.msra.mxu0 %v9316_v38 }
 0x3c3   : > { %6854 = vmatpush3.msra.mxu1 %v9432_v17  ;;  %6812 = vmatprep.subr.mxu0 %v9330_v9 }
 0x3c4   : > { %6855 = vmatprep.subr.mxu1 %v9442_v54  ;;  %6813 = vmatpush3.msra.mxu0 %v9333_v50 }
 0x3c5   : > { %6856 = vmatpush3.msra.mxu1 %v9444_v39  ;;  %6814 = vmatprep.subr.mxu0 %v9343_v12 }
 0x3c6   : > { %6857 = vmatprep.subr.mxu1 %v9454_v60  ;;  %6815 = vmatpush3.msra.mxu0 %v9346_v59 }
 0x3c7   : > { %6858 = vmatpush3.msra.mxu1 %v9456_v57  ;;  %6816 = vmatprep.subr.mxu0 %v9413_v28 }
 0x3c8   : > { %6859 = vmatprep.subr.mxu1 %v9523_v2  ;;  %6817 = vmatpush3.msra.mxu0 %v10590_v6 }
 0x3c9   : > { %6860 = vmatpush3.msra.mxu1 %v10591_v7  ;;  %6818 = vmatprep.subr.mxu0 %v10592_v4 }
 0x3ca   : > { %6861 = vmatprep.subr.mxu1 %v10593_v19  ;;  %6819 = vmatpush3.msra.mxu0 %v10594_v5  ;;  %v10647_v5 = vld [vmem:[#allocation17_spill] sm:$0xff] }
 0x3cb   : > { %6862 = vmatpush3.msra.mxu1 %v10595_v46  ;;  %6820 = vmatprep.subr.mxu0 %v10596_v33  ;;  %v10645_v33 = vld [vmem:[#allocation13_spill] sm:$0xff] }
 0x3cc   : > { %6863 = vmatprep.subr.mxu1 %v10597_v1  ;;  %6821 = vmatpush3.msra.mxu0 %v10598_v0  ;;  %v10643_v0 = vld [vmem:[#allocation12_spill] sm:$0xff] }
 0x3cd   : > { %6864 = vmatpush3.msra.mxu1 %v10599_v16  ;;  %6822 = vmatprep.subr.mxu0 %v10600_v42  ;;  %v10612_v42 = vld [vmem:[#allocation77_spill] sm:$0xff] }
 0x3ce   : > { %6865 = vmatprep.subr.mxu1 %v10601_v27  ;;  %6823 = vmatpush3.msra.mxu0 %v10602_v25  ;;  %v10608_v25 = vld [vmem:[#allocation69_spill] sm:$0xff] }
 0x3cf   : > { %6866 = vmatpush3.msra.mxu1 %v10603_v30  ;;  %6824 = vmatprep.subr.mxu0 %v10604_v8  ;;  %v10609_v8 = vld [vmem:[#allocation73_spill] sm:$0xff] }
 0x3d0   : > { %4228 = vmatmul.mubr.f32.vlgmr.msra.gmra.mxu1 %v3747_v53  ;;  %6905 = vmatprep.subr.mxu1 %v10605_v13  ;;  %v10610_v53 = vld [vmem:[#allocation74_spill] sm:$0xff] }
 0x3d1   : > { %6825 = vmatpush3.msra.mxu0 %v10606_v24  ;;  %6906 = vmatpush3.msra.mxu1 %v9135_v26  ;;  %v10611_v24 = vld [vmem:[#allocation76_spill] sm:$0xff] }
 0x3d2   : > { %4498 = vmatprep.mubr.f32.mxu1 %v9693_v51  ;;  %6826 = vmatprep.subr.mxu0 %v10607_v29  ;;  %v10641_v29 = vld [vmem:[#allocation8_spill] sm:$0xff] }
 0x3d3   : > { %6907 = vmatprep.subr.mxu1 %v9143_v48  ;;  %6827 = vmatpush3.msra.mxu0 %v10608_v25  ;;  %v10613_v25 = vld [vmem:[#allocation11_spill] sm:$0xff] }
 0x3d4   : > { %6908 = vmatpush3.msra.mxu1 %v9152_v21  ;;  %6828 = vmatprep.subr.mxu0 %v10609_v8  ;;  %v10614_v8 = vld [vmem:[#allocation5_spill] sm:$0xff] }
 0x3d5   : > { %6909 = vmatprep.subr.mxu1 %v9170_v31  ;;  %6829 = vmatpush3.msra.mxu0 %v10610_v53  ;;  %v10615_v53 = vld [vmem:[#allocation14_spill] sm:$0xff] }
 0x3d6   : > { %6910 = vmatpush3.msra.mxu1 %v9172_v58  ;;  %6830 = vmatprep.subr.mxu0 %v10611_v24  ;;  %v10616_v24 = vld [vmem:[#allocation6_spill] sm:$0xff] }
 0x3d7   : > { %6911 = vmatprep.subr.mxu1 %v9184_v18  ;;  %6831 = vmatpush3.msra.mxu0 %v10612_v42  ;;  %v10617_v42 = vld [vmem:[#allocation7_spill] sm:$0xff] }
 0x3d8   : > { %6912 = vmatpush3.msra.mxu1 %v9186_v34  ;;  %4120 = vmatmul.mubr.f32.vlgmr.msra.gmra.mxu0 %v9697_v47  ;;  %v10618_v47 = vld [vmem:[#allocation16_spill] sm:$0xff] }
 0x3d9   : > { %6870 = vmatprep.subr.mxu0 %v10613_v25  ;;  %6913 = vmatprep.subr.mxu1 %v9251_v32  ;;  %v10636_v25 = vld [vmem:[#allocation51_spill] sm:$0xff] }
 0x3da   : > { %6871 = vmatpush3.msra.mxu0 %v10614_v8  ;;  %4394 = vmatprep.mubr.f32.mxu0 %v9693_v51  ;;  %v10619_v8 = vld [vmem:[#allocation9_spill] sm:$0xff]  ;;  %v10620_v51 = vld [vmem:[#allocation10_spill] sm:$0xff] }
 0x3db   : > { %6914 = vmatpush3.msra.mxu1 %v9263_v15  ;;  %6872 = vmatprep.subr.mxu0 %v10615_v53  ;;  %v10621_v53 = vld [vmem:[#allocation21_spill] sm:$0xff] }
 0x3dc   : > { %6915 = vmatprep.subr.mxu1 %v9279_v14  ;;  %6873 = vmatpush3.msra.mxu0 %v10616_v24  ;;  %v10622_v24 = vld [vmem:[#allocation2_spill] sm:$0xff] }
 0x3dd   : > { %6916 = vmatpush3.msra.mxu1 %v9293_v40  ;;  %6874 = vmatprep.subr.mxu0 %v10617_v42  ;;  %v10623_v42 = vld [vmem:[#allocation22_spill] sm:$0xff] }
 0x3de   : > { %6917 = vmatprep.subr.mxu1 %v9303_v11  ;;  %6875 = vmatpush3.msra.mxu0 %v10618_v47  ;;  %v10624_v47 = vld [vmem:[#allocation23_spill] sm:$0xff] }
 0x3df   : > { %6918 = vmatpush3.msra.mxu1 %v9305_v22  ;;  %6876 = vmatprep.subr.mxu0 %v10619_v8  ;;  %v10625_v8 = vld [vmem:[#allocation25_spill] sm:$0xff] }
 0x3e0   : > { %6919 = vmatprep.subr.mxu1 %v9318_v41  ;;  %6877 = vmatpush3.msra.mxu0 %v10620_v51  ;;  %v10626_v51 = vld [vmem:[#allocation26_spill] sm:$0xff] }
 0x3e1   : > { %6920 = vmatpush3.msra.mxu1 %v9320_v3  ;;  %6878 = vmatprep.subr.mxu0 %v10621_v53  ;;  %v4507_v53 = vmul.f32 %v9687_v43, %v9687_v43  ;;  %v10632_v43 = vld [vmem:[#allocation41_spill] sm:$0xff] }
 0x3e2   : > { %6921 = vmatprep.subr.mxu1 %v9387_v10  ;;  %6879 = vmatpush3.msra.mxu0 %v10622_v24  ;;  %v10627_v24 = vld [vmem:[#allocation28_spill] sm:$0xff] }
 0x3e3   : > { %6922 = vmatpush3.msra.mxu1 %v9399_v61  ;;  %6880 = vmatprep.subr.mxu0 %v10623_v42  ;;  %v10628_v42 = vld [vmem:[#allocation29_spill] sm:$0xff] }
 0x3e4   : > { %6923 = vmatprep.subr.mxu1 %v9415_v20  ;;  %6881 = vmatpush3.msra.mxu0 %v10624_v47  ;;  %v10629_v47 = vld [vmem:[#allocation37_spill] sm:$0xff] }
 0x3e5   : > { %6924 = vmatpush3.msra.mxu1 %v9432_v17  ;;  %6882 = vmatprep.subr.mxu0 %v10625_v8  ;;  %v10630_v8 = vld [vmem:[#allocation39_spill] sm:$0xff] }
 0x3e6   : > { %6925 = vmatprep.subr.mxu1 %v9442_v54  ;;  %6883 = vmatpush3.msra.mxu0 %v10626_v51  ;;  %v9819_v51 = vand.u32 4294901760, %v4507_v53 }
 0x3e7   : > { %6926 = vmatpush3.msra.mxu1 %v9444_v39  ;;  %6884 = vmatprep.subr.mxu0 %v10627_v24  ;;  %v10633_v24 = vld [vmem:[#allocation44_spill] sm:$0xff] }
 0x3e8   : > { %6927 = vmatprep.subr.mxu1 %v9454_v60  ;;  %6885 = vmatpush3.msra.mxu0 %v10628_v42  ;;  %10631 = vst [vmem:[#allocation36_spill] sm:$0xff] %v9819_v51  ;;  %v10634_v42 = vld [vmem:[#allocation48_spill] sm:$0xff] }
 0x3e9   : > { %6928 = vmatpush3.msra.mxu1 %v9456_v57  ;;  %6886 = vmatprep.subr.mxu0 %v10629_v47  ;;  %v10635_v47 = vld [vmem:[#allocation49_spill] sm:$0xff] }
 0x3ea   : > { %6929 = vmatprep.subr.mxu1 %v9523_v2  ;;  %6887 = vmatpush3.msra.mxu0 %v10630_v8  ;;  %v9830_v8 = vsub.f32 %v4507_v53, %v9819_v51  ;;  %v10640_v53 = vld [vmem:[#allocation68_spill] sm:$0xff] }
 0x3eb   : > { %6930 = vmatpush3.msra.mxu1 %v10591_v7  ;;  %6888 = vmatprep.subr.mxu0 %v10632_v43  ;;  %v10637_v43 = vld [vmem:[#allocation52_spill] sm:$0xff] }
 0x3ec   : > { %6931 = vmatprep.subr.mxu1 %v10593_v19  ;;  %6889 = vmatpush3.msra.mxu0 %v10633_v24  ;;  %v10638_v24 = vld [vmem:[#allocation64_spill] sm:$0xff] }
 0x3ed   : > { %6932 = vmatpush3.msra.mxu1 %v10595_v46  ;;  %6890 = vmatprep.subr.mxu0 %v10634_v42  ;;  %v10639_v42 = vld [vmem:[#allocation15_spill] sm:$0xff] }
 0x3ee   : > { %6933 = vmatprep.subr.mxu1 %v10597_v1  ;;  %6891 = vmatpush3.msra.mxu0 %v10635_v47  ;;  %v10403_v47 = vand.u32 4294901760, %v9830_v8 }
 0x3ef   : > { %6934 = vmatpush3.msra.mxu1 %v10599_v16  ;;  %6892 = vmatprep.subr.mxu0 %v10636_v25  ;;  %v10642_v25 = vld [vmem:[#allocation72_spill] sm:$0xff] }
 0x3f0   : > { %6935 = vmatprep.subr.mxu1 %v10601_v27  ;;  %6893 = vmatpush3.msra.mxu0 %v10637_v43  ;;  %v10644_v43 = vld [vmem:[#allocation75_spill] sm:$0xff] }
 0x3f1   : > { %6936 = vmatpush3.msra.mxu1 %v10603_v30  ;;  %6894 = vmatprep.subr.mxu0 %v10638_v24  ;;  %v10646_v24 = vld [vmem:[#allocation79_spill] sm:$0xff] }
 0x3f2   : > { %4500 = vmatmul.mubr.f32.vlgmr.msra.gmra.mxu1 %v9690_v55  ;;  %6975 = vmatprep.subr.mxu1 %v10639_v42  ;;  %v4607_v42 = vsub.f32 %v9830_v8, %v10403_v47  ;;  %v10654_v47 = vld [vmem:[#allocation24_spill] sm:$0xff] }
 0x3f3   : > { %6895 = vmatpush3.msra.mxu0 %v10640_v53  ;;  %6976 = vmatpush3.msra.mxu1 %v10641_v29  ;;  %v10648_v53 = vld [vmem:[#allocation80_spill] sm:$0xff]  ;;  %v10649_v29 = vld [vmem:[#allocation18_spill] sm:$0xff] }
 0x3f4   : > { %4845 = vmatprep.mubr.f32.mxu1 %v9819_v51  ;;  %6896 = vmatprep.subr.mxu0 %v10642_v25  ;;  %v10650_v51 = vld [vmem:[#allocation82_spill] sm:$0xff]  ;;  %v10651_v25 = vld [vmem:[#allocation19_spill] sm:$0xff] }
 0x3f5   : > { %6977 = vmatprep.subr.mxu1 %v10643_v0  ;;  %6897 = vmatpush3.msra.mxu0 %v10644_v43  ;;  %v10652_v0 = vld [vmem:[#allocation83_spill] sm:$0xff]  ;;  %v10653_v43 = vld [vmem:[#allocation20_spill] sm:$0xff] }
 0x3f6   : > { %6978 = vmatpush3.msra.mxu1 %v10645_v33  ;;  %6898 = vmatprep.subr.mxu0 %v10646_v24  ;;  %v4608_v33 = vand.u32 4294901760, %v4607_v42  ;;  %v10661_v42 = vld [vmem:[#allocation35_spill] sm:$0xff] }
 0x3f7   : > { %6979 = vmatprep.subr.mxu1 %v10647_v5  ;;  %6899 = vmatpush3.msra.mxu0 %v10648_v53  ;;  %v10655_v5 = vld [vmem:[#allocation27_spill] sm:$0xff] }
 0x3f8   : > { %6980 = vmatpush3.msra.mxu1 %v10649_v29  ;;  %6900 = vmatprep.subr.mxu0 %v10650_v51  ;;  %v10656_v29 = vld [vmem:[#allocation30_spill] sm:$0xff] }
 0x3f9   : > { %6981 = vmatprep.subr.mxu1 %v10651_v25  ;;  %6901 = vmatpush3.msra.mxu0 %v10652_v0  ;;  %v10657_v25 = vld [vmem:[#allocation31_spill] sm:$0xff] }
 0x3fa   : > { %6982 = vmatpush3.msra.mxu1 %v10653_v43  ;;  %4396 = vmatmul.mubr.f32.vlgmr.msra.gmra.mxu0 %v9690_v55  ;;  %v10658_v43 = vld [vmem:[#allocation32_spill] sm:$0xff]  ;;  %v10659_v55 = vld [vmem:[#allocation33_spill] sm:$0xff] }
 0x3fb   : > { %6940 = vmatprep.subr.mxu0 %v10605_v13  ;;  %6983 = vmatprep.subr.mxu1 %v10654_v47  ;;  %v10660_v47 = vld [vmem:[#allocation34_spill] sm:$0xff] }
 0x3fc   : > { %6941 = vmatpush3.msra.mxu0 %v9135_v26  ;;  %4609 = vmatprep.mubr.f32.mxu0 %v4608_v33  ;;  %v10662_v33 = vld [vmem:[#allocation47_spill] sm:$0xff] }
 0x3fd   : > { %6984 = vmatpush3.msra.mxu1 %v10655_v5  ;;  %6942 = vmatprep.subr.mxu0 %v9143_v48  ;;  %v10663_v5 = vld [vmem:[#allocation50_spill] sm:$0xff] }
 0x3fe   : > { %6985 = vmatprep.subr.mxu1 %v10656_v29  ;;  %6943 = vmatpush3.msra.mxu0 %v9152_v21  ;;  %v10664_v29 = vld [vmem:[#allocation53_spill] sm:$0xff] }
 0x3ff   : > { %6986 = vmatpush3.msra.mxu1 %v10657_v25  ;;  %6944 = vmatprep.subr.mxu0 %v9170_v31  ;;  %v4506_v25 = vmul.f32 %v9685_v44, %v9685_v44 }
 0x400   : > { %6987 = vmatprep.subr.mxu1 %v10658_v43  ;;  %6945 = vmatpush3.msra.mxu0 %v9172_v58  ;;  %v10665_v43 = vld [vmem:[#allocation54_spill] sm:$0xff] }
 0x401   : > { %6988 = vmatpush3.msra.mxu1 %v10659_v55  ;;  %6946 = vmatprep.subr.mxu0 %v9184_v18  ;;  %v10666_v55 = vld [vmem:[#allocation56_spill] sm:$0xff] }
 0x402   : > { %6989 = vmatprep.subr.mxu1 %v10660_v47  ;;  %6947 = vmatpush3.msra.mxu0 %v9186_v34  ;;  %v10667_v47 = vld [vmem:[#allocation57_spill] sm:$0xff] }
 0x403   : > { %6990 = vmatpush3.msra.mxu1 %v10661_v42  ;;  %6948 = vmatprep.subr.mxu0 %v9251_v32  ;;  %v10668_v42 = vld [vmem:[#allocation60_spill] sm:$0xff] }
 0x404   : > { %6991 = vmatprep.subr.mxu1 %v10662_v33  ;;  %6949 = vmatpush3.msra.mxu0 %v9263_v15  ;;  %v9893_v33 = vand.u32 4294901760, %v4506_v25 }
 0x405   : > { %6992 = vmatpush3.msra.mxu1 %v10663_v5  ;;  %6950 = vmatprep.subr.mxu0 %v9279_v14  ;;  %v10669_v5 = vld [vmem:[#allocation61_spill] sm:$0xff] }
 0x406   : > { %6993 = vmatprep.subr.mxu1 %v10664_v29  ;;  %6951 = vmatpush3.msra.mxu0 %v9293_v40  ;;  %v10670_v29 = vld [vmem:[#allocation78_spill] sm:$0xff] }
 0x407   : > { %6994 = vmatpush3.msra.mxu1 %v10665_v43  ;;  %6952 = vmatprep.subr.mxu0 %v9303_v11  ;;  %v10671_v43 = vld [vmem:[#allocation81_spill] sm:$0xff] }
 0x408   : > { %6995 = vmatprep.subr.mxu1 %v10666_v55  ;;  %6953 = vmatpush3.msra.mxu0 %v9305_v22  ;;  %v10672_v55 = vld [vmem:[#allocation84_spill] sm:$0xff] }
 0x409   : > { %6996 = vmatpush3.msra.mxu1 %v10667_v47  ;;  %6954 = vmatprep.subr.mxu0 %v9318_v41  ;;  %v9904_v47 = vsub.f32 %v4506_v25, %v9893_v33  ;;  %v10677_v25 = vld [vmem:[#allocation89_spill] sm:$0xff] }
 0x40a   : > { %6997 = vmatprep.subr.mxu1 %v10668_v42  ;;  %6955 = vmatpush3.msra.mxu0 %v9320_v3  ;;  %v10673_v42 = vld [vmem:[#allocation85_spill] sm:$0xff] }
 0x40b   : > { %6998 = vmatpush3.msra.mxu1 %v10669_v5  ;;  %6956 = vmatprep.subr.mxu0 %v9387_v10  ;;  %v10674_v5 = vld [vmem:[#allocation86_spill] sm:$0xff] }
 0x40c   : > { %6999 = vmatprep.subr.mxu1 %v10670_v29  ;;  %6957 = vmatpush3.msra.mxu0 %v9399_v61  ;;  %v10675_v29 = vld [vmem:[#allocation87_spill] sm:$0xff] }
 0x40d   : > { %7000 = vmatpush3.msra.mxu1 %v10671_v43  ;;  %6958 = vmatprep.subr.mxu0 %v9415_v20  ;;  %v10676_v43 = vld [vmem:[#allocation88_spill] sm:$0xff] }
 0x40e   : > { %7001 = vmatprep.subr.mxu1 %v10672_v55  ;;  %6959 = vmatpush3.msra.mxu0 %v9432_v17  ;;  %v4612_v55 = vand.u32 4294901760, %v9904_v47 }
 0x40f   : > { %7002 = vmatpush3.msra.mxu1 %v10673_v42  ;;  %6960 = vmatprep.subr.mxu0 %v9442_v54  ;;  %v10678_v42 = vand.u32 4294901760, %v9830_v8 }
 0x410   : > { %7003 = vmatprep.subr.mxu1 %v10674_v5  ;;  %6961 = vmatpush3.msra.mxu0 %v9444_v39  ;;  %v4613_v5 = vsub.f32 %v9904_v47, %v4612_v55 }
 0x411   : > { %7004 = vmatpush3.msra.mxu1 %v10675_v29  ;;  %6962 = vmatprep.subr.mxu0 %v9454_v60 }
 0x412   : > { %7005 = vmatprep.subr.mxu1 %v10676_v43  ;;  %6963 = vmatpush3.msra.mxu0 %v9456_v57  ;;  %v4614_v29 = vand.u32 4294901760, %v4613_v5  ;;  %v10679_v43 = vld [vmem:[#allocation4_spill] sm:$0xff] }
 0x413   : > { %7006 = vmatpush3.msra.mxu1 %v10677_v25  ;;  %6964 = vmatprep.subr.mxu0 %v9523_v2  ;;  %v10718_v5 = vld [vmem:[#allocation64_spill] sm:$0xff] }
 0x414   : > { %4847 = vmatmul.mubr.f32.vlgmr.msra.gmra.mxu1 %v9893_v33  ;;  %7045 = vmatprep.subr.mxu1 %v10605_v13 }
 0x415   : > { %6965 = vmatpush3.msra.mxu0 %v10591_v7  ;;  %7046 = vmatpush3.msra.mxu1 %v9135_v26 }
 0x416   : > { %5089 = vmatprep.mubr.f32.mxu1 %v10678_v42  ;;  %6966 = vmatprep.subr.mxu0 %v10593_v19 }
 0x417   : > { %7047 = vmatprep.subr.mxu1 %v9143_v48  ;;  %6967 = vmatpush3.msra.mxu0 %v10595_v46 }
 0x418   : > { %7048 = vmatpush3.msra.mxu1 %v9152_v21  ;;  %6968 = vmatprep.subr.mxu0 %v10597_v1 }
 0x419   : > { %7049 = vmatprep.subr.mxu1 %v9170_v31  ;;  %6969 = vmatpush3.msra.mxu0 %v10599_v16 }
 0x41a   : > { %7050 = vmatpush3.msra.mxu1 %v9172_v58  ;;  %6970 = vmatprep.subr.mxu0 %v10601_v27 }
 0x41b   : > { %7051 = vmatprep.subr.mxu1 %v9184_v18  ;;  %6971 = vmatpush3.msra.mxu0 %v10603_v30 }
 0x41c   : > { %7052 = vmatpush3.msra.mxu1 %v9186_v34  ;;  %4615 = vmatmul.mubr.f32.vlgmr.msra.gmra.mxu0 %v4614_v29 }
 0x41d   : > { %7010 = vmatprep.subr.mxu0 %v10679_v43  ;;  %7053 = vmatprep.subr.mxu1 %v9251_v32 }
 0x41e   : > { %7011 = vmatpush3.msra.mxu0 %v9150_v36  ;;  %4982 = vmatprep.mubr.f32.mxu0 %v9830_v8  ;;  %v10680_v36 = vld [vmem:[#allocation40_spill] sm:$0xff] }
 0x41f   : > { %7054 = vmatpush3.msra.mxu1 %v9263_v15  ;;  %7012 = vmatprep.subr.mxu0 %v9168_v37  ;;  %v10681_v37 = vld [vmem:[#allocation42_spill] sm:$0xff] }
 0x420   : > { %7055 = vmatprep.subr.mxu1 %v9279_v14  ;;  %7013 = vmatpush3.msra.mxu0 %v9182_v49  ;;  %v10682_v49 = vld [vmem:[#allocation43_spill] sm:$0xff] }
 0x421   : > { %7056 = vmatpush3.msra.mxu1 %v9293_v40  ;;  %7014 = vmatprep.subr.mxu0 %v9195_v23  ;;  %v10683_v23 = vld [vmem:[#allocation45_spill] sm:$0xff] }
 0x422   : > { %7057 = vmatprep.subr.mxu1 %v9303_v11  ;;  %7015 = vmatpush3.msra.mxu0 %v9198_v45  ;;  %v10684_v45 = vld [vmem:[#allocation46_spill] sm:$0xff] }
 0x423   : > { %7058 = vmatpush3.msra.mxu1 %v9305_v22  ;;  %7016 = vmatprep.subr.mxu0 %v9207_v56  ;;  %v10685_v56 = vld [vmem:[#allocation58_spill] sm:$0xff] }
 0x424   : > { %7059 = vmatprep.subr.mxu1 %v9318_v41  ;;  %7017 = vmatpush3.msra.mxu0 %v9210_v62  ;;  %v10686_v62 = vld [vmem:[#allocation62_spill] sm:$0xff] }
 0x425   : > { %7060 = vmatpush3.msra.mxu1 %v9320_v3  ;;  %7018 = vmatprep.subr.mxu0 %v9277_v63  ;;  %v10687_v63 = vld [vmem:[#allocation36_spill] sm:$0xff] }
 0x426   : > { %7061 = vmatprep.subr.mxu1 %v9387_v10  ;;  %7019 = vmatpush3.msra.mxu0 %v9291_v35  ;;  %v10688_v35 = vld [vmem:[#allocation65_spill] sm:$0xff] }
 0x427   : > { %7062 = vmatpush3.msra.mxu1 %v9399_v61  ;;  %7020 = vmatprep.subr.mxu0 %v9301_v52  ;;  %v10689_v52 = vld [vmem:[#allocation69_spill] sm:$0xff] }
 0x428   : > { %7063 = vmatprep.subr.mxu1 %v9415_v20  ;;  %7021 = vmatpush3.msra.mxu0 %v9316_v38  ;;  %v10690_v38 = vld [vmem:[#allocation73_spill] sm:$0xff] }
 0x429   : > { %7064 = vmatpush3.msra.mxu1 %v9432_v17  ;;  %7022 = vmatprep.subr.mxu0 %v9330_v9  ;;  %v10691_v9 = vld [vmem:[#allocation74_spill] sm:$0xff] }
 0x42a   : > { %7065 = vmatprep.subr.mxu1 %v9442_v54  ;;  %7023 = vmatpush3.msra.mxu0 %v9333_v50  ;;  %v10692_v50 = vld [vmem:[#allocation76_spill] sm:$0xff] }
 0x42b   : > { %7066 = vmatpush3.msra.mxu1 %v9444_v39  ;;  %7024 = vmatprep.subr.mxu0 %v9343_v12 }
 0x42c   : > { %7067 = vmatprep.subr.mxu1 %v9454_v60  ;;  %7025 = vmatpush3.msra.mxu0 %v9346_v59  ;;  %v10701_v59 = vld [vmem:[#allocation10_spill] sm:$0xff] }
 0x42d   : > { %7068 = vmatpush3.msra.mxu1 %v9456_v57  ;;  %7026 = vmatprep.subr.mxu0 %v9413_v28  ;;  %v10702_v28 = vld [vmem:[#allocation21_spill] sm:$0xff] }
 0x42e   : > { %7069 = vmatprep.subr.mxu1 %v9523_v2  ;;  %7027 = vmatpush3.msra.mxu0 %v10590_v6 }
 0x42f   : > { %7070 = vmatpush3.msra.mxu1 %v10591_v7  ;;  %7028 = vmatprep.subr.mxu0 %v10592_v4 }
 0x430   : > { %7071 = vmatprep.subr.mxu1 %v10593_v19  ;;  %7029 = vmatpush3.msra.mxu0 %v10680_v36 }
 0x431   : > { %7072 = vmatpush3.msra.mxu1 %v10595_v46  ;;  %7030 = vmatprep.subr.mxu0 %v10681_v37 }
 0x432   : > { %7073 = vmatprep.subr.mxu1 %v10597_v1  ;;  %7031 = vmatpush3.msra.mxu0 %v10682_v49 }
 0x433   : > { %7074 = vmatpush3.msra.mxu1 %v10599_v16  ;;  %7032 = vmatprep.subr.mxu0 %v10683_v23 }
 0x434   : > { %7075 = vmatprep.subr.mxu1 %v10601_v27  ;;  %7033 = vmatpush3.msra.mxu0 %v10684_v45 }
 0x435   : > { %7076 = vmatpush3.msra.mxu1 %v10603_v30  ;;  %7034 = vmatprep.subr.mxu0 %v10685_v56 }
 0x436   : > { %5093 = vmatmul.mubr.f32.vlgmr.msra.gmra.mxu1 %v4612_v55  ;;  %7115 = vmatprep.subr.mxu1 %v10605_v13  ;;  %v10714_v55 = vld [vmem:[#allocation48_spill] sm:$0xff] }
 0x437   : > { %7035 = vmatpush3.msra.mxu0 %v10686_v62  ;;  %7116 = vmatpush3.msra.mxu1 %v9135_v26  ;;  %v10693_v26 = vld [vmem:[#allocation77_spill] sm:$0xff] }
 0x438   : > { %5363 = vmatprep.mubr.f32.mxu1 %v10687_v63  ;;  %7036 = vmatprep.subr.mxu0 %v10688_v35 }
 0x439   : > { %7117 = vmatprep.subr.mxu1 %v9143_v48  ;;  %7037 = vmatpush3.msra.mxu0 %v10689_v52  ;;  %v10694_v48 = vld [vmem:[#allocation11_spill] sm:$0xff] }
 0x43a   : > { %7118 = vmatpush3.msra.mxu1 %v9152_v21  ;;  %7038 = vmatprep.subr.mxu0 %v10690_v38  ;;  %v10695_v21 = vld [vmem:[#allocation5_spill] sm:$0xff] }
 0x43b   : > { %7119 = vmatprep.subr.mxu1 %v9170_v31  ;;  %7039 = vmatpush3.msra.mxu0 %v10691_v9  ;;  %v10696_v31 = vld [vmem:[#allocation14_spill] sm:$0xff] }
 0x43c   : > { %7120 = vmatpush3.msra.mxu1 %v9172_v58  ;;  %7040 = vmatprep.subr.mxu0 %v10692_v50  ;;  %v10697_v58 = vld [vmem:[#allocation6_spill] sm:$0xff] }
 0x43d   : > { %7121 = vmatprep.subr.mxu1 %v9184_v18  ;;  %7041 = vmatpush3.msra.mxu0 %v10693_v26  ;;  %v3642_v18 = vld [vmem:[%s10169_s10 + $0x8] sm:$0xff] }
 0x43e   : > { %7122 = vmatpush3.msra.mxu1 %v9186_v34  ;;  %4985 = vmatmul.mubr.f32.vlgmr.msra.gmra.mxu0 %v9904_v47  ;;  %v10698_v34 = vld [vmem:[#allocation7_spill] sm:$0xff]  ;;  %v10027_v12 = vand.u32 4294901760, %v3642_v18  ;;  %v10713_v47 = vld [vmem:[#allocation44_spill] sm:$0xff] }
 0x43f   : > { %7080 = vmatprep.subr.mxu0 %v10694_v48  ;;  %7123 = vmatprep.subr.mxu1 %v9251_v32  ;;  %v3641_v32 = vld [vmem:[%s10169_s10] sm:$0xff] }
 0x440   : > { %7081 = vmatpush3.msra.mxu0 %v10695_v21  ;;  %5259 = vmatprep.mubr.f32.mxu0 %v10687_v63  ;;  %v10040_v6 = vsub.f32 %v3642_v18, %v10027_v12 }
 0x441   : > { %7124 = vmatpush3.msra.mxu1 %v9263_v15  ;;  %7082 = vmatprep.subr.mxu0 %v10696_v31  ;;  %v10699_v15 = vld [vmem:[#allocation16_spill] sm:$0xff] }
 0x442   : > { %7125 = vmatprep.subr.mxu1 %v9279_v14  ;;  %7083 = vmatpush3.msra.mxu0 %v10697_v58  ;;  %v10700_v14 = vld [vmem:[#allocation9_spill] sm:$0xff]  ;;  %v10054_v8 = vand.u32 4294901760, %v10040_v6 }
 0x443   : > { %7126 = vmatpush3.msra.mxu1 %v9293_v40  ;;  %7084 = vmatprep.subr.mxu0 %v10698_v34  ;;  %v10031_v40 = vand.u32 4294901760, %v3641_v32 }
 0x444   : > { %7127 = vmatprep.subr.mxu1 %v9303_v11  ;;  %7085 = vmatpush3.msra.mxu0 %v10699_v15  ;;  %v10703_v11 = vld [vmem:[#allocation2_spill] sm:$0xff] }
 0x445   : > { %7128 = vmatpush3.msra.mxu1 %v9305_v22  ;;  %7086 = vmatprep.subr.mxu0 %v10700_v14  ;;  %v10704_v22 = vld [vmem:[#allocation22_spill] sm:$0xff]  ;;  %v10045_v4 = vsub.f32 %v3641_v32, %v10031_v40 }
 0x446   : > { %7129 = vmatprep.subr.mxu1 %v9318_v41  ;;  %7087 = vmatpush3.msra.mxu0 %v10701_v59  ;;  %v10705_v41 = vld [vmem:[#allocation23_spill] sm:$0xff] }
 0x447   : > { %7130 = vmatpush3.msra.mxu1 %v9320_v3  ;;  %7088 = vmatprep.subr.mxu0 %v10702_v28  ;;  %v10706_v3 = vld [vmem:[#allocation25_spill] sm:$0xff]  ;;  %v10059_v13 = vand.u32 4294901760, %v10045_v4 }
 0x448   : > { %7131 = vmatprep.subr.mxu1 %v9387_v10  ;;  %7089 = vmatpush3.msra.mxu0 %v10703_v11  ;;  %v10707_v10 = vld [vmem:[#allocation26_spill] sm:$0xff] }
 0x449   : > { %7132 = vmatpush3.msra.mxu1 %v9399_v61  ;;  %7090 = vmatprep.subr.mxu0 %v10704_v22  ;;  %v10708_v61 = vld [vmem:[#allocation28_spill] sm:$0xff] }
 0x44a   : > { %7133 = vmatprep.subr.mxu1 %v9415_v20  ;;  %7091 = vmatpush3.msra.mxu0 %v10705_v41  ;;  %v10709_v20 = vld [vmem:[#allocation29_spill] sm:$0xff] }
 0x44b   : > { %7134 = vmatpush3.msra.mxu1 %v9432_v17  ;;  %7092 = vmatprep.subr.mxu0 %v10706_v3  ;;  %v10710_v17 = vld [vmem:[#allocation37_spill] sm:$0xff] }
 0x44c   : > { %7135 = vmatprep.subr.mxu1 %v9442_v54  ;;  %7093 = vmatpush3.msra.mxu0 %v10707_v10  ;;  %v10711_v54 = vld [vmem:[#allocation39_spill] sm:$0xff] }
 0x44d   : > { %7136 = vmatpush3.msra.mxu1 %v9444_v39  ;;  %7094 = vmatprep.subr.mxu0 %v10708_v61  ;;  %v10712_v39 = vld [vmem:[#allocation41_spill] sm:$0xff] }
 0x44e   : > { %7137 = vmatprep.subr.mxu1 %v9454_v60  ;;  %7095 = vmatpush3.msra.mxu0 %v10709_v20  ;;  %v5490_v60 = vsub.f32 %v10040_v6, %v10054_v8 }
 0x44f   : > { %7138 = vmatpush3.msra.mxu1 %v9456_v57  ;;  %7096 = vmatprep.subr.mxu0 %v10710_v17  ;;  %v5496_v57 = vsub.f32 %v10045_v4, %v10059_v13 }
 0x450   : > { %7139 = vmatprep.subr.mxu1 %v9523_v2  ;;  %7097 = vmatpush3.msra.mxu0 %v10711_v54  ;;  %v10715_v2 = vld [vmem:[#allocation49_spill] sm:$0xff]  ;;  %v5491_v25 = vand.u32 4294901760, %v5490_v60 }
 0x451   : > { %7140 = vmatpush3.msra.mxu1 %v10591_v7  ;;  %7098 = vmatprep.subr.mxu0 %v10712_v39  ;;  %v10716_v7 = vld [vmem:[#allocation51_spill] sm:$0xff]  ;;  %v5497_v42 = vand.u32 4294901760, %v5496_v57 }
 0x452   : > { %7141 = vmatprep.subr.mxu1 %v10593_v19  ;;  %7099 = vmatpush3.msra.mxu0 %v10713_v47  ;;  %v10717_v19 = vld [vmem:[#allocation52_spill] sm:$0xff] }
 0x453   : > { %7142 = vmatpush3.msra.mxu1 %v10595_v46  ;;  %7100 = vmatprep.subr.mxu0 %v10714_v55  ;;  %v10719_v46 = vld [vmem:[#allocation68_spill] sm:$0xff] }
 0x454   : > { %7143 = vmatprep.subr.mxu1 %v10597_v1  ;;  %7101 = vmatpush3.msra.mxu0 %v10715_v2  ;;  %v10720_v1 = vld [vmem:[#allocation72_spill] sm:$0xff] }
 0x455   : > { %7144 = vmatpush3.msra.mxu1 %v10599_v16  ;;  %7102 = vmatprep.subr.mxu0 %v10716_v7  ;;  %v10721_v16 = vld [vmem:[#allocation75_spill] sm:$0xff] }
 0x456   : > { %7145 = vmatprep.subr.mxu1 %v10601_v27  ;;  %7103 = vmatpush3.msra.mxu0 %v10717_v19  ;;  %v10722_v27 = vmov 0.0  }
 0x457   : > { %7146 = vmatpush3.msra.mxu1 %v10603_v30  ;;  %7104 = vmatprep.subr.mxu0 %v10718_v5 }
 0x458   : > { %5365 = vmatmul.mubr.f32.vlgmr.msra.gmra.mxu1 %v9893_v33  ;;  %7105 = vmatpush3.msra.mxu0 %v10719_v46 }
 0x459   : > { %7106 = vmatprep.subr.mxu0 %v10720_v1  ;;  %5492 = vmatprep.subr.mxu1 %v5491_v25 }
 0x45a   : > { %7107 = vmatpush3.msra.mxu0 %v10721_v16  ;;  %5498 = vmatpush1.msra.mxu1 %v5497_v42 }
 0x45b   : > { %7108 = vmatprep.subr.mxu0 %v10646_v24  ;;  %5531 = vmatprep.mubr.f32.mxu1 %v10722_v27 }
 0x45c   : > { %7109 = vmatpush3.msra.mxu0 %v10648_v53  ;;  %5647 = vmatprep.subr.mxu1 %v10027_v12 }
 0x45d   : > { %7110 = vmatprep.subr.mxu0 %v10650_v51 }
 0x45e   : > { %7111 = vmatpush3.msra.mxu0 %v10652_v0 }
 0x45f   : > { %5261 = vmatmul.mubr.f32.vlgmr.msra.gmra.mxu0 %v9893_v33  ;;  %5410 = vmatprep.subr.mxu0 %v10027_v12 }
 0x460   : > { %5412 = vmatpush1.msra.mxu0 %v10031_v40  ;;  %5445 = vmatprep.mubr.f32.mxu0 %v10722_v27 }
 0x461   : > { %5571 = vmatprep.subr.mxu0 %v10040_v6 }
 0x46f   : > { %v6797_v24 = vpop.f32.mrf.mxu1 }
 0x471   : > { %v6798_v43 = vpop.f32.mrf.mxu1 }
 0x472   : > { %v6799_v49 = vadd.f32 %v6798_v43, %v6797_v24 }
 0x477   : > { %v6762_v30 = vpop.f32.mrf.mxu0 }
 0x479   : > { %v6763_v29 = vpop.f32.mrf.mxu0 }
 0x47a   : > { %v6764_v51 = vadd.f32 %v6763_v29, %v6762_v30 }
 0x47c   : > { %v3984_v33 = vadd.f32 %v6799_v49, %v6764_v51 }
 0x490   : > { %v6867_v36 = vpop.f32.mrf.mxu1 }
 0x492   : > { %v6868_v23 = vpop.f32.mrf.mxu1 }
 0x493   : > { %v6869_v63 = vadd.f32 %v6868_v23, %v6867_v36 }
 0x498   : > { %v6832_v53 = vpop.f32.mrf.mxu0 }
 0x49a   : > { %v6833_v37 = vpop.f32.mrf.mxu0 }
 0x49b   : > { %v6834_v0 = vadd.f32 %v6833_v37, %v6832_v53 }
 0x49d   : > { %v4122_v56 = vadd.f32 %v6834_v0, %v3984_v33 }
 0x49f   : > { %v4230_v38 = vadd.f32 %v6869_v63, %v4122_v56 }
 0x4b2   : > { %v6937_v45 = vpop.f32.mrf.mxu1 }
 0x4b4   : > { %v6938_v35 = vpop.f32.mrf.mxu1 }
 0x4b5   : > { %v6939_v50 = vadd.f32 %v6938_v35, %v6937_v45 }
 0x4ba   : > { %v6902_v62 = vpop.f32.mrf.mxu0 }
 0x4bc   : > { %v6903_v52 = vpop.f32.mrf.mxu0 }
 0x4bd   : > { %v6904_v9 = vadd.f32 %v6903_v52, %v6902_v62 }
 0x4bf   : > { %v4398_v26 = vadd.f32 %v6904_v9, %v4230_v38 }
 0x4c1   : > { %v4502_v48 = vadd.f32 %v6939_v50, %v4398_v26 }
 0x4c3   : > { %v4505_v21 = vmul.f32 0.03125, %v4502_v48 }
 0x4c5   : > { %v5377_v31 = vsel %vm1793_vm1, %v4505_v21, 0  ;;  %v5371_v5 = vmul.f32 %v4505_v21, %v4505_v21 }
 0x4c6   : > { %v5446_v58 = vand.u32 4294901760, %v5377_v31 }
 0x4c8   : > { %5533 = vmatmul.mubr.f32.vlgmr.msra.gmra.mxu1 %v5446_v58  ;;  %v5447_v18 = vsub.f32 %v5377_v31, %v5446_v58 }
 0x4c9   : > { %5649 = vmatpush1.msra.mxu1 %v10031_v40  ;;  %5682 = vmatprep.mubr.f32.mxu1 %v10722_v27 }
 0x4ca   : > { %v5448_v34 = vand.u32 4294901760, %v5447_v18  ;;  %5801 = vmatprep.subr.mxu1 %v10027_v12 }
 0x4cc   : > { %5686 = vmatmul.mubr.f32.vlgmr.msra.gmra.mxu1 %v5448_v34  ;;  %v5449_v32 = vsub.f32 %v5447_v18, %v5448_v34 }
 0x4cd   : > { %5803 = vmatpush1.msra.mxu1 %v10031_v40  ;;  %5836 = vmatprep.mubr.f32.mxu1 %v10722_v27 }
 0x4ce   : > { %v5450_v15 = vand.u32 4294901760, %v5449_v32  ;;  %5960 = vmatprep.subr.mxu1 %v5491_v25 }
 0x4d0   : > { %5451 = vmatmul.mubr.f32.vlgmr.msra.gmra.mxu0 %v5450_v15  ;;  %5838 = vmatmul.mubr.f32.vlgmr.msra.gmra.mxu1 %v5446_v58 }
 0x4d1   : > { %5574 = vmatpush1.msra.mxu0 %v10045_v4  ;;  %5607 = vmatprep.mubr.f32.mxu0 %v10722_v27 }
 0x4d2   : > { %5725 = vmatprep.subr.mxu0 %v10054_v8  ;;  %5966 = vmatpush1.msra.mxu1 %v5497_v42 }
 0x4d3   : > { %5999 = vmatprep.mubr.f32.mxu1 %v10722_v27  ;;  %6115 = vmatprep.subr.mxu1 %v10027_v12 }
 0x4d4   : > { %5610 = vmatmul.mubr.f32.vlgmr.msra.gmra.mxu0 %v5447_v18  ;;  %v7007_v59 = vpop.f32.mrf.mxu1 }
 0x4d5   : > { %5729 = vmatpush1.msra.mxu0 %v10059_v13  ;;  %5762 = vmatprep.mubr.f32.mxu0 %v10722_v27 }
 0x4d6   : > { %5878 = vmatprep.subr.mxu0 %v10027_v12  ;;  %v7008_v22 = vpop.f32.mrf.mxu1 }
 0x4d7   : > { %v7009_v61 = vadd.f32 %v7008_v22, %v7007_v59 }
 0x4d8   : > { %5764 = vmatmul.mubr.f32.vlgmr.msra.gmra.mxu0 %v5446_v58 }
 0x4d9   : > { %5880 = vmatpush1.msra.mxu0 %v10031_v40  ;;  %5913 = vmatprep.mubr.f32.mxu0 %v10722_v27 }
 0x4da   : > { %6039 = vmatprep.subr.mxu0 %v10040_v6 }
 0x4dc   : > { %v6972_v14 = vpop.f32.mrf.mxu0 }
 0x4de   : > { %v6973_v28 = vpop.f32.mrf.mxu0 }
 0x4df   : > { %v6974_v10 = vadd.f32 %v6973_v28, %v6972_v14 }
 0x4e1   : > { %v4849_v54 = vadd.f32 %v7009_v61, %v6974_v10  ;;  %v6316_v61 = vld [vmem:[%s10164_s5] sm:$0x3] }
 0x4f6   : > { %v7077_v41 = vpop.f32.mrf.mxu1 }
 0x4f8   : > { %v7078_v17 = vpop.f32.mrf.mxu1 }
 0x4f9   : > { %v7079_v57 = vadd.f32 %v7078_v17, %v7077_v41 }
 0x4fe   : > { %v7042_v11 = vpop.f32.mrf.mxu0 }
 0x500   : > { %v7043_v3 = vpop.f32.mrf.mxu0 }
 0x501   : > { %v7044_v20 = vadd.f32 %v7043_v3, %v7042_v11 }
 0x503   : > { %v4987_v60 = vadd.f32 %v7044_v20, %v4849_v54  ;;  %v6330_v54 = vld [vmem:[%s10165_s6] sm:$0x3] }
 0x505   : > { %v5095_v7 = vadd.f32 %v7079_v57, %v4987_v60 }
 0x518   : > { %v7147_v39 = vpop.f32.mrf.mxu1 }
 0x51a   : > { %v7148_v55 = vpop.f32.mrf.mxu1 }
 0x51b   : > { %v7149_v25 = vadd.f32 %v7148_v55, %v7147_v39  ;;  %v10723_v55 = vld [vmem:[#allocation90_spill] sm:$0xff] }
 0x51f   : > { %v7112_v47 = vpop.f32.mrf.mxu0 }
 0x521   : > { %v7113_v2 = vpop.f32.mrf.mxu0 }
 0x522   : > { %v7114_v6 = vadd.f32 %v7113_v2, %v7112_v47  ;;  %v6321_v2 = vrot.slane %v6316_v61, %v10723_v55 }
 0x524   : > { %v5263_v19 = vadd.f32 %v7114_v6, %v5095_v7 }
 0x526   : > { %v5367_v42 = vadd.f32 %v7149_v25, %v5263_v19  ;;  %v6335_v25 = vrot.slane %v6330_v54, %v10723_v55  ;;  %v10724_v19 = vld [vmem:[#allocation92_spill] sm:$0xff] }
 0x528   : > { %v5370_v46 = vmul.f32 0.03125, %v5367_v42 }
 0x52a   : > { %v5372_v1 = vsub.f32 %v5370_v46, %v5371_v5 }
 0x52c   : > { %v5373_v16 = vmax.f32 %v5372_v1, 0.0  ;;  %v10725_v1 = vld [vmem:[#allocation91_spill] sm:$0xff] }
 0x52e   : > { %v5374_v30 = vadd.f32 1e-05, %v5373_v16  ;;  %v6325_v16 = vrot.slane %v6316_v61, %v10725_v1 }
 0x530   : > { %7674 = vrsqrt.f32 %v5374_v30 }
 0x53d   : > { %v7675_v24 = vpop.eup %7674 }
 0x53e   : > { %v5845_v29 = vsel %vm1793_vm1, %v7675_v24, 0 }
 0x53f   : > { %v5914_v53 = vand.u32 4294901760, %v5845_v29 }
 0x541   : > { %v5915_v43 = vsub.f32 %v5845_v29, %v5914_v53  ;;  %6001 = vmatmul.mubr.f32.vlgmr.msra.gmra.mxu1 %v5914_v53  ;;  %v6339_v29 = vrot.slane %v6330_v54, %v10725_v1 }
 0x542   : > { %6117 = vmatpush1.msra.mxu1 %v10031_v40  ;;  %6150 = vmatprep.mubr.f32.mxu1 %v10722_v27 }
 0x543   : > { %v5916_v36 = vand.u32 4294901760, %v5915_v43  ;;  %6269 = vmatprep.subr.mxu1 %v10027_v12 }
 0x545   : > { %6154 = vmatmul.mubr.f32.vlgmr.msra.gmra.mxu1 %v5916_v36  ;;  %v5917_v37 = vsub.f32 %v5915_v43, %v5916_v36 }
 0x546   : > { %6271 = vmatpush1.msra.mxu1 %v10031_v40  ;;  %6304 = vmatprep.mubr.f32.mxu1 %v10722_v27 }
 0x547   : > { %v5918_v51 = vand.u32 4294901760, %v5917_v37 }
 0x549   : > { %5919 = vmatmul.mubr.f32.vlgmr.msra.gmra.mxu0 %v5918_v51  ;;  %6306 = vmatmul.mubr.f32.vlgmr.msra.gmra.mxu1 %v5914_v53 }
 0x54a   : > { %6042 = vmatpush1.msra.mxu0 %v10045_v4  ;;  %6075 = vmatprep.mubr.f32.mxu0 %v10722_v27 }
 0x54b   : > { %6193 = vmatprep.subr.mxu0 %v10054_v8 }
 0x54d   : > { %6078 = vmatmul.mubr.f32.vlgmr.msra.gmra.mxu0 %v5915_v43 }
 0x54e   : > { %6197 = vmatpush1.msra.mxu0 %v10059_v13  ;;  %6230 = vmatprep.mubr.f32.mxu0 %v10722_v27 }
 0x551   : > { %6232 = vmatmul.mubr.f32.vlgmr.msra.gmra.mxu0 %v5914_v53 }
 0x588   : > { %v5534_v12 = vpop.f32.mrf.mxu1 }
 0x58a   : > { %v5536_v49 = vpop.f32.mrf.mxu1 }
 0x58c   : > { %v5687_v40 = vpop.f32.mrf.mxu1 }
 0x58e   : > { %v5689_v23 = vpop.f32.mrf.mxu1 }
 0x590   : > { %v5452_v0 = vpop.f32.mrf.mxu0  ;;  %v5839_v45 = vpop.f32.mrf.mxu1 }
 0x591   : > { %v5535_v35 = vadd.f32 %v5534_v12, %v5452_v0 }
 0x592   : > { %v5454_v33 = vpop.f32.mrf.mxu0  ;;  %v5841_v62 = vpop.f32.mrf.mxu1 }
 0x593   : > { %v5537_v8 = vadd.f32 %v5536_v49, %v5454_v33 }
 0x594   : > { %v5611_v56 = vpop.f32.mrf.mxu0 }
 0x595   : > { %v5612_v38 = vadd.f32 %v5611_v56, %v5535_v35 }
 0x596   : > { %v5613_v4 = vpop.f32.mrf.mxu0 }
 0x597   : > { %v5614_v13 = vadd.f32 %v5613_v4, %v5537_v8  ;;  %v5688_v50 = vadd.f32 %v5687_v40, %v5612_v38 }
 0x598   : > { %v5765_v52 = vpop.f32.mrf.mxu0 }
 0x599   : > { %v5690_v21 = vadd.f32 %v5689_v23, %v5614_v13  ;;  %v5766_v58 = vadd.f32 %v5765_v52, %v5688_v50 }
 0x59a   : > { %v5767_v27 = vpop.f32.mrf.mxu0 }
 0x59b   : > { %v5768_v15 = vadd.f32 %v5767_v27, %v5690_v21  ;;  %v5840_v11 = vadd.f32 %v5839_v45, %v5766_v58 }
 0x59d   : > { %v5842_v20 = vadd.f32 %v5841_v62, %v5768_v15  ;;  %v6312_v47 = vsub.f32 %v9685_v44, %v5840_v11 }
 0x59f   : > { %v6313_v42 = vsub.f32 %v10724_v19, %v5842_v20 }
 0x601   : > { %v6002_v63 = vpop.f32.mrf.mxu1 }
 0x603   : > { %v6004_v9 = vpop.f32.mrf.mxu1 }
 0x605   : > { %v6155_v26 = vpop.f32.mrf.mxu1 }
 0x607   : > { %v6157_v34 = vpop.f32.mrf.mxu1 }
 0x609   : > { %v5920_v48 = vpop.f32.mrf.mxu0  ;;  %v6307_v3 = vpop.f32.mrf.mxu1 }
 0x60a   : > { %v6003_v18 = vadd.f32 %v6002_v63, %v5920_v48 }
 0x60b   : > { %v5922_v31 = vpop.f32.mrf.mxu0  ;;  %v6309_v6 = vpop.f32.mrf.mxu1 }
 0x60c   : > { %v6005_v14 = vadd.f32 %v6004_v9, %v5922_v31 }
 0x60d   : > { %v6079_v32 = vpop.f32.mrf.mxu0 }
 0x60e   : > { %v6080_v59 = vadd.f32 %v6079_v32, %v6003_v18 }
 0x60f   : > { %v6081_v28 = vpop.f32.mrf.mxu0 }
 0x610   : > { %v6082_v22 = vadd.f32 %v6081_v28, %v6005_v14  ;;  %v6156_v41 = vadd.f32 %v6155_v26, %v6080_v59 }
 0x611   : > { %v6233_v10 = vpop.f32.mrf.mxu0 }
 0x612   : > { %v6234_v17 = vadd.f32 %v6233_v10, %v6156_v41  ;;  %v6158_v39 = vadd.f32 %v6157_v34, %v6082_v22 }
 0x613   : > { %v6235_v60 = vpop.f32.mrf.mxu0 }
 0x614   : > { %v6308_v57 = vadd.f32 %v6307_v3, %v6234_v17  ;;  %v6236_v7 = vadd.f32 %v6235_v60, %v6158_v39 }
 0x616   : > { %v6314_v5 = vmul.f32 %v6312_v47, %v6308_v57  ;;  %v6310_v46 = vadd.f32 %v6309_v6, %v6236_v7 }
 0x618   : > { %v6328_v30 = vmul.f32 %v6321_v2, %v6314_v5  ;;  %v6315_v24 = vmul.f32 %v6313_v42, %v6310_v46 }
 0x61a   : > { %v6342_v44 = vadd.f32 %v6335_v25, %v6328_v30  ;;  %v6329_v53 = vmul.f32 %v6325_v16, %v6315_v24 }
 0x61c   : > { %6344 = vst [vmem:[%s484_s13] sm:$0xff] %v6342_v44  ;;  %v6343_v43 = vadd.f32 %v6339_v29, %v6329_v53 }
 0x61e   : > { %6345 = vst [vmem:[%s484_s13 + $0x8] sm:$0xff] %v6343_v43 }
 0x61f PF: > { %s21_s21 = sadd.s32 1, %s7715_s21   ;;  %s10726_s17 = smov %s7707_s19 }
 0x620   : > { %p18_p7 = scmp.ge.s32.totalorder %s21_s21, 6   ;;  %s10727_s18 = smov %s7711_s20 }
 0x621   : > { %s10728_s19 = smov %s10731_s22  ;;  %s10729_s20 = smov %s10735_s23 }
 0x622   :  { %20 = sbr.rel (!%p18_p7) target bundleno = 3 (0x3), region = 100 }

</bundles_post_ra>
